<compile_context>
chip_gen: v7x
topology: tpu7x:2x2x1
jax: 0.10.0
libtpu: 0.0.40
codegen_flags: <defaults>
</compile_context>

<pallas_src>
import functools

import numpy as np
import jax
import jax.numpy as jnp
from jax.experimental import pallas as pl
from jax.experimental.pallas import tpu as pltpu


_HWPAD1 = 1152   # 32*32 = 1024 flat spatial, zero-padded so all tap/pool slices fit
_HWPAD2 = 256    # conv1's pooled 15*15 = 225 map, emitted already padded for conv2


def _pick_block(n, cap):
    """Largest divisor of n that is <= cap (>= 1)."""
    cap = max(1, min(cap, n))
    for d in range(cap, 0, -1):
        if n % d == 0:
            return d
    return 1


# --------------------------------------------------------------------------
# Fused conv3x3(valid) + bias + ReLU + 2x2/2 max-pool (one conv layer)
# --------------------------------------------------------------------------

def _conv_relu_pool_kernel(x_ref, w_ref, b_ref, s_ref, o_ref, patch_ref, *,
                           Cin, W, HoW, Bt):
    """One grid step = Bt images.

    x_ref:     (Bt, Cin, HWpad)  bf16 flattened NCHW image, flat spatial axis
                                 zero-padded so every slice below is in range.
    w_ref:     (Cout, 9*Cin)     bf16 tap-major folded conv weights.
    b_ref:     (Cout, 1)         f32 bias.
    s_ref:     (HoW, Ncols)      bf16 0/1 pool-selection matrix (extra cols zero).
    o_ref:     (Bt, Cout, Ncols) bf16 pooled output.
    patch_ref: (9*Cin, Pext)     bf16 VMEM scratch, Pext = HoW + W + 1.
    """
    Pext = HoW + W + 1
    w = w_ref[...]
    bias = b_ref[...]
    sel = s_ref[...]
    for b in range(Bt):                       # static unroll over the batch block
        # im2col patch: 9 static shifted copies of the flat image.
        for t in range(9):
            dy, dx = divmod(t, 3)
            off = dy * W + dx
            patch_ref[pl.ds(t * Cin, Cin), :] = x_ref[b, :, pl.ds(off, Pext)]
        # 2x2 max-pool fused as a max over the 4 pool phases; each phase is ONE
        # bf16 MXU dot (K = 9*Cin folded) against a shifted view of the patch.
        m = None
        for s in (0, 1, W, W + 1):
            y = jnp.dot(w, patch_ref[:, pl.ds(s, HoW)],
                        preferred_element_type=jnp.float32)     # (Cout, HoW) f32
            m = y if m is None else jnp.maximum(m, y)
        m = jnp.maximum(m + bias, 0.0)                          # bias + ReLU (f32)
        # Compact the stride-2 pooled positions with a 0/1 selection matmul,
        # staying in the lane-dense (Cout, spatial) layout; full-block store.
        o_ref[b] = jnp.dot(m.astype(sel.dtype), sel,
                           preferred_element_type=jnp.float32).astype(o_ref.dtype)


def conv_relu_pool_pallas(x, w, b, sel, *, H, W, block_b=8):
    """x: (B, Cin, HWpad) bf16. Returns (B, Cout, Ncols) bf16 pooled output."""
    B, Cin, HWpad = x.shape
    Cout = w.shape[0]
    assert w.shape[1] == 9 * Cin
    Ho, Wo = H - 2, W - 2
    Hp, Wp = Ho // 2, Wo // 2
    HoW = Ho * W
    Ncols = sel.shape[1]
    assert sel.shape[0] == HoW and Ncols >= Hp * Wp
    # Every tap / pool-phase slice must stay inside the padded flat axis, and
    # the pool must never select a wrapped column (c >= W-2) or row.
    assert HWpad >= HoW + 3 * W + 3, (HWpad, HoW, W)
    assert 2 * Hp <= Ho and 2 * Wp <= Wo

    Bt = _pick_block(B, min(block_b, max(1, B // 2)))   # >=2 grid steps when B>=2
    grid = (B // Bt,)
    kernel = functools.partial(_conv_relu_pool_kernel, Cin=Cin, W=W, HoW=HoW, Bt=Bt)

    flops = 2 * B * (4 * Cout * 9 * Cin * HoW + Cout * HoW * Ncols)
    bytes_accessed = (B * Cin * HWpad + Cout * 9 * Cin + HoW * Ncols
                      + B * Cout * Ncols) * 2 + Cout * 4

    return pl.pallas_call(
        kernel,
        out_shape=jax.ShapeDtypeStruct((B, Cout, Ncols), jnp.bfloat16),
        grid=grid,
        in_specs=[
            pl.BlockSpec((Bt, Cin, HWpad), lambda i: (i, 0, 0)),
            pl.BlockSpec((Cout, 9 * Cin), lambda i: (0, 0)),
            pl.BlockSpec((Cout, 1), lambda i: (0, 0)),
            pl.BlockSpec((HoW, Ncols), lambda i: (0, 0)),
        ],
        out_specs=pl.BlockSpec((Bt, Cout, Ncols), lambda i: (i, 0, 0)),
        scratch_shapes=[pltpu.VMEM((9 * Cin, HoW + W + 1), jnp.bfloat16)],
        compiler_params=pltpu.CompilerParams(dimension_semantics=("parallel",)),
        cost_estimate=pl.CostEstimate(flops=flops, transcendentals=0,
                                      bytes_accessed=bytes_accessed),
    )(x, w, b, sel)


# --------------------------------------------------------------------------
# Fused MLP head: fc2(relu(fc1(x)))
# --------------------------------------------------------------------------

def _mlp_head_kernel(x_ref, w1_ref, b1_ref, w2_ref, b2_ref, o_ref):
    h = jnp.dot(x_ref[...], w1_ref[...], preferred_element_type=jnp.float32)
    h = jnp.maximum(h + b1_ref[...], 0.0)                       # (Bh, 128) f32
    y = jnp.dot(h.astype(w2_ref.dtype), w2_ref[...],
                preferred_element_type=jnp.float32)             # (Bh, 10) f32
    o_ref[...] = (y + b2_ref[...]).astype(o_ref.dtype)


def mlp_head_pallas(x, w1, b1, w2, b2):
    """x: (B, 1152) bf16. Returns (B, 10) f32 logits."""
    B, K1 = x.shape
    N1, N2 = w1.shape[1], w2.shape[1]
    # Batch-tile once B is large enough to give v7x megacore >=2 parallel steps
    # with 8-aligned blocks; small batches run as a single full block.
    Bh = 128 if (B >= 256 and B % 128 == 0) else B
    grid = (B // Bh,)
    flops = 2 * B * (K1 * N1 + N1 * N2)
    bytes_accessed = (B * K1 + K1 * N1 + N1 * N2) * 2 + (N1 + N2 + B * N2) * 4
    return pl.pallas_call(
        _mlp_head_kernel,
        out_shape=jax.ShapeDtypeStruct((B, N2), jnp.float32),
        grid=grid,
        in_specs=[
            pl.BlockSpec((Bh, K1), lambda i: (i, 0)),
            pl.BlockSpec((K1, N1), lambda i: (0, 0)),
            pl.BlockSpec((1, N1), lambda i: (0, 0)),
            pl.BlockSpec((N1, N2), lambda i: (0, 0)),
            pl.BlockSpec((1, N2), lambda i: (0, 0)),
        ],
        out_specs=pl.BlockSpec((Bh, N2), lambda i: (i, 0)),
        compiler_params=pltpu.CompilerParams(dimension_semantics=("parallel",)),
        cost_estimate=pl.CostEstimate(flops=flops, transcendentals=0,
                                      bytes_accessed=bytes_accessed),
    )(x, w1, b1, w2, b2)


# ------------------------------- forward -----------------------------------

def simple_cnn_forward(x_nchw, params):
    """x_nchw: (B, 3, 32, 32) f32. params: output of prepare_params()."""
    B = x_nchw.shape[0]
    # Flatten NCHW spatial, zero-pad the flat axis, cast ONCE to bf16 (the MXU
    # operand dtype). This is the only XLA-side data prep before the kernels.
    x = x_nchw.reshape(B, 3, 32 * 32).astype(jnp.bfloat16)
    x = jnp.pad(x, ((0, 0), (0, 0), (0, _HWPAD1 - 32 * 32)))
    # conv1 + ReLU + pool -> (B, 16, 256) bf16; cols >= 225 are exact zeros and
    # double as conv2's flat-spatial padding (no intermediate HBM pool pass).
    y = conv_relu_pool_pallas(x, params["conv1_w"], params["conv1_b"],
                              params["pool1_sel"], H=32, W=32)
    # conv2 + ReLU + pool -> (B, 32, 36) bf16.
    y = conv_relu_pool_pallas(y, params["conv2_w"], params["conv2_b"],
                              params["pool2_sel"], H=15, W=15)
    # torch.flatten(x, 1) on NCHW == row-major reshape; tiny XLA relayout gives
    # the head an already-bf16, lane-dense (B, 1152) slab.
    feats = y.reshape(B, 32 * 6 * 6)
    return mlp_head_pallas(feats, params["fc1_w"], params["fc1_b"],
                           params["fc2_w"], params["fc2_b"])


# ------------------------------ parameters ----------------------------------

def init_params(key):
    """Deterministic init in torch layouts (OIHW conv, (out,in) fc)."""
    ks = jax.random.split(key, 8)

    def u(k, shape, fan_in):
        bound = 1.0 / float(np.sqrt(fan_in))
        return jax.random.uniform(k, shape, jnp.float32, -bound, bound)

    return {
        "conv1_w": u(ks[0], (16, 3, 3, 3), 3 * 9),
        "conv1_b": u(ks[1], (16,), 3 * 9),
        "conv2_w": u(ks[2], (32, 16, 3, 3), 16 * 9),
        "conv2_b": u(ks[3], (32,), 16 * 9),
        "fc1_w":   u(ks[4], (128, 32 * 6 * 6), 32 * 6 * 6),
        "fc1_b":   u(ks[5], (128,), 32 * 6 * 6),
        "fc2_w":   u(ks[6], (10, 128), 128),
        "fc2_b":   u(ks[7], (10,), 128),
    }


def _fold_conv_w(w_oihw):
    """OIHW (O,I,3,3) -> (O, 9*I) bf16, column k = (dy*3+dx)*I + i (tap-major)."""
    O, I = w_oihw.shape[0], w_oihw.shape[1]
    return jnp.transpose(w_oihw, (0, 2, 3, 1)).reshape(O, 9 * I).astype(jnp.bfloat16)


def _pool_select_matrix(H, W, ncols):
    """0/1 matrix compacting flat conv positions 2rp*W+2cp into a dense pooled
    map of Hp*Wp columns (extra columns stay exactly zero)."""
    Ho, Wo = H - 2, W - 2
    Hp, Wp = Ho // 2, Wo // 2
    S = np.zeros((Ho * W, ncols), np.float32)
    for rp in range(Hp):
        for cp in range(Wp):
            S[(2 * rp) * W + 2 * cp, rp * Wp + cp] = 1.0
    return jnp.asarray(S, dtype=jnp.bfloat16)


def prepare_params(p):
    """One-time fold of all weight reordering / transposes / casts / constants
    (run once, outside the jitted forward)."""
    return {
        "conv1_w": _fold_conv_w(p["conv1_w"]),
        "conv1_b": p["conv1_b"].reshape(-1, 1).astype(jnp.float32),
        "conv2_w": _fold_conv_w(p["conv2_w"]),
        "conv2_b": p["conv2_b"].reshape(-1, 1).astype(jnp.float32),
        "pool1_sel": _pool_select_matrix(32, 32, _HWPAD2),   # (960, 256)
        "pool2_sel": _pool_select_matrix(15, 15, 6 * 6),     # (195, 36)
        "fc1_w": p["fc1_w"].T.astype(jnp.bfloat16),          # (1152, 128)
        "fc1_b": p["fc1_b"].reshape(1, -1).astype(jnp.float32),
        "fc2_w": p["fc2_w"].T.astype(jnp.bfloat16),          # (128, 10)
        "fc2_b": p["fc2_b"].reshape(1, -1).astype(jnp.float32),
    }


if __name__ == "__main__":
    key = jax.random.PRNGKey(0)
    k_x, k_p = jax.random.split(key)
    # Input must be 3x32x32 so 32 -> conv 30 -> pool 15 -> conv 13 -> pool 6,
    # matching fc1's 32*6*6 input size (as in the PyTorch module).
    x = jax.random.normal(k_x, (2, 3, 32, 32), dtype=jnp.float32)
    params = prepare_params(init_params(k_p))   # one-time weight/constant folding

    fwd = jax.jit(simple_cnn_forward)
    out = jax.block_until_ready(fwd(x, params))
    assert out.shape == (2, 10), out.shape
    assert bool(jnp.all(jnp.isfinite(out)))
    print("KERNEL_OK")
</pallas_src>

<mosaic_0001>
module attributes {stable_mosaic.version = 11 : i64} {
  func.func @_conv_relu_pool_kernel(%arg0: i32, %arg1: memref<1x16x256xbf16, #tpu.memory_space<vmem>>, %arg2: memref<32x144xbf16, #tpu.memory_space<vmem>>, %arg3: memref<32x1xf32, #tpu.memory_space<vmem>>, %arg4: memref<195x36xbf16, #tpu.memory_space<vmem>>, %arg5: memref<1x32x36xbf16, #tpu.memory_space<vmem>>, %arg6: memref<144x211xbf16, #tpu.memory_space<vmem>>) attributes {dimension_semantics = [#tpu.dimension_semantics<parallel>], iteration_bounds = array<i64: 2>, scalar_prefetch = 0 : i64, scratch_operands = 1 : i64, tpu.core_type = #tpu.core_type<tc>, window_params = [{transform_indices = @transform_0, window_bounds = array<i64: 1, 16, 256>}, {pipeline_mode = #tpu.pipeline_mode<synchronous>, transform_indices = @transform_1, window_bounds = array<i64: 32, 144>}, {pipeline_mode = #tpu.pipeline_mode<synchronous>, transform_indices = @transform_2, window_bounds = array<i64: 32, 1>}, {pipeline_mode = #tpu.pipeline_mode<synchronous>, transform_indices = @transform_3, window_bounds = array<i64: 195, 36>}, {transform_indices = @transform_4, window_bounds = array<i64: 1, 32, 36>}]} {
    %c0 = arith.constant 0 : index
    %c0_0 = arith.constant 0 : index
    %0 = vector.load %arg2[%c0, %c0_0] : memref<32x144xbf16, #tpu.memory_space<vmem>>, vector<32x144xbf16>
    %c0_1 = arith.constant 0 : index
    %c0_2 = arith.constant 0 : index
    %1 = vector.load %arg3[%c0_1, %c0_2] : memref<32x1xf32, #tpu.memory_space<vmem>>, vector<32x1xf32>
    %c0_3 = arith.constant 0 : index
    %c0_4 = arith.constant 0 : index
    %2 = vector.load %arg4[%c0_3, %c0_4] : memref<195x36xbf16, #tpu.memory_space<vmem>>, vector<195x36xbf16>
    %c0_5 = arith.constant 0 : index
    %c0_6 = arith.constant 0 : index
    %c0_7 = arith.constant 0 : index
    %3 = vector.load %arg1[%c0_5, %c0_6, %c0_7] : memref<1x16x256xbf16, #tpu.memory_space<vmem>>, vector<1x16x211xbf16>
    %4 = vector.shape_cast %3 : vector<1x16x211xbf16> to vector<16x211xbf16>
    %c0_8 = arith.constant 0 : index
    %c0_9 = arith.constant 0 : index
    %5 = vector.load %arg6[%c0_8, %c0_9] : memref<144x211xbf16, #tpu.memory_space<vmem>>, vector<16x211xbf16>
    tpu.vector_store %arg6[%c0_8, %c0_9], %4 {strides = array<i32>} : memref<144x211xbf16, #tpu.memory_space<vmem>>, vector<16x211xbf16>,
    %c0_10 = arith.constant 0 : index
    %c0_11 = arith.constant 0 : index
    %c1 = arith.constant 1 : index
    %6 = vector.load %arg1[%c0_10, %c0_11, %c1] : memref<1x16x256xbf16, #tpu.memory_space<vmem>>, vector<1x16x211xbf16>
    %7 = vector.shape_cast %6 : vector<1x16x211xbf16> to vector<16x211xbf16>
    %c16 = arith.constant 16 : index
    %c0_12 = arith.constant 0 : index
    %8 = vector.load %arg6[%c16, %c0_12] : memref<144x211xbf16, #tpu.memory_space<vmem>>, vector<16x211xbf16>
    tpu.vector_store %arg6[%c16, %c0_12], %7 {strides = array<i32>} : memref<144x211xbf16, #tpu.memory_space<vmem>>, vector<16x211xbf16>,
    %c0_13 = arith.constant 0 : index
    %c0_14 = arith.constant 0 : index
    %c2 = arith.constant 2 : index
    %9 = vector.load %arg1[%c0_13, %c0_14, %c2] : memref<1x16x256xbf16, #tpu.memory_space<vmem>>, vector<1x16x211xbf16>
    %10 = vector.shape_cast %9 : vector<1x16x211xbf16> to vector<16x211xbf16>
    %c32 = arith.constant 32 : index
    %c0_15 = arith.constant 0 : index
    %11 = vector.load %arg6[%c32, %c0_15] : memref<144x211xbf16, #tpu.memory_space<vmem>>, vector<16x211xbf16>
    tpu.vector_store %arg6[%c32, %c0_15], %10 {strides = array<i32>} : memref<144x211xbf16, #tpu.memory_space<vmem>>, vector<16x211xbf16>,
    %c0_16 = arith.constant 0 : index
    %c0_17 = arith.constant 0 : index
    %c15 = arith.constant 15 : index
    %12 = vector.load %arg1[%c0_16, %c0_17, %c15] : memref<1x16x256xbf16, #tpu.memory_space<vmem>>, vector<1x16x211xbf16>
    %13 = vector.shape_cast %12 : vector<1x16x211xbf16> to vector<16x211xbf16>
    %c48 = arith.constant 48 : index
    %c0_18 = arith.constant 0 : index
    %14 = vector.load %arg6[%c48, %c0_18] : memref<144x211xbf16, #tpu.memory_space<vmem>>, vector<16x211xbf16>
    tpu.vector_store %arg6[%c48, %c0_18], %13 {strides = array<i32>} : memref<144x211xbf16, #tpu.memory_space<vmem>>, vector<16x211xbf16>,
    %c0_19 = arith.constant 0 : index
    %c0_20 = arith.constant 0 : index
    %c16_21 = arith.constant 16 : index
    %15 = vector.load %arg1[%c0_19, %c0_20, %c16_21] : memref<1x16x256xbf16, #tpu.memory_space<vmem>>, vector<1x16x211xbf16>
    %16 = vector.shape_cast %15 : vector<1x16x211xbf16> to vector<16x211xbf16>
    %c64 = arith.constant 64 : index
    %c0_22 = arith.constant 0 : index
    %17 = vector.load %arg6[%c64, %c0_22] : memref<144x211xbf16, #tpu.memory_space<vmem>>, vector<16x211xbf16>
    tpu.vector_store %arg6[%c64, %c0_22], %16 {strides = array<i32>} : memref<144x211xbf16, #tpu.memory_space<vmem>>, vector<16x211xbf16>,
    %c0_23 = arith.constant 0 : index
    %c0_24 = arith.constant 0 : index
    %c17 = arith.constant 17 : index
    %18 = vector.load %arg1[%c0_23, %c0_24, %c17] : memref<1x16x256xbf16, #tpu.memory_space<vmem>>, vector<1x16x211xbf16>
    %19 = vector.shape_cast %18 : vector<1x16x211xbf16> to vector<16x211xbf16>
    %c80 = arith.constant 80 : index
    %c0_25 = arith.constant 0 : index
    %20 = vector.load %arg6[%c80, %c0_25] : memref<144x211xbf16, #tpu.memory_space<vmem>>, vector<16x211xbf16>
    tpu.vector_store %arg6[%c80, %c0_25], %19 {strides = array<i32>} : memref<144x211xbf16, #tpu.memory_space<vmem>>, vector<16x211xbf16>,
    %c0_26 = arith.constant 0 : index
    %c0_27 = arith.constant 0 : index
    %c30 = arith.constant 30 : index
    %21 = vector.load %arg1[%c0_26, %c0_27, %c30] : memref<1x16x256xbf16, #tpu.memory_space<vmem>>, vector<1x16x211xbf16>
    %22 = vector.shape_cast %21 : vector<1x16x211xbf16> to vector<16x211xbf16>
    %c96 = arith.constant 96 : index
    %c0_28 = arith.constant 0 : index
    %23 = vector.load %arg6[%c96, %c0_28] : memref<144x211xbf16, #tpu.memory_space<vmem>>, vector<16x211xbf16>
    tpu.vector_store %arg6[%c96, %c0_28], %22 {strides = array<i32>} : memref<144x211xbf16, #tpu.memory_space<vmem>>, vector<16x211xbf16>,
    %c0_29 = arith.constant 0 : index
    %c0_30 = arith.constant 0 : index
    %c31 = arith.constant 31 : index
    %24 = vector.load %arg1[%c0_29, %c0_30, %c31] : memref<1x16x256xbf16, #tpu.memory_space<vmem>>, vector<1x16x211xbf16>
    %25 = vector.shape_cast %24 : vector<1x16x211xbf16> to vector<16x211xbf16>
    %c112 = arith.constant 112 : index
    %c0_31 = arith.constant 0 : index
    %26 = vector.load %arg6[%c112, %c0_31] : memref<144x211xbf16, #tpu.memory_space<vmem>>, vector<16x211xbf16>
    tpu.vector_store %arg6[%c112, %c0_31], %25 {strides = array<i32>} : memref<144x211xbf16, #tpu.memory_space<vmem>>, vector<16x211xbf16>,
    %c0_32 = arith.constant 0 : index
    %c0_33 = arith.constant 0 : index
    %c32_34 = arith.constant 32 : index
    %27 = vector.load %arg1[%c0_32, %c0_33, %c32_34] : memref<1x16x256xbf16, #tpu.memory_space<vmem>>, vector<1x16x211xbf16>
    %28 = vector.shape_cast %27 : vector<1x16x211xbf16> to vector<16x211xbf16>
    %c128 = arith.constant 128 : index
    %c0_35 = arith.constant 0 : index
    %29 = vector.load %arg6[%c128, %c0_35] : memref<144x211xbf16, #tpu.memory_space<vmem>>, vector<16x211xbf16>
    tpu.vector_store %arg6[%c128, %c0_35], %28 {strides = array<i32>} : memref<144x211xbf16, #tpu.memory_space<vmem>>, vector<16x211xbf16>,
    %c0_36 = arith.constant 0 : index
    %c0_37 = arith.constant 0 : index
    %30 = vector.load %arg6[%c0_36, %c0_37] : memref<144x211xbf16, #tpu.memory_space<vmem>>, vector<144x195xbf16>
    %cst = arith.constant dense<0.000000e+00> : vector<32x195xf32>
    %31 = tpu.matmul %0, %30, %cst {dimension_numbers = #tpu.dot_dimension_numbers<[1], [0], [0], [1], [0, 0, 1, 1], [], []>} : vector<32x144xbf16>, vector<144x195xbf16>, vector<32x195xf32> -> vector<32x195xf32>
    %c0_38 = arith.constant 0 : index
    %c1_39 = arith.constant 1 : index
    %32 = vector.load %arg6[%c0_38, %c1_39] : memref<144x211xbf16, #tpu.memory_space<vmem>>, vector<144x195xbf16>
    %cst_40 = arith.constant dense<0.000000e+00> : vector<32x195xf32>
    %33 = tpu.matmul %0, %32, %cst_40 {dimension_numbers = #tpu.dot_dimension_numbers<[1], [0], [0], [1], [0, 0, 1, 1], [], []>} : vector<32x144xbf16>, vector<144x195xbf16>, vector<32x195xf32> -> vector<32x195xf32>
    %34 = arith.maximumf %31, %33 : vector<32x195xf32>
    %c0_41 = arith.constant 0 : index
    %c15_42 = arith.constant 15 : index
    %35 = vector.load %arg6[%c0_41, %c15_42] : memref<144x211xbf16, #tpu.memory_space<vmem>>, vector<144x195xbf16>
    %cst_43 = arith.constant dense<0.000000e+00> : vector<32x195xf32>
    %36 = tpu.matmul %0, %35, %cst_43 {dimension_numbers = #tpu.dot_dimension_numbers<[1], [0], [0], [1], [0, 0, 1, 1], [], []>} : vector<32x144xbf16>, vector<144x195xbf16>, vector<32x195xf32> -> vector<32x195xf32>
    %37 = arith.maximumf %34, %36 : vector<32x195xf32>
    %c0_44 = arith.constant 0 : index
    %c16_45 = arith.constant 16 : index
    %38 = vector.load %arg6[%c0_44, %c16_45] : memref<144x211xbf16, #tpu.memory_space<vmem>>, vector<144x195xbf16>
    %cst_46 = arith.constant dense<0.000000e+00> : vector<32x195xf32>
    %39 = tpu.matmul %0, %38, %cst_46 {dimension_numbers = #tpu.dot_dimension_numbers<[1], [0], [0], [1], [0, 0, 1, 1], [], []>} : vector<32x144xbf16>, vector<144x195xbf16>, vector<32x195xf32> -> vector<32x195xf32>
    %40 = arith.maximumf %37, %39 : vector<32x195xf32>
    %41 = vector.broadcast %1 : vector<32x1xf32> to vector<32x195xf32>
    %42 = arith.addf %40, %41 : vector<32x195xf32>
    %cst_47 = arith.constant 0.000000e+00 : f32
    %43 = vector.broadcast %cst_47 : f32 to vector<32x195xf32>
    %44 = arith.maximumf %42, %43 : vector<32x195xf32>
    %45 = arith.truncf %44 : vector<32x195xf32> to vector<32x195xbf16>
    %cst_48 = arith.constant dense<0.000000e+00> : vector<32x36xf32>
    %46 = tpu.matmul %45, %2, %cst_48 {dimension_numbers = #tpu.dot_dimension_numbers<[1], [0], [0], [1], [0, 0, 1, 1], [], []>} : vector<32x195xbf16>, vector<195x36xbf16>, vector<32x36xf32> -> vector<32x36xf32>
    %47 = arith.truncf %46 : vector<32x36xf32> to vector<32x36xbf16>
    %c0_49 = arith.constant 0 : index
    %c0_50 = arith.constant 0 : index
    %c0_51 = arith.constant 0 : index
    %48 = vector.load %arg5[%c0_49, %c0_50, %c0_51] : memref<1x32x36xbf16, #tpu.memory_space<vmem>>, vector<1x32x36xbf16>
    %49 = vector.shape_cast %48 : vector<1x32x36xbf16> to vector<32x36xbf16>
    %50 = vector.shape_cast %47 : vector<32x36xbf16> to vector<1x32x36xbf16>
    tpu.vector_store %arg5[%c0_49, %c0_50, %c0_51], %50 {strides = array<i32>} : memref<1x32x36xbf16, #tpu.memory_space<vmem>>, vector<1x32x36xbf16>,
    return
  }
  func.func @transform_0(%arg0: i32) -> (i32, i32, i32) {
    %c0_i32 = arith.constant 0 : i32
    %c0_i32_0 = arith.constant 0 : i32
    %c0_i32_1 = arith.constant 0 : i32
    return %arg0, %c0_i32, %c0_i32_0 : i32, i32, i32
  }
  func.func @transform_1(%arg0: i32) -> (i32, i32) {
    %c0_i32 = arith.constant 0 : i32
    %c0_i32_0 = arith.constant 0 : i32
    %c0_i32_1 = arith.constant 0 : i32
    return %c0_i32, %c0_i32_0 : i32, i32
  }
  func.func @transform_2(%arg0: i32) -> (i32, i32) {
    %c0_i32 = arith.constant 0 : i32
    %c0_i32_0 = arith.constant 0 : i32
    %c0_i32_1 = arith.constant 0 : i32
    return %c0_i32, %c0_i32_0 : i32, i32
  }
  func.func @transform_3(%arg0: i32) -> (i32, i32) {
    %c0_i32 = arith.constant 0 : i32
    %c0_i32_0 = arith.constant 0 : i32
    %c0_i32_1 = arith.constant 0 : i32
    return %c0_i32, %c0_i32_0 : i32, i32
  }
  func.func @transform_4(%arg0: i32) -> (i32, i32, i32) {
    %c0_i32 = arith.constant 0 : i32
    %c0_i32_0 = arith.constant 0 : i32
    %c0_i32_1 = arith.constant 0 : i32
    return %arg0, %c0_i32, %c0_i32_0 : i32, i32, i32
  }
}

module attributes {stable_mosaic.version = 11 : i64} {
  func.func @_conv_relu_pool_kernel(%arg0: i32, %arg1: memref<1x3x1152xbf16, #tpu.memory_space<vmem>>, %arg2: memref<16x27xbf16, #tpu.memory_space<vmem>>, %arg3: memref<16x1xf32, #tpu.memory_space<vmem>>, %arg4: memref<960x256xbf16, #tpu.memory_space<vmem>>, %arg5: memref<1x16x256xbf16, #tpu.memory_space<vmem>>, %arg6: memref<27x993xbf16, #tpu.memory_space<vmem>>) attributes {dimension_semantics = [#tpu.dimension_semantics<parallel>], iteration_bounds = array<i64: 2>, scalar_prefetch = 0 : i64, scratch_operands = 1 : i64, tpu.core_type = #tpu.core_type<tc>, window_params = [{transform_indices = @transform_0, window_bounds = array<i64: 1, 3, 1152>}, {pipeline_mode = #tpu.pipeline_mode<synchronous>, transform_indices = @transform_1, window_bounds = array<i64: 16, 27>}, {pipeline_mode = #tpu.pipeline_mode<synchronous>, transform_indices = @transform_2, window_bounds = array<i64: 16, 1>}, {pipeline_mode = #tpu.pipeline_mode<synchronous>, transform_indices = @transform_3, window_bounds = array<i64: 960, 256>}, {transform_indices = @transform_4, window_bounds = array<i64: 1, 16, 256>}]} {
    %c0 = arith.constant 0 : index
    %c0_0 = arith.constant 0 : index
    %0 = vector.load %arg2[%c0, %c0_0] : memref<16x27xbf16, #tpu.memory_space<vmem>>, vector<16x27xbf16>
    %c0_1 = arith.constant 0 : index
    %c0_2 = arith.constant 0 : index
    %1 = vector.load %arg3[%c0_1, %c0_2] : memref<16x1xf32, #tpu.memory_space<vmem>>, vector<16x1xf32>
    %c0_3 = arith.constant 0 : index
    %c0_4 = arith.constant 0 : index
    %2 = vector.load %arg4[%c0_3, %c0_4] : memref<960x256xbf16, #tpu.memory_space<vmem>>, vector<960x256xbf16>
    %c0_5 = arith.constant 0 : index
    %c0_6 = arith.constant 0 : index
    %c0_7 = arith.constant 0 : index
    %3 = vector.load %arg1[%c0_5, %c0_6, %c0_7] : memref<1x3x1152xbf16, #tpu.memory_space<vmem>>, vector<1x3x993xbf16>
    %4 = vector.shape_cast %3 : vector<1x3x993xbf16> to vector<3x993xbf16>
    %c0_8 = arith.constant 0 : index
    %c0_9 = arith.constant 0 : index
    %5 = vector.load %arg6[%c0_8, %c0_9] : memref<27x993xbf16, #tpu.memory_space<vmem>>, vector<3x993xbf16>
    tpu.vector_store %arg6[%c0_8, %c0_9], %4 {strides = array<i32>} : memref<27x993xbf16, #tpu.memory_space<vmem>>, vector<3x993xbf16>,
    %c0_10 = arith.constant 0 : index
    %c0_11 = arith.constant 0 : index
    %c1 = arith.constant 1 : index
    %6 = vector.load %arg1[%c0_10, %c0_11, %c1] : memref<1x3x1152xbf16, #tpu.memory_space<vmem>>, vector<1x3x993xbf16>
    %7 = vector.shape_cast %6 : vector<1x3x993xbf16> to vector<3x993xbf16>
    %c3 = arith.constant 3 : index
    %c0_12 = arith.constant 0 : index
    %8 = vector.load %arg6[%c3, %c0_12] : memref<27x993xbf16, #tpu.memory_space<vmem>>, vector<3x993xbf16>
    tpu.vector_store %arg6[%c3, %c0_12], %7 {strides = array<i32>} : memref<27x993xbf16, #tpu.memory_space<vmem>>, vector<3x993xbf16>,
    %c0_13 = arith.constant 0 : index
    %c0_14 = arith.constant 0 : index
    %c2 = arith.constant 2 : index
    %9 = vector.load %arg1[%c0_13, %c0_14, %c2] : memref<1x3x1152xbf16, #tpu.memory_space<vmem>>, vector<1x3x993xbf16>
    %10 = vector.shape_cast %9 : vector<1x3x993xbf16> to vector<3x993xbf16>
    %c6 = arith.constant 6 : index
    %c0_15 = arith.constant 0 : index
    %11 = vector.load %arg6[%c6, %c0_15] : memref<27x993xbf16, #tpu.memory_space<vmem>>, vector<3x993xbf16>
    tpu.vector_store %arg6[%c6, %c0_15], %10 {strides = array<i32>} : memref<27x993xbf16, #tpu.memory_space<vmem>>, vector<3x993xbf16>,
    %c0_16 = arith.constant 0 : index
    %c0_17 = arith.constant 0 : index
    %c32 = arith.constant 32 : index
    %12 = vector.load %arg1[%c0_16, %c0_17, %c32] : memref<1x3x1152xbf16, #tpu.memory_space<vmem>>, vector<1x3x993xbf16>
    %13 = vector.shape_cast %12 : vector<1x3x993xbf16> to vector<3x993xbf16>
    %c9 = arith.constant 9 : index
    %c0_18 = arith.constant 0 : index
    %14 = vector.load %arg6[%c9, %c0_18] : memref<27x993xbf16, #tpu.memory_space<vmem>>, vector<3x993xbf16>
    tpu.vector_store %arg6[%c9, %c0_18], %13 {strides = array<i32>} : memref<27x993xbf16, #tpu.memory_space<vmem>>, vector<3x993xbf16>,
    %c0_19 = arith.constant 0 : index
    %c0_20 = arith.constant 0 : index
    %c33 = arith.constant 33 : index
    %15 = vector.load %arg1[%c0_19, %c0_20, %c33] : memref<1x3x1152xbf16, #tpu.memory_space<vmem>>, vector<1x3x993xbf16>
    %16 = vector.shape_cast %15 : vector<1x3x993xbf16> to vector<3x993xbf16>
    %c12 = arith.constant 12 : index
    %c0_21 = arith.constant 0 : index
    %17 = vector.load %arg6[%c12, %c0_21] : memref<27x993xbf16, #tpu.memory_space<vmem>>, vector<3x993xbf16>
    tpu.vector_store %arg6[%c12, %c0_21], %16 {strides = array<i32>} : memref<27x993xbf16, #tpu.memory_space<vmem>>, vector<3x993xbf16>,
    %c0_22 = arith.constant 0 : index
    %c0_23 = arith.constant 0 : index
    %c34 = arith.constant 34 : index
    %18 = vector.load %arg1[%c0_22, %c0_23, %c34] : memref<1x3x1152xbf16, #tpu.memory_space<vmem>>, vector<1x3x993xbf16>
    %19 = vector.shape_cast %18 : vector<1x3x993xbf16> to vector<3x993xbf16>
    %c15 = arith.constant 15 : index
    %c0_24 = arith.constant 0 : index
    %20 = vector.load %arg6[%c15, %c0_24] : memref<27x993xbf16, #tpu.memory_space<vmem>>, vector<3x993xbf16>
    tpu.vector_store %arg6[%c15, %c0_24], %19 {strides = array<i32>} : memref<27x993xbf16, #tpu.memory_space<vmem>>, vector<3x993xbf16>,
    %c0_25 = arith.constant 0 : index
    %c0_26 = arith.constant 0 : index
    %c64 = arith.constant 64 : index
    %21 = vector.load %arg1[%c0_25, %c0_26, %c64] : memref<1x3x1152xbf16, #tpu.memory_space<vmem>>, vector<1x3x993xbf16>
    %22 = vector.shape_cast %21 : vector<1x3x993xbf16> to vector<3x993xbf16>
    %c18 = arith.constant 18 : index
    %c0_27 = arith.constant 0 : index
    %23 = vector.load %arg6[%c18, %c0_27] : memref<27x993xbf16, #tpu.memory_space<vmem>>, vector<3x993xbf16>
    tpu.vector_store %arg6[%c18, %c0_27], %22 {strides = array<i32>} : memref<27x993xbf16, #tpu.memory_space<vmem>>, vector<3x993xbf16>,
    %c0_28 = arith.constant 0 : index
    %c0_29 = arith.constant 0 : index
    %c65 = arith.constant 65 : index
    %24 = vector.load %arg1[%c0_28, %c0_29, %c65] : memref<1x3x1152xbf16, #tpu.memory_space<vmem>>, vector<1x3x993xbf16>
    %25 = vector.shape_cast %24 : vector<1x3x993xbf16> to vector<3x993xbf16>
    %c21 = arith.constant 21 : index
    %c0_30 = arith.constant 0 : index
    %26 = vector.load %arg6[%c21, %c0_30] : memref<27x993xbf16, #tpu.memory_space<vmem>>, vector<3x993xbf16>
    tpu.vector_store %arg6[%c21, %c0_30], %25 {strides = array<i32>} : memref<27x993xbf16, #tpu.memory_space<vmem>>, vector<3x993xbf16>,
    %c0_31 = arith.constant 0 : index
    %c0_32 = arith.constant 0 : index
    %c66 = arith.constant 66 : index
    %27 = vector.load %arg1[%c0_31, %c0_32, %c66] : memref<1x3x1152xbf16, #tpu.memory_space<vmem>>, vector<1x3x993xbf16>
    %28 = vector.shape_cast %27 : vector<1x3x993xbf16> to vector<3x993xbf16>
    %c24 = arith.constant 24 : index
    %c0_33 = arith.constant 0 : index
    %29 = vector.load %arg6[%c24, %c0_33] : memref<27x993xbf16, #tpu.memory_space<vmem>>, vector<3x993xbf16>
    tpu.vector_store %arg6[%c24, %c0_33], %28 {strides = array<i32>} : memref<27x993xbf16, #tpu.memory_space<vmem>>, vector<3x993xbf16>,
    %c0_34 = arith.constant 0 : index
    %c0_35 = arith.constant 0 : index
    %30 = vector.load %arg6[%c0_34, %c0_35] : memref<27x993xbf16, #tpu.memory_space<vmem>>, vector<27x960xbf16>
    %cst = arith.constant dense<0.000000e+00> : vector<16x960xf32>
    %31 = tpu.matmul %0, %30, %cst {dimension_numbers = #tpu.dot_dimension_numbers<[1], [0], [0], [1], [0, 0, 1, 1], [], []>} : vector<16x27xbf16>, vector<27x960xbf16>, vector<16x960xf32> -> vector<16x960xf32>
    %c0_36 = arith.constant 0 : index
    %c1_37 = arith.constant 1 : index
    %32 = vector.load %arg6[%c0_36, %c1_37] : memref<27x993xbf16, #tpu.memory_space<vmem>>, vector<27x960xbf16>
    %cst_38 = arith.constant dense<0.000000e+00> : vector<16x960xf32>
    %33 = tpu.matmul %0, %32, %cst_38 {dimension_numbers = #tpu.dot_dimension_numbers<[1], [0], [0], [1], [0, 0, 1, 1], [], []>} : vector<16x27xbf16>, vector<27x960xbf16>, vector<16x960xf32> -> vector<16x960xf32>
    %34 = arith.maximumf %31, %33 : vector<16x960xf32>
    %c0_39 = arith.constant 0 : index
    %c32_40 = arith.constant 32 : index
    %35 = vector.load %arg6[%c0_39, %c32_40] : memref<27x993xbf16, #tpu.memory_space<vmem>>, vector<27x960xbf16>
    %cst_41 = arith.constant dense<0.000000e+00> : vector<16x960xf32>
    %36 = tpu.matmul %0, %35, %cst_41 {dimension_numbers = #tpu.dot_dimension_numbers<[1], [0], [0], [1], [0, 0, 1, 1], [], []>} : vector<16x27xbf16>, vector<27x960xbf16>, vector<16x960xf32> -> vector<16x960xf32>
    %37 = arith.maximumf %34, %36 : vector<16x960xf32>
    %c0_42 = arith.constant 0 : index
    %c33_43 = arith.constant 33 : index
    %38 = vector.load %arg6[%c0_42, %c33_43] : memref<27x993xbf16, #tpu.memory_space<vmem>>, vector<27x960xbf16>
    %cst_44 = arith.constant dense<0.000000e+00> : vector<16x960xf32>
    %39 = tpu.matmul %0, %38, %cst_44 {dimension_numbers = #tpu.dot_dimension_numbers<[1], [0], [0], [1], [0, 0, 1, 1], [], []>} : vector<16x27xbf16>, vector<27x960xbf16>, vector<16x960xf32> -> vector<16x960xf32>
    %40 = arith.maximumf %37, %39 : vector<16x960xf32>
    %41 = vector.broadcast %1 : vector<16x1xf32> to vector<16x960xf32>
    %42 = arith.addf %40, %41 : vector<16x960xf32>
    %cst_45 = arith.constant 0.000000e+00 : f32
    %43 = vector.broadcast %cst_45 : f32 to vector<16x960xf32>
    %44 = arith.maximumf %42, %43 : vector<16x960xf32>
    %45 = arith.truncf %44 : vector<16x960xf32> to vector<16x960xbf16>
    %cst_46 = arith.constant dense<0.000000e+00> : vector<16x256xf32>
    %46 = tpu.matmul %45, %2, %cst_46 {dimension_numbers = #tpu.dot_dimension_numbers<[1], [0], [0], [1], [0, 0, 1, 1], [], []>} : vector<16x960xbf16>, vector<960x256xbf16>, vector<16x256xf32> -> vector<16x256xf32>
    %47 = arith.truncf %46 : vector<16x256xf32> to vector<16x256xbf16>
    %c0_47 = arith.constant 0 : index
    %c0_48 = arith.constant 0 : index
    %c0_49 = arith.constant 0 : index
    %48 = vector.load %arg5[%c0_47, %c0_48, %c0_49] : memref<1x16x256xbf16, #tpu.memory_space<vmem>>, vector<1x16x256xbf16>
    %49 = vector.shape_cast %48 : vector<1x16x256xbf16> to vector<16x256xbf16>
    %50 = vector.shape_cast %47 : vector<16x256xbf16> to vector<1x16x256xbf16>
    tpu.vector_store %arg5[%c0_47, %c0_48, %c0_49], %50 {strides = array<i32>} : memref<1x16x256xbf16, #tpu.memory_space<vmem>>, vector<1x16x256xbf16>,
    return
  }
  func.func @transform_0(%arg0: i32) -> (i32, i32, i32) {
    %c0_i32 = arith.constant 0 : i32
    %c0_i32_0 = arith.constant 0 : i32
    %c0_i32_1 = arith.constant 0 : i32
    return %arg0, %c0_i32, %c0_i32_0 : i32, i32, i32
  }
  func.func @transform_1(%arg0: i32) -> (i32, i32) {
    %c0_i32 = arith.constant 0 : i32
    %c0_i32_0 = arith.constant 0 : i32
    %c0_i32_1 = arith.constant 0 : i32
    return %c0_i32, %c0_i32_0 : i32, i32
  }
  func.func @transform_2(%arg0: i32) -> (i32, i32) {
    %c0_i32 = arith.constant 0 : i32
    %c0_i32_0 = arith.constant 0 : i32
    %c0_i32_1 = arith.constant 0 : i32
    return %c0_i32, %c0_i32_0 : i32, i32
  }
  func.func @transform_3(%arg0: i32) -> (i32, i32) {
    %c0_i32 = arith.constant 0 : i32
    %c0_i32_0 = arith.constant 0 : i32
    %c0_i32_1 = arith.constant 0 : i32
    return %c0_i32, %c0_i32_0 : i32, i32
  }
  func.func @transform_4(%arg0: i32) -> (i32, i32, i32) {
    %c0_i32 = arith.constant 0 : i32
    %c0_i32_0 = arith.constant 0 : i32
    %c0_i32_1 = arith.constant 0 : i32
    return %arg0, %c0_i32, %c0_i32_0 : i32, i32, i32
  }
}

module attributes {stable_mosaic.version = 11 : i64} {
  func.func @_mlp_head_kernel(%arg0: i32, %arg1: memref<2x1152xbf16, #tpu.memory_space<vmem>>, %arg2: memref<1152x128xbf16, #tpu.memory_space<vmem>>, %arg3: memref<1x128xf32, #tpu.memory_space<vmem>>, %arg4: memref<128x10xbf16, #tpu.memory_space<vmem>>, %arg5: memref<1x10xf32, #tpu.memory_space<vmem>>, %arg6: memref<2x10xf32, #tpu.memory_space<vmem>>) attributes {dimension_semantics = [#tpu.dimension_semantics<parallel>], iteration_bounds = array<i64: 1>, scalar_prefetch = 0 : i64, scratch_operands = 0 : i64, tpu.core_type = #tpu.core_type<tc>, window_params = [{transform_indices = @transform_0, window_bounds = array<i64: 2, 1152>}, {pipeline_mode = #tpu.pipeline_mode<synchronous>, transform_indices = @transform_1, window_bounds = array<i64: 1152, 128>}, {pipeline_mode = #tpu.pipeline_mode<synchronous>, transform_indices = @transform_2, window_bounds = array<i64: 1, 128>}, {pipeline_mode = #tpu.pipeline_mode<synchronous>, transform_indices = @transform_3, window_bounds = array<i64: 128, 10>}, {pipeline_mode = #tpu.pipeline_mode<synchronous>, transform_indices = @transform_4, window_bounds = array<i64: 1, 10>}, {transform_indices = @transform_5, window_bounds = array<i64: 2, 10>}]} {
    %c0 = arith.constant 0 : index
    %c0_0 = arith.constant 0 : index
    %0 = vector.load %arg1[%c0, %c0_0] : memref<2x1152xbf16, #tpu.memory_space<vmem>>, vector<2x1152xbf16>
    %c0_1 = arith.constant 0 : index
    %c0_2 = arith.constant 0 : index
    %1 = vector.load %arg2[%c0_1, %c0_2] : memref<1152x128xbf16, #tpu.memory_space<vmem>>, vector<1152x128xbf16>
    %cst = arith.constant dense<0.000000e+00> : vector<2x128xf32>
    %2 = tpu.matmul %0, %1, %cst {dimension_numbers = #tpu.dot_dimension_numbers<[1], [0], [0], [1], [0, 0, 1, 1], [], []>} : vector<2x1152xbf16>, vector<1152x128xbf16>, vector<2x128xf32> -> vector<2x128xf32>
    %c0_3 = arith.constant 0 : index
    %c0_4 = arith.constant 0 : index
    %3 = vector.load %arg3[%c0_3, %c0_4] : memref<1x128xf32, #tpu.memory_space<vmem>>, vector<1x128xf32>
    %4 = vector.broadcast %3 : vector<1x128xf32> to vector<2x128xf32>
    %5 = arith.addf %2, %4 : vector<2x128xf32>
    %cst_5 = arith.constant 0.000000e+00 : f32
    %6 = vector.broadcast %cst_5 : f32 to vector<2x128xf32>
    %7 = arith.maximumf %5, %6 : vector<2x128xf32>
    %8 = arith.truncf %7 : vector<2x128xf32> to vector<2x128xbf16>
    %c0_6 = arith.constant 0 : index
    %c0_7 = arith.constant 0 : index
    %9 = vector.load %arg4[%c0_6, %c0_7] : memref<128x10xbf16, #tpu.memory_space<vmem>>, vector<128x10xbf16>
    %cst_8 = arith.constant dense<0.000000e+00> : vector<2x10xf32>
    %10 = tpu.matmul %8, %9, %cst_8 {dimension_numbers = #tpu.dot_dimension_numbers<[1], [0], [0], [1], [0, 0, 1, 1], [], []>} : vector<2x128xbf16>, vector<128x10xbf16>, vector<2x10xf32> -> vector<2x10xf32>
    %c0_9 = arith.constant 0 : index
    %c0_10 = arith.constant 0 : index
    %11 = vector.load %arg5[%c0_9, %c0_10] : memref<1x10xf32, #tpu.memory_space<vmem>>, vector<1x10xf32>
    %12 = vector.broadcast %11 : vector<1x10xf32> to vector<2x10xf32>
    %13 = arith.addf %10, %12 : vector<2x10xf32>
    %c0_11 = arith.constant 0 : index
    %c0_12 = arith.constant 0 : index
    %14 = vector.load %arg6[%c0_11, %c0_12] : memref<2x10xf32, #tpu.memory_space<vmem>>, vector<2x10xf32>
    tpu.vector_store %arg6[%c0_11, %c0_12], %13 {strides = array<i32>} : memref<2x10xf32, #tpu.memory_space<vmem>>, vector<2x10xf32>,
    return
  }
  func.func @transform_0(%arg0: i32) -> (i32, i32) {
    %c0_i32 = arith.constant 0 : i32
    %c0_i32_0 = arith.constant 0 : i32
    return %arg0, %c0_i32 : i32, i32
  }
  func.func @transform_1(%arg0: i32) -> (i32, i32) {
    %c0_i32 = arith.constant 0 : i32
    %c0_i32_0 = arith.constant 0 : i32
    %c0_i32_1 = arith.constant 0 : i32
    return %c0_i32, %c0_i32_0 : i32, i32
  }
  func.func @transform_2(%arg0: i32) -> (i32, i32) {
    %c0_i32 = arith.constant 0 : i32
    %c0_i32_0 = arith.constant 0 : i32
    %c0_i32_1 = arith.constant 0 : i32
    return %c0_i32, %c0_i32_0 : i32, i32
  }
  func.func @transform_3(%arg0: i32) -> (i32, i32) {
    %c0_i32 = arith.constant 0 : i32
    %c0_i32_0 = arith.constant 0 : i32
    %c0_i32_1 = arith.constant 0 : i32
    return %c0_i32, %c0_i32_0 : i32, i32
  }
  func.func @transform_4(%arg0: i32) -> (i32, i32) {
    %c0_i32 = arith.constant 0 : i32
    %c0_i32_0 = arith.constant 0 : i32
    %c0_i32_1 = arith.constant 0 : i32
    return %c0_i32, %c0_i32_0 : i32, i32
  }
  func.func @transform_5(%arg0: i32) -> (i32, i32) {
    %c0_i32 = arith.constant 0 : i32
    %c0_i32_0 = arith.constant 0 : i32
    return %arg0, %c0_i32 : i32, i32
  }
}

</mosaic_0001>

<bundles_post_ra>
// kernel: simple_cnn_forward.4
= control target key start
LH: loop header
LB: loop body
LE: loop exit
PB: predicated region body
PF: predicated region fallthrough
CT: control target
= control target key end

     0   :  { %s1298_s15 = smov 0   ;;  %s1629_s0 = inlined_call_operand.vmem [shape: bf16[2,16,256], index: 0, kind: input, shape index: {}]   ;;  %s1630_s1 = inlined_call_operand.vmem [shape: bf16[32,144], index: 1, kind: input, shape index: {}]   ;;  %s1631_s2 = inlined_call_operand.vmem [shape: f32[32,1], index: 2, kind: input, shape index: {}]   ;;  %s1632_s3 = inlined_call_operand.vmem [shape: bf16[195,36], index: 3, kind: input, shape index: {}]   ;;  %s1633_s4 = inlined_call_operand.vmem [shape: bf16[2,32,36], index: 4, kind: output, shape index: {}]  }
   0x1 LB: > { %s1147_s16 = sadd.s32 4294967295, %s1261_s15   ;;  %p1151_p0 = scmp.ge.s32.totalorder %s1261_s15, 1  ;;  %s1261_s15 = sphi %s1298_s15, %s14_s15  }
   0x2   : > { %p162_p1 = scmp.lt.s32.totalorder %s1261_s15, 3 }
   0x4   : > { %p163_p2 = pnand %p1151_p0, %p162_p1 }
   0x5   : > { %p188_p3 = scmp.lt.s32.totalorder (!%p163_p2), %s1147_s16, 1  ;;  %vm245_vm0 = vcmask (!%p163_p2), 678912   ;;  %s1263_s21 = smov (!%p163_p2), 126   ;;  %v1330_v3 = vld [vmem:[%s1630_s1 + $0x4] ss:$8 sps:$4 sm:$0xff] (!%p163_p2)   ;;  %vm443_vm1 = vcmask (!%p163_p2), 130048  }
   0x6   : > { %166 = sbr.rel (%p163_p2) target bundleno = 804 (0x324), region = 36  ;;  %s1264_s22 = smov (!%p163_p2), 127   ;;  %1178 = vmatprep.mubr.msk.bf16.mxu1 (!%p163_p2), %vm443_vm1, %v1330_v3  ;;  %1182 = vmatprep.mubr.msk.bf16.mxu0 (!%p163_p2), %vm443_vm1, %v1330_v3  ;;  %vm281_vm2 = vcmask (!%p163_p2), 1031168   ;;  %vm261_vm3 = vcmask (!%p163_p2), 1039360   ;;  %vm301_vm4 = vcmask (!%p163_p2), 924672   ;;  %vm321_vm5 = vcmask (!%p163_p2), 916480  }
   0x7   : > { %s1265_s23 = smov (!%p163_p2), 113   ;;  %s1266_s24 = smov (!%p163_p2), 112   ;;  %vm341_vm6 = vcmask (!%p163_p2), 908288   ;;  %vm361_vm7 = vcmask (!%p163_p2), 801792   ;;  %vm381_vm8 = vcmask (!%p163_p2), 793600   ;;  %vm401_vm9 = vcmask (!%p163_p2), 785408  }
   0x8   : > { %s1267_s25 = smov (!%p163_p2), 111   ;;  %s1268_s26 = smov (!%p163_p2), 98   ;;  %v1417_v41 = vld [vmem:[%s1630_s1] ss:$8 sps:$4 sm:$0xff] (!%p163_p2)   ;;  %v1425_v43 = vld [vmem:[%s1630_s1 + $0x14] ss:$8 sps:$4 sm:$0xff] (!%p163_p2)  }
   0x9   : > { %s1269_s27 = smov (!%p163_p2), 97   ;;  %s1270_s28 = smov (!%p163_p2), 96   ;;  %v1439_v44 = vld [vmem:[%s1630_s1 + $0x10] ss:$8 sps:$4 sm:$0xff] (!%p163_p2)   ;;  %v203_v45 = vld [vmem:[%s1631_s2] sm:$0xff] (!%p163_p2)  ;;  %v1271_v46 = vmov (!%p163_p2), 0  }
   0xa   : > { %1231 = vset.pattern.permute.xlu0 (!%p163_p2), %v1271_v46  ;;  %1232 = vset.pattern.permute.xlu1 (!%p163_p2), %v1271_v46  ;;  %v204_v47 = vld [vmem:[%s1631_s2 + $0x8] sm:$0xff] (!%p163_p2)  ;;  %v206_v48 = vld [vmem:[%s1631_s2 + $0x18] sm:$0xff] (!%p163_p2)  ;;  %v205_v49 = vld [vmem:[%s1631_s2 + $0x10] sm:$0xff] (!%p163_p2)  ;;  %vm1015_vm10 = vcmask (!%p163_p2), 1040384   ;;  %vm1016_vm11 = vcmask (!%p163_p2), 1041408   ;;  %vm1008_vm12 = vcmask (!%p163_p2), 547840  }
   0xb   : > { %vm1087_vm13 = vcmask (!%p163_p2), 289792  }
   0xd   : > { %s1635_s16 = smov (!%p188_p3, %s1147_s16), 1 }
   0xe   : > { %s1207_s17 = sshll.u32 %s1635_s16, 4 }
   0xf   : > { %s192_s20 = scalar_lea.vmem %s1629_s0, %s1207_s17 }
  0x10   : > { %v1233_v0 = vld [vmem:[%s192_s20] ss:$8 sps:$4 sm:$0xff]   ;;  %v1235_v1 = vld [vmem:[%s192_s20 + $0x4] ss:$8 sps:$4 sm:$0xff]  }
  0x11   : > { %277 = vrot.lane.b32.xlu1 %v1233_v0, %s1263_s21  ;;  %257 = vrot.lane.b32.xlu0 %v1233_v0, %s1264_s22  ;;  %246 = vst.msk [vmem:[#allocation2 + $0x8] sm:$0xff] %vm245_vm0, %v1235_v1 }
  0x15   : > { %279 = vrot.lane.b32.xlu1 %v1235_v1, %s1263_s21  ;;  %259 = vrot.lane.b32.xlu0 %v1235_v1, %s1264_s22 }
  0x18   : > { %v408_v2 = vld [vmem:[#allocation2 + $0x8] sm:$0xff] }
  0x19   : > { %299 = vrot.lane.b32.xlu1 %v1235_v1, %s1265_s23  ;;  %297 = vrot.lane.b32.xlu0 %v1233_v0, %s1265_s23 }
  0x1a   : > { %450 = vmatprep.subr.bf16.mxu1 %v408_v2 }
  0x1b   : > { %451 = vmatpush1.bf16.msra.mxu1 %v1233_v0 }
  0x1d   : > { %319 = vrot.lane.b32.xlu1 %v1235_v1, %s1266_s24  ;;  %317 = vrot.lane.b32.xlu0 %v1233_v0, %s1266_s24 }
  0x21   : > { %339 = vrot.lane.b32.xlu1 %v1235_v1, %s1267_s25  ;;  %337 = vrot.lane.b32.xlu0 %v1233_v0, %s1267_s25 }
  0x25   : > { %359 = vrot.lane.b32.xlu1 %v1235_v1, %s1268_s26  ;;  %357 = vrot.lane.b32.xlu0 %v1233_v0, %s1268_s26 }
  0x29   : > { %379 = vrot.lane.b32.xlu1 %v1235_v1, %s1269_s27  ;;  %377 = vrot.lane.b32.xlu0 %v1233_v0, %s1269_s27  ;;  %s197_s27 = scalar_lea.vmem %s1633_s4, %s1207_s17 }
  0x2d   : > { %399 = vrot.lane.b32.xlu1 %v1235_v1, %s1270_s28  ;;  %397 = vrot.lane.b32.xlu0 %v1233_v0, %s1270_s28 }
  0x31   : > { %523 = vrot.lane.b32.xlu1 %v408_v2, %s1264_s22  ;;  %521 = vrot.lane.b32.xlu0 %v1233_v0, %s1264_s22 }
  0x35   : > { %647 = vrot.lane.b32.xlu1 %v408_v2, %s1265_s23  ;;  %645 = vrot.lane.b32.xlu0 %v1233_v0, %s1265_s23 }
  0x39   : > { %771 = vrot.lane.b32.xlu1 %v408_v2, %s1266_s24  ;;  %769 = vrot.lane.b32.xlu0 %v1233_v0, %s1266_s24 }
  0x83   : > { %v278_v4 = vpop.permute.xlu1 %277  ;;  %v258_v5 = vpop.permute.xlu0 %257 }
  0x87   : > { %v280_v6 = vpop.permute.xlu1 %279  ;;  %v260_v7 = vpop.permute.xlu0 %259 }
  0x88   : > { %v1336_v8 = vsel %vm281_vm2, %v278_v4, %v280_v6  ;;  %286 = vst.msk [vmem:[#allocation2 + $0x28] sm:$0xff] %vm245_vm0, %v280_v6  ;;  %v1340_v9 = vsel %vm261_vm3, %v258_v5, %v260_v7  ;;  %266 = vst.msk [vmem:[#allocation2 + $0x18] sm:$0xff] %vm245_vm0, %v260_v7 }
  0x89   : > { %525 = vrot.lane.b32.xlu0 %v1340_v9, %s1264_s22 }
  0x8b   : > { %v300_v10 = vpop.permute.xlu1 %299  ;;  %v298_v11 = vpop.permute.xlu0 %297 }
  0x8c   : > { %306 = vst.msk [vmem:[#allocation2 + $0x38] sm:$0xff] %vm245_vm0, %v300_v10  ;;  %v1347_v12 = vsel %vm301_vm4, %v298_v11, %v300_v10 }
  0x8d   : > { %529 = vrot.lane.b32.xlu0 %v1336_v8, %s1264_s22 }
  0x8f   : > { %v1351_v13 = vld [vmem:[#allocation2 + $0x18] sm:$0xff]  ;;  %v320_v14 = vpop.permute.xlu1 %319  ;;  %v318_v15 = vpop.permute.xlu0 %317  ;;  %v1353_v16 = vld [vmem:[#allocation2 + $0x28] sm:$0xff] }
  0x90   : > { %527 = vrot.lane.b32.xlu1 %v1351_v13, %s1264_s22  ;;  %452 = vmatprep.subr.bf16.mxu1 %v1351_v13  ;;  %326 = vst.msk [vmem:[#allocation2 + $0x48] sm:$0xff] %vm245_vm0, %v320_v14  ;;  %v1360_v17 = vsel %vm321_vm5, %v318_v15, %v320_v14 }
  0x91   : > { %453 = vmatpush1.bf16.msra.mxu1 %v1340_v9  ;;  %533 = vrot.lane.b32.xlu0 %v1347_v12, %s1264_s22 }
  0x92   : > { %454 = vmatprep.subr.bf16.mxu1 %v1353_v16 }
  0x93   : > { %v340_v18 = vpop.permute.xlu1 %339  ;;  %v338_v19 = vpop.permute.xlu0 %337  ;;  %v1366_v20 = vld [vmem:[#allocation2 + $0x38] sm:$0xff] }
  0x94   : > { %531 = vrot.lane.b32.xlu1 %v1353_v16, %s1264_s22  ;;  %346 = vst.msk [vmem:[#allocation2 + $0x58] sm:$0xff] %vm245_vm0, %v340_v18  ;;  %v1371_v21 = vsel %vm341_vm6, %v338_v19, %v340_v18 }
  0x95   : > { %455 = vmatpush1.bf16.msra.mxu1 %v1336_v8  ;;  %537 = vrot.lane.b32.xlu0 %v1360_v17, %s1264_s22 }
  0x96   : > { %456 = vmatprep.subr.bf16.mxu1 %v1366_v20 }
  0x97   : > { %v360_v22 = vpop.permute.xlu1 %359  ;;  %v358_v23 = vpop.permute.xlu0 %357  ;;  %v1377_v24 = vld [vmem:[#allocation2 + $0x48] sm:$0xff] }
  0x98   : > { %535 = vrot.lane.b32.xlu1 %v1366_v20, %s1264_s22  ;;  %366 = vst.msk [vmem:[#allocation2 + $0x68] sm:$0xff] %vm245_vm0, %v360_v22  ;;  %v1382_v25 = vsel %vm361_vm7, %v358_v23, %v360_v22 }
  0x99   : > { %457 = vmatpush1.bf16.msra.mxu1 %v1347_v12  ;;  %541 = vrot.lane.b32.xlu0 %v1371_v21, %s1264_s22 }
  0x9a   : > { %458 = vmatprep.subr.bf16.mxu1 %v1377_v24 }
  0x9b   : > { %v380_v26 = vpop.permute.xlu1 %379  ;;  %v378_v27 = vpop.permute.xlu0 %377  ;;  %v1388_v28 = vld [vmem:[#allocation2 + $0x58] sm:$0xff] }
  0x9c   : > { %539 = vrot.lane.b32.xlu1 %v1377_v24, %s1264_s22  ;;  %386 = vst.msk [vmem:[#allocation2 + $0x78] sm:$0xff] %vm245_vm0, %v380_v26  ;;  %v1393_v29 = vsel %vm381_vm8, %v378_v27, %v380_v26 }
  0x9d   : > { %459 = vmatpush1.bf16.msra.mxu1 %v1360_v17  ;;  %545 = vrot.lane.b32.xlu0 %v1382_v25, %s1264_s22 }
  0x9e   : > { %460 = vmatprep.subr.bf16.mxu1 %v1388_v28 }
  0x9f   : > { %v400_v30 = vpop.permute.xlu1 %399  ;;  %v398_v31 = vpop.permute.xlu0 %397  ;;  %v420_v32 = vld [vmem:[#allocation2 + $0x68] sm:$0xff] }
  0xa0   : > { %543 = vrot.lane.b32.xlu1 %v1388_v28, %s1264_s22  ;;  %406 = vst.msk [vmem:[#allocation2 + $0x88] sm:$0xff] %vm245_vm0, %v400_v30  ;;  %v402_v33 = vsel %vm401_vm9, %v398_v31, %v400_v30 }
  0xa1   : > { %461 = vmatpush1.bf16.msra.mxu1 %v1371_v21  ;;  %549 = vrot.lane.b32.xlu0 %v1393_v29, %s1264_s22 }
  0xa2   : > { %462 = vmatprep.subr.bf16.mxu1 %v420_v32 }
  0xa3   : > { %v422_v34 = vld [vmem:[#allocation2 + $0x78] sm:$0xff]  ;;  %v524_v35 = vpop.permute.xlu1 %523  ;;  %v522_v36 = vpop.permute.xlu0 %521 }
  0xa4   : > { %547 = vrot.lane.b32.xlu1 %v420_v32, %s1264_s22  ;;  %v557_v42 = vsel %vm261_vm3, %v522_v36, %v524_v35 }
  0xa5   : > { %463 = vmatpush1.bf16.msra.mxu1 %v1382_v25  ;;  %553 = vrot.lane.b32.xlu0 %v402_v33, %s1264_s22 }
  0xa6   : > { %464 = vmatprep.subr.bf16.mxu1 %v422_v34 }
  0xa7   : > { %v424_v37 = vld [vmem:[#allocation2 + $0x88] sm:$0xff]  ;;  %v648_v38 = vpop.permute.xlu1 %647  ;;  %v646_v39 = vpop.permute.xlu0 %645 }
  0xa8   : > { %551 = vrot.lane.b32.xlu1 %v422_v34, %s1264_s22  ;;  %708 = vmatprep.subr.bf16.mxu0 %v648_v38  ;;  %v681_v40 = vsel %vm301_vm4, %v646_v39, %v648_v38 }
  0xa9   : > { %465 = vmatpush1.bf16.msra.mxu1 %v1393_v29  ;;  %649 = vrot.lane.b32.xlu0 %v1340_v9, %s1265_s23 }
  0xaa   : > { %466 = vmatprep.subr.bf16.mxu1 %v424_v37  ;;  %709 = vmatpush1.bf16.msra.mxu0 %v681_v40 }
  0xab   : > { %v770_v50 = vpop.permute.xlu0 %769  ;;  %v772_v52 = vpop.permute.xlu1 %771 }
  0xac   : > { %555 = vrot.lane.b32.xlu1 %v424_v37, %s1264_s22 }
  0xad   : > { %467 = vmatpush1.bf16.msra.mxu1 %v402_v33  ;;  %773 = vrot.lane.b32.xlu0 %v1340_v9, %s1266_s24 }
  0xae   : > { %584 = vmatprep.subr.bf16.mxu1 %v524_v35 }
  0xb0   : > { %651 = vrot.lane.b32.xlu1 %v1351_v13, %s1265_s23  ;;  %483 = vmatmul.mubr.bf16.vlgmr.msra.gmra.mrb[0].mxu1 %v1417_v41 }
  0xb1   : > { %653 = vrot.lane.b32.xlu0 %v1336_v8, %s1265_s23  ;;  %585 = vmatpush1.bf16.msra.mxu1 %v557_v42 }
  0xb2   : > { %1179 = vmatprep.mubr.msk.bf16.mxu1 %vm443_vm1, %v1425_v43 }
  0xb4   : > { %775 = vrot.lane.b32.xlu1 %v1351_v13, %s1266_s24 }
  0xb5   : > { %777 = vrot.lane.b32.xlu0 %v1336_v8, %s1266_s24 }
  0xb8   : > { %655 = vrot.lane.b32.xlu1 %v1353_v16, %s1265_s23  ;;  %493 = vmatmul.mubr.bf16.gmra.mrb[4].mxu1 %v1439_v44 }
  0xb9   : > { %657 = vrot.lane.b32.xlu0 %v1347_v12, %s1265_s23  ;;  %1180 = vmatprep.mubr.msk.bf16.mxu1 %vm443_vm1, %v1330_v3 }
  0xbc   : > { %779 = vrot.lane.b32.xlu1 %v1353_v16, %s1266_s24  ;;  %v805_v16 = vsel %vm321_vm5, %v770_v50, %v772_v52 }
  0xbd   : > { %781 = vrot.lane.b32.xlu0 %v1347_v12, %s1266_s24 }
  0xc0   : > { %659 = vrot.lane.b32.xlu1 %v1366_v20, %s1265_s23 }
  0xc1   : > { %661 = vrot.lane.b32.xlu0 %v1360_v17, %s1265_s23 }
  0xc4   : > { %783 = vrot.lane.b32.xlu1 %v1366_v20, %s1266_s24 }
  0xc5   : > { %785 = vrot.lane.b32.xlu0 %v1360_v17, %s1266_s24 }
  0xc8   : > { %663 = vrot.lane.b32.xlu1 %v1377_v24, %s1265_s23 }
  0xc9   : > { %665 = vrot.lane.b32.xlu0 %v1371_v21, %s1265_s23 }
  0xcc   : > { %787 = vrot.lane.b32.xlu1 %v1377_v24, %s1266_s24 }
  0xcd   : > { %789 = vrot.lane.b32.xlu0 %v1371_v21, %s1266_s24 }
  0xd0   : > { %667 = vrot.lane.b32.xlu1 %v1388_v28, %s1265_s23 }
  0xd1   : > { %669 = vrot.lane.b32.xlu0 %v1382_v25, %s1265_s23 }
  0xd4   : > { %791 = vrot.lane.b32.xlu1 %v1388_v28, %s1266_s24 }
  0xd5   : > { %793 = vrot.lane.b32.xlu0 %v1382_v25, %s1266_s24 }
  0xd8   : > { %671 = vrot.lane.b32.xlu1 %v420_v32, %s1265_s23 }
  0xd9   : > { %673 = vrot.lane.b32.xlu0 %v1393_v29, %s1265_s23 }
  0xdc   : > { %795 = vrot.lane.b32.xlu1 %v420_v32, %s1266_s24 }
  0xdd   : > { %797 = vrot.lane.b32.xlu0 %v1393_v29, %s1266_s24 }
  0xe0   : > { %675 = vrot.lane.b32.xlu1 %v422_v34, %s1265_s23 }
  0xe1   : > { %677 = vrot.lane.b32.xlu0 %v402_v33, %s1265_s23 }
  0xe4   : > { %799 = vrot.lane.b32.xlu1 %v422_v34, %s1266_s24 }
  0xe5   : > { %801 = vrot.lane.b32.xlu0 %v402_v33, %s1266_s24 }
  0xe8   : > { %679 = vrot.lane.b32.xlu1 %v424_v37, %s1265_s23 }
  0xe9   : > { %895 = vperm.xlu0 %1231, %v203_v45  }
  0xec   : > { %803 = vrot.lane.b32.xlu1 %v424_v37, %s1266_s24 }
  0xed   : > { %910 = vperm.xlu0 %1231, %v206_v48  }
  0xf0   : > { %900 = vperm.xlu1 %1232, %v204_v47  }
  0xf4   : > { %905 = vperm.xlu1 %1232, %v205_v49  }
  0xfb   : > { %v526_v51 = vpop.permute.xlu0 %525 }
  0xff   : > { %v530_v53 = vpop.permute.xlu0 %529 }
 0x102   : > { %v528_v54 = vpop.permute.xlu1 %527 }
 0x103   : > { %v558_v55 = vsel %vm261_vm3, %v526_v51, %v528_v54  ;;  %586 = vmatprep.subr.bf16.mxu1 %v528_v54  ;;  %v534_v56 = vpop.permute.xlu0 %533 }
 0x104   : > { %587 = vmatpush1.bf16.msra.mxu1 %v558_v55 }
 0x106   : > { %v532_v57 = vpop.permute.xlu1 %531 }
 0x107   : > { %v559_v58 = vsel %vm261_vm3, %v530_v53, %v532_v57  ;;  %588 = vmatprep.subr.bf16.mxu1 %v532_v57  ;;  %v538_v59 = vpop.permute.xlu0 %537 }
 0x108   : > { %589 = vmatpush1.bf16.msra.mxu1 %v559_v58 }
 0x10a   : > { %v536_v60 = vpop.permute.xlu1 %535 }
 0x10b   : > { %v560_v61 = vsel %vm261_vm3, %v534_v56, %v536_v60  ;;  %590 = vmatprep.subr.bf16.mxu1 %v536_v60  ;;  %v542_v62 = vpop.permute.xlu0 %541 }
 0x10c   : > { %591 = vmatpush1.bf16.msra.mxu1 %v560_v61 }
 0x10e   : > { %v540_v63 = vpop.permute.xlu1 %539 }
 0x10f   : > { %v561_v0 = vsel %vm261_vm3, %v538_v59, %v540_v63  ;;  %592 = vmatprep.subr.bf16.mxu1 %v540_v63  ;;  %v546_v1 = vpop.permute.xlu0 %545 }
 0x110   : > { %593 = vmatpush1.bf16.msra.mxu1 %v561_v0 }
 0x112   : > { %v544_v2 = vpop.permute.xlu1 %543 }
 0x113   : > { %v562_v4 = vsel %vm261_vm3, %v542_v62, %v544_v2  ;;  %594 = vmatprep.subr.bf16.mxu1 %v544_v2  ;;  %v550_v5 = vpop.permute.xlu0 %549 }
 0x114   : > { %595 = vmatpush1.bf16.msra.mxu1 %v562_v4 }
 0x116   : > { %v548_v6 = vpop.permute.xlu1 %547 }
 0x117   : > { %v563_v7 = vsel %vm261_vm3, %v546_v1, %v548_v6  ;;  %596 = vmatprep.subr.bf16.mxu1 %v548_v6  ;;  %v554_v8 = vpop.permute.xlu0 %553  ;;  %v1242_v1 = vld [vmem:[%s1632_s3] sm:$0xff]  }
 0x118   : > { %597 = vmatpush1.bf16.msra.mxu1 %v563_v7 }
 0x11a   : > { %v552_v9 = vpop.permute.xlu1 %551 }
 0x11b   : > { %v564_v10 = vsel %vm261_vm3, %v550_v5, %v552_v9  ;;  %598 = vmatprep.subr.bf16.mxu1 %v552_v9  ;;  %v650_v11 = vpop.permute.xlu0 %649 }
 0x11c   : > { %599 = vmatpush1.bf16.msra.mxu1 %v564_v10 }
 0x11e   : > { %v556_v12 = vpop.permute.xlu1 %555 }
 0x11f   : > { %v565_v13 = vsel %vm261_vm3, %v554_v8, %v556_v12  ;;  %600 = vmatprep.subr.bf16.mxu1 %v556_v12  ;;  %v774_v14 = vpop.permute.xlu0 %773  ;;  %v1245_v8 = vld [vmem:[%s1632_s3 + $0x18] sm:$0xff]   ;;  %v1247_v12 = vld [vmem:[%s1632_s3 + $0x28] sm:$0xff]  }
 0x120   : > { %601 = vmatpush1.bf16.msra.mxu1 %v565_v13  ;;  %v1248_v13 = vld [vmem:[%s1632_s3 + $0x30] sm:$0xff]  }
 0x121   : > { %832 = vmatprep.subr.bf16.mxu1 %v772_v52 }
 0x122   : > { %v652_v15 = vpop.permute.xlu1 %651 }
 0x123   : > { %710 = vmatprep.subr.bf16.mxu0 %v652_v15  ;;  %617 = vmatmul.mubr.bf16.vlgmr.msra.gmra.mrb[8].mxu1 %v1417_v41  ;;  %v682_v17 = vsel %vm301_vm4, %v650_v11, %v652_v15  ;;  %v654_v18 = vpop.permute.xlu0 %653  ;;  %v1246_v11 = vld [vmem:[%s1632_s3 + $0x20] sm:$0xff]  }
 0x124   : > { %711 = vmatpush1.bf16.msra.mxu0 %v682_v17  ;;  %833 = vmatpush1.bf16.msra.mxu1 %v805_v16  ;;  %v1250_v15 = vld [vmem:[%s1632_s3 + $0x40] sm:$0xff]   ;;  %v1251_v16 = vld [vmem:[%s1632_s3 + $0x48] sm:$0xff]   ;;  %v1252_v17 = vld [vmem:[%s1632_s3 + $0x50] sm:$0xff]  }
 0x125   : > { %1181 = vmatprep.mubr.msk.bf16.mxu1 %vm443_vm1, %v1425_v43 }
 0x126   : > { %v776_v19 = vpop.permute.xlu1 %775 }
 0x127   : > { %v806_v20 = vsel %vm321_vm5, %v774_v14, %v776_v19  ;;  %834 = vmatprep.subr.bf16.mxu1 %v776_v19  ;;  %v778_v21 = vpop.permute.xlu0 %777  ;;  %v1249_v14 = vld [vmem:[%s1632_s3 + $0x38] sm:$0xff]   ;;  %v1254_v19 = vld [vmem:[%s1632_s3 + $0x60] ss:$0 sps:$4 sm:$0x33]  }
 0x128   : > { %835 = vmatpush1.bf16.msra.mxu1 %v806_v20  ;;  %v1272_v20 = vmov 65535  }
 0x12a   : > { %v656_v22 = vpop.permute.xlu1 %655 }
 0x12b   : > { %712 = vmatprep.subr.bf16.mxu0 %v656_v22  ;;  %v683_v23 = vsel %vm301_vm4, %v654_v18, %v656_v22  ;;  %v658_v24 = vpop.permute.xlu0 %657  ;;  %627 = vmatmul.mubr.bf16.gmra.mrb[12].mxu1 %v1439_v44  ;;  %v1253_v18 = vld [vmem:[%s1632_s3 + $0x58] sm:$0xff]  }
 0x12c   : > { %713 = vmatpush1.bf16.msra.mxu0 %v683_v23  ;;  %1184 = vmatprep.mubr.msk.bf16.mxu1 %vm443_vm1, %v1330_v3 }
 0x12e   : > { %v780_v25 = vpop.permute.xlu1 %779 }
 0x12f   : > { %v807_v26 = vsel %vm321_vm5, %v778_v21, %v780_v25  ;;  %836 = vmatprep.subr.bf16.mxu1 %v780_v25  ;;  %v782_v27 = vpop.permute.xlu0 %781  ;;  %v1017_v21 = vsel %vm1015_vm10, 4294967295, %v1272_v20 }
 0x130   : > { %837 = vmatpush1.bf16.msra.mxu1 %v807_v26  ;;  %v1018_v22 = vsel %vm1016_vm11, %v1017_v21, 0 }
 0x131   : > { %v1020_v23 = vand.u32 %v1254_v19, %v1018_v22 }
 0x132   : > { %v660_v28 = vpop.permute.xlu1 %659 }
 0x133   : > { %714 = vmatprep.subr.bf16.mxu0 %v660_v28  ;;  %v684_v29 = vsel %vm301_vm4, %v658_v24, %v660_v28  ;;  %v662_v30 = vpop.permute.xlu0 %661 }
 0x134   : > { %715 = vmatpush1.bf16.msra.mxu0 %v684_v29 }
 0x136   : > { %v784_v31 = vpop.permute.xlu1 %783 }
 0x137   : > { %v808_v32 = vsel %vm321_vm5, %v782_v27, %v784_v31  ;;  %838 = vmatprep.subr.bf16.mxu1 %v784_v31  ;;  %v786_v33 = vpop.permute.xlu0 %785 }
 0x138   : > { %839 = vmatpush1.bf16.msra.mxu1 %v808_v32 }
 0x13a   : > { %v664_v34 = vpop.permute.xlu1 %663 }
 0x13b   : > { %716 = vmatprep.subr.bf16.mxu0 %v664_v34  ;;  %v685_v3 = vsel %vm301_vm4, %v662_v30, %v664_v34  ;;  %v666_v35 = vpop.permute.xlu0 %665 }
 0x13c   : > { %717 = vmatpush1.bf16.msra.mxu0 %v685_v3 }
 0x13e   : > { %v788_v36 = vpop.permute.xlu1 %787 }
 0x13f   : > { %v809_v37 = vsel %vm321_vm5, %v786_v33, %v788_v36  ;;  %840 = vmatprep.subr.bf16.mxu1 %v788_v36  ;;  %v790_v38 = vpop.permute.xlu0 %789 }
 0x140   : > { %841 = vmatpush1.bf16.msra.mxu1 %v809_v37 }
 0x142   : > { %v668_v39 = vpop.permute.xlu1 %667 }
 0x143   : > { %718 = vmatprep.subr.bf16.mxu0 %v668_v39  ;;  %v686_v40 = vsel %vm301_vm4, %v666_v35, %v668_v39  ;;  %v670_v42 = vpop.permute.xlu0 %669 }
 0x144   : > { %719 = vmatpush1.bf16.msra.mxu0 %v686_v40 }
 0x146   : > { %v792_v45 = vpop.permute.xlu1 %791 }
 0x147   : > { %v810_v47 = vsel %vm321_vm5, %v790_v38, %v792_v45  ;;  %842 = vmatprep.subr.bf16.mxu1 %v792_v45  ;;  %v794_v48 = vpop.permute.xlu0 %793 }
 0x148   : > { %843 = vmatpush1.bf16.msra.mxu1 %v810_v47 }
 0x14a   : > { %v672_v49 = vpop.permute.xlu1 %671 }
 0x14b   : > { %720 = vmatprep.subr.bf16.mxu0 %v672_v49  ;;  %v687_v50 = vsel %vm301_vm4, %v670_v42, %v672_v49  ;;  %v674_v51 = vpop.permute.xlu0 %673 }
 0x14c   : > { %721 = vmatpush1.bf16.msra.mxu0 %v687_v50 }
 0x14e   : > { %v796_v52 = vpop.permute.xlu1 %795 }
 0x14f   : > { %v811_v53 = vsel %vm321_vm5, %v794_v48, %v796_v52  ;;  %844 = vmatprep.subr.bf16.mxu1 %v796_v52  ;;  %v798_v55 = vpop.permute.xlu0 %797 }
 0x150   : > { %845 = vmatpush1.bf16.msra.mxu1 %v811_v53 }
 0x152   : > { %v676_v54 = vpop.permute.xlu1 %675 }
 0x153   : > { %722 = vmatprep.subr.bf16.mxu0 %v676_v54  ;;  %v688_v56 = vsel %vm301_vm4, %v674_v51, %v676_v54  ;;  %v678_v59 = vpop.permute.xlu0 %677 }
 0x154   : > { %723 = vmatpush1.bf16.msra.mxu0 %v688_v56 }
 0x156   : > { %v800_v57 = vpop.permute.xlu1 %799 }
 0x157   : > { %v812_v58 = vsel %vm321_vm5, %v798_v55, %v800_v57  ;;  %846 = vmatprep.subr.bf16.mxu1 %v800_v57  ;;  %v802_v63 = vpop.permute.xlu0 %801 }
 0x158   : > { %847 = vmatpush1.bf16.msra.mxu1 %v812_v58 }
 0x15a   : > { %v680_v60 = vpop.permute.xlu1 %679 }
 0x15b   : > { %724 = vmatprep.subr.bf16.mxu0 %v680_v60  ;;  %v689_v61 = vsel %vm301_vm4, %v678_v59, %v680_v60 }
 0x15c   : > { %725 = vmatpush1.bf16.msra.mxu0 %v689_v61 }
 0x15d   : > { %1022 = vmatprep.subr.bf16.mxu0 %v1271_v46 }
 0x15e   : > { %v804_v62 = vpop.permute.xlu1 %803 }
 0x15f   : > { %v813_v0 = vsel %vm321_vm5, %v802_v63, %v804_v62  ;;  %848 = vmatprep.subr.bf16.mxu1 %v804_v62  ;;  %741 = vmatmul.mubr.bf16.vlgmr.msra.gmra.mrb[0].mxu0 %v1417_v41 }
 0x160   : > { %849 = vmatpush1.bf16.msra.mxu1 %v813_v0  ;;  %1183 = vmatprep.mubr.msk.bf16.mxu0 %vm443_vm1, %v1425_v43 }
 0x161   : > { %1023 = vmatpush1.bf16.msra.mxu0 %v1242_v1 }
 0x162   : > { %1024 = vmatprep.subr.bf16.mxu0 %v1271_v46 }
 0x163   : > { %865 = vmatmul.mubr.bf16.vlgmr.msra.gmra.mrb[16].mxu1 %v1417_v41  ;;  %v1243_v41 = vld [vmem:[%s1632_s3 + $0x8] sm:$0xff]  }
 0x164   : > { %1185 = vmatprep.mubr.msk.bf16.mxu1 %vm443_vm1, %v1425_v43 }
 0x165   : > { %1025 = vmatpush1.bf16.msra.mxu0 %v1243_v41 }
 0x166   : > { %1026 = vmatprep.subr.bf16.mxu0 %v1271_v46 }
 0x167   : > { %751 = vmatmul.mubr.bf16.gmra.mrb[4].mxu0 %v1439_v44 }
 0x168   : > { %v896_v51 = vpop.permute.xlu0 %895 }
 0x16b   : > { %875 = vmatmul.mubr.bf16.gmra.mrb[20].mxu1 %v1439_v44  ;;  %v1244_v44 = vld [vmem:[%s1632_s3 + $0x10] sm:$0xff]  }
 0x16c   : > { %1027 = vmatpush1.bf16.msra.mxu0 %v1244_v44  ;;  %v911_v21 = vpop.permute.xlu0 %910 }
 0x16d   : > { %1028 = vmatprep.subr.bf16.mxu0 %v1271_v46 }
 0x16f   : > { %v901_v59 = vpop.permute.xlu1 %900 }
 0x170   : > { %1029 = vmatpush1.bf16.msra.mxu0 %v1245_v8 }
 0x171   : > { %1030 = vmatprep.subr.bf16.mxu0 %v1271_v46 }
 0x174   : > { %1031 = vmatpush1.bf16.msra.mxu0 %v1246_v11 }
 0x175   : > { %1032 = vmatprep.subr.bf16.mxu0 %v1271_v46 }
 0x178   : > { %1033 = vmatpush1.bf16.msra.mxu0 %v1247_v12 }
 0x179   : > { %1034 = vmatprep.subr.bf16.mxu0 %v1271_v46 }
 0x17c   : > { %1035 = vmatpush1.bf16.msra.mxu0 %v1248_v13 }
 0x17d   : > { %1036 = vmatprep.subr.bf16.mxu0 %v1271_v46 }
 0x180   : > { %1037 = vmatpush1.bf16.msra.mxu0 %v1249_v14 }
 0x181   : > { %1038 = vmatprep.subr.bf16.mxu0 %v1271_v46 }
 0x183   : > { %v1547_v2 = vpop.f32.mrb[0].mxu1 }
 0x184   : > { %v1549_v4 = vpop.f32.mrb[1].mxu1  ;;  %1039 = vmatpush1.bf16.msra.mxu0 %v1250_v15  ;;  %v906_v15 = vpop.permute.xlu1 %905 }
 0x185   : > { %v1554_v5 = vpop.f32.mrb[2].mxu1  ;;  %1040 = vmatprep.subr.bf16.mxu0 %v1271_v46 }
 0x186   : > { %v1557_v43 = vpop.f32.mrb[3].mxu1 }
 0x188   : > { %1041 = vmatpush1.bf16.msra.mxu0 %v1251_v16 }
 0x189   : > { %1042 = vmatprep.subr.bf16.mxu0 %v1271_v46 }
 0x18b   : > { %v1563_v6 = vpop.f32.mrb[4].mxu1 }
 0x18c   : > { %v1565_v7 = vpop.f32.mrb[5].mxu1  ;;  %1043 = vmatpush1.bf16.msra.mxu0 %v1252_v17 }
 0x18d   : > { %v1570_v9 = vpop.f32.mrb[6].mxu1  ;;  %1044 = vmatprep.subr.bf16.mxu0 %v1271_v46 }
 0x18e   : > { %v1573_v10 = vpop.f32.mrb[7].mxu1 }
 0x190   : > { %1045 = vmatpush1.bf16.msra.mxu0 %v1253_v18 }
 0x191   : > { %1046 = vmatprep.subr.bf16.mxu0 %v1271_v46 }
 0x194   : > { %1047 = vmatpush1.bf16.msra.mxu0 %v1020_v23 }
 0x1f6   : > { %v618_v24 = vpop.f32.mrb[8].mxu1 }
 0x1f7   : > { %v637_v25 = vmax.f32 %v1547_v2, %v618_v24  ;;  %v620_v26 = vpop.f32.mrb[9].mxu1 }
 0x1f8   : > { %v638_v27 = vmax.f32 %v1549_v4, %v620_v26  ;;  %v622_v28 = vpop.f32.mrb[10].mxu1 }
 0x1f9   : > { %v639_v29 = vmax.f32 %v1554_v5, %v622_v28  ;;  %v624_v30 = vpop.f32.mrb[11].mxu1 }
 0x1fa   : > { %v640_v31 = vmax.f32 %v1557_v43, %v624_v30 }
 0x1fe   : > { %v628_v32 = vpop.f32.mrb[12].mxu1 }
 0x1ff   : > { %v641_v33 = vmax.f32 %v1563_v6, %v628_v32  ;;  %v630_v34 = vpop.f32.mrb[13].mxu1 }
 0x200   : > { %v642_v46 = vmax.f32 %v1565_v7, %v630_v34  ;;  %v632_v3 = vpop.f32.mrb[14].mxu1 }
 0x201   : > { %v643_v35 = vmax.f32 %v1570_v9, %v632_v3  ;;  %v634_v36 = vpop.f32.mrb[15].mxu1 }
 0x202   : > { %v644_v37 = vmax.f32 %v1573_v10, %v634_v36 }
 0x232   : > { %v742_v38 = vpop.f32.mrb[0].mxu0 }
 0x233   : > { %v761_v39 = vmax.f32 %v637_v25, %v742_v38  ;;  %v744_v40 = vpop.f32.mrb[1].mxu0 }
 0x234   : > { %v762_v42 = vmax.f32 %v638_v27, %v744_v40  ;;  %v746_v45 = vpop.f32.mrb[2].mxu0 }
 0x235   : > { %v763_v47 = vmax.f32 %v639_v29, %v746_v45  ;;  %v748_v48 = vpop.f32.mrb[3].mxu0 }
 0x236   : > { %v764_v49 = vmax.f32 %v640_v31, %v748_v48  ;;  %v866_v50 = vpop.f32.mrb[16].mxu1 }
 0x237   : > { %v885_v52 = vmax.f32 %v761_v39, %v866_v50  ;;  %v868_v53 = vpop.f32.mrb[17].mxu1 }
 0x238   : > { %v886_v54 = vmax.f32 %v762_v42, %v868_v53  ;;  %v870_v55 = vpop.f32.mrb[18].mxu1 }
 0x239   : > { %v913_v56 = vadd.f32 %v896_v51, %v885_v52  ;;  %v887_v57 = vmax.f32 %v763_v47, %v870_v55  ;;  %v872_v58 = vpop.f32.mrb[19].mxu1 }
 0x23a   : > { %v914_v60 = vadd.f32 %v896_v51, %v886_v54  ;;  %v888_v61 = vmax.f32 %v764_v49, %v872_v58  ;;  %v752_v62 = vpop.f32.mrb[4].mxu0 }
 0x23b   : > { %v915_v63 = vadd.f32 %v901_v59, %v887_v57  ;;  %v765_v0 = vmax.f32 %v641_v33, %v752_v62  ;;  %v754_v1 = vpop.f32.mrb[5].mxu0  ;;  %v921_v5 = vmax.f32 %v913_v56, 0.0 }
 0x23c   : > { %v916_v2 = vadd.f32 %v901_v59, %v888_v61  ;;  %v766_v4 = vmax.f32 %v642_v46, %v754_v1  ;;  %v756_v41 = vpop.f32.mrb[6].mxu0  ;;  %v922_v7 = vmax.f32 %v914_v60, 0.0 }
 0x23d   : > { %v923_v43 = vmax.f32 %v915_v63, 0.0  ;;  %v767_v44 = vmax.f32 %v643_v35, %v756_v41  ;;  %v758_v6 = vpop.f32.mrb[7].mxu0 }
 0x23e   : > { %v924_v8 = vmax.f32 %v916_v2, 0.0  ;;  %v768_v9 = vmax.f32 %v644_v37, %v758_v6  ;;  %v876_v10 = vpop.f32.mrb[20].mxu1 }
 0x23f   : > { %v929_v11 = vpack.c.bf16 %v923_v43, %v921_v5  ;;  %v889_v12 = vmax.f32 %v765_v0, %v876_v10  ;;  %v878_v13 = vpop.f32.mrb[21].mxu1 }
 0x240   : > { %v930_v14 = vpack.c.bf16 %v924_v8, %v922_v7  ;;  %v890_v16 = vmax.f32 %v766_v4, %v878_v13  ;;  %v880_v17 = vpop.f32.mrb[22].mxu1 }
 0x241   : > { %v917_v18 = vadd.f32 %v906_v15, %v889_v12  ;;  %v891_v19 = vmax.f32 %v767_v44, %v880_v17  ;;  %v882_v20 = vpop.f32.mrb[23].mxu1 }
 0x242   : > { %v918_v22 = vadd.f32 %v906_v15, %v890_v16  ;;  %v892_v23 = vmax.f32 %v768_v9, %v882_v20  ;;  %1199 = vmatprep.mubr.msk.bf16.mxu0 %vm1008_vm12, %v930_v14 }
 0x243   : > { %v919_v24 = vadd.f32 %v911_v21, %v891_v19  ;;  %1055 = vmatmul.mubr.bf16.vlgmr.msra.gmra.mrb[8].mxu0 %v929_v11  ;;  %v925_v26 = vmax.f32 %v917_v18, 0.0 }
 0x244   : > { %v920_v25 = vadd.f32 %v911_v21, %v892_v23  ;;  %v926_v28 = vmax.f32 %v918_v22, 0.0 }
 0x245   : > { %v927_v27 = vmax.f32 %v919_v24, 0.0 }
 0x246   : > { %v928_v29 = vmax.f32 %v920_v25, 0.0 }
 0x247   : > { %v931_v30 = vpack.c.bf16 %v927_v27, %v925_v26 }
 0x248   : > { %v932_v31 = vpack.c.bf16 %v928_v29, %v926_v28 }
 0x24a   : > { %1200 = vmatprep.mubr.msk.bf16.mxu0 %vm1008_vm12, %v932_v31 }
 0x24b   : > { %1063 = vmatmul.mubr.bf16.gmra.mrb[12].mxu0 %v931_v30 }
 0x316   : > { %v1056_v32 = vpop.f32.mrb[8].mxu0 }
 0x317   : > { %v1209_v33 = vpack.c.bf16 %v1056_v32, %v1056_v32  ;;  %v1058_v34 = vpop.f32.mrb[9].mxu0 }
 0x318   : > { %v1059_v46 = vpop.f32.mrb[10].mxu0 }
 0x319   : > { %1088 = vst.msk [vmem:[%s197_s27] sm:$0xf] %vm1087_vm13, %v1209_v33  ;;  %v1210_v3 = vpack.c.bf16 %v1059_v46, %v1059_v46  ;;  %v1061_v35 = vpop.f32.mrb[11].mxu0 }
 0x31b   : > { %1089 = vst.msk [vmem:[%s197_s27 + $0x4] sm:$0xf] %vm1087_vm13, %v1210_v3 }
 0x31e   : > { %v1064_v36 = vpop.f32.mrb[12].mxu0 }
 0x31f   : > { %v1211_v37 = vpack.c.bf16 %v1064_v36, %v1064_v36  ;;  %v1066_v38 = vpop.f32.mrb[13].mxu0 }
 0x320   : > { %v1067_v39 = vpop.f32.mrb[14].mxu0 }
 0x321   : > { %1090 = vst.msk [vmem:[%s197_s27 + $0x8] sm:$0xf] %vm1087_vm13, %v1211_v37  ;;  %v1212_v40 = vpack.c.bf16 %v1067_v39, %v1067_v39  ;;  %v1069_v42 = vpop.f32.mrb[15].mxu0 }
 0x323   : > { %1091 = vst.msk [vmem:[%s197_s27 + $0xc] sm:$0xf] %vm1087_vm13, %v1212_v40 }
 0x324 PF: > { %s14_s15 = sadd.s32 1, %s1261_s15  }
 0x325   : > { %p11_p4 = scmp.ge.s32.totalorder %s14_s15, 4  }
 0x327   :  { %13 = sbr.rel (!%p11_p4) target bundleno = 1 (0x1), region = 66 }

// kernel: simple_cnn_forward.5
= control target key start
LH: loop header
LB: loop body
LE: loop exit
PB: predicated region body
PF: predicated region fallthrough
CT: control target
= control target key end

     0   :  { %v181_v27 = vlaneseq  ;;  %v1348_v35 = vmov 1966171168   ;;  %vm1350_vm0 = vmmov 0   ;;  %s1660_s0 = inlined_call_operand.vmem [shape: bf16[2,1152], index: 0, kind: input, shape index: {}]   ;;  %s1661_s1 = inlined_call_operand.vmem [shape: bf16[1152,128], index: 1, kind: input, shape index: {}]   ;;  %s1662_s2 = inlined_call_operand.vmem [shape: f32[1,128], index: 2, kind: input, shape index: {}]   ;;  %s1663_s3 = inlined_call_operand.vmem [shape: bf16[128,10], index: 3, kind: input, shape index: {}]   ;;  %s1664_s4 = inlined_call_operand.vmem [shape: f32[1,10], index: 4, kind: input, shape index: {}]   ;;  %s1665_s5 = inlined_call_operand.hbm [shape: f32[2,10], index: 5, kind: output, shape index: {}]  }
   0x1   :  { %v1243_v0 = vld [vmem:[%s1661_s1 + $0x40] sm:$0xff]   ;;  %v1247_v4 = vld [vmem:[%s1661_s1 + $0x48] sm:$0xff]   ;;  %v1251_v8 = vld [vmem:[%s1661_s1 + $0x50] sm:$0xff]   ;;  %v179_v36 = vunpack.c.l.s4 %v1348_v35 }
   0x2   :  { %v1244_v1 = vld [vmem:[%s1661_s1] sm:$0xff]   ;;  %1093 = vmatprep.subr.bf16.mxu0 %v1243_v0  ;;  %v1248_v5 = vld [vmem:[%s1661_s1 + $0x8] sm:$0xff]   ;;  %v1252_v9 = vld [vmem:[%s1661_s1 + $0x10] sm:$0xff]   ;;  %v182_v32 = vshrl.u32 %v181_v27, 7 }
   0x3   :  { %v1245_v2 = vld [vmem:[%s1661_s1 + $0xc0] sm:$0xff]   ;;  %1094 = vmatpush3.bf16.msra.mxu0 %v1244_v1  ;;  %v1249_v6 = vld [vmem:[%s1661_s1 + $0xc8] sm:$0xff]   ;;  %v1253_v10 = vld [vmem:[%s1661_s1 + $0xd0] sm:$0xff]   ;;  %v180_v39 = vunpack.c.0.s8 %v179_v36 }
   0x4   :  { %v1246_v3 = vld [vmem:[%s1661_s1 + $0x80] sm:$0xff]   ;;  %1115 = vmatprep.subr.bf16.mxu1 %v1245_v2  ;;  %1095 = vmatprep.subr.bf16.mxu0 %v1247_v4  ;;  %v1250_v7 = vld [vmem:[%s1661_s1 + $0x88] sm:$0xff]   ;;  %v1254_v11 = vld [vmem:[%s1661_s1 + $0x90] sm:$0xff]  }
   0x5   :  { %1116 = vmatpush3.bf16.msra.mxu1 %v1246_v3  ;;  %v1255_v12 = vld [vmem:[%s1661_s1 + $0x58] sm:$0xff]   ;;  %v1259_v16 = vld [vmem:[%s1661_s1 + $0x60] sm:$0xff]   ;;  %v1263_v20 = vld [vmem:[%s1661_s1 + $0x68] sm:$0xff]   ;;  %v1487_v41 = vsub.s32 %v180_v39, %v182_v32 }
   0x6   :  { %1117 = vmatprep.subr.bf16.mxu1 %v1249_v6  ;;  %v1256_v13 = vld [vmem:[%s1661_s1 + $0x18] sm:$0xff]   ;;  %v1260_v17 = vld [vmem:[%s1661_s1 + $0x20] sm:$0xff]   ;;  %v1264_v21 = vld [vmem:[%s1661_s1 + $0x28] sm:$0xff]  }
   0x7   :  { %1096 = vmatpush3.bf16.msra.mxu0 %v1248_v5  ;;  %v1257_v14 = vld [vmem:[%s1661_s1 + $0xd8] sm:$0xff]   ;;  %v1261_v18 = vld [vmem:[%s1661_s1 + $0xe0] sm:$0xff]   ;;  %v1265_v22 = vld [vmem:[%s1661_s1 + $0xe8] sm:$0xff]  }
   0x8   :  { %1097 = vmatprep.subr.bf16.mxu0 %v1251_v8  ;;  %v1258_v15 = vld [vmem:[%s1661_s1 + $0x98] sm:$0xff]   ;;  %v1262_v19 = vld [vmem:[%s1661_s1 + $0xa0] sm:$0xff]   ;;  %v1266_v23 = vld [vmem:[%s1661_s1 + $0xa8] sm:$0xff]  }
   0x9   :  { %1118 = vmatpush3.bf16.msra.mxu1 %v1250_v7  ;;  %v1267_v24 = vld [vmem:[%s1661_s1 + $0x70] sm:$0xff]   ;;  %v1271_v29 = vld [vmem:[%s1661_s1 + $0x78] sm:$0xff]   ;;  %v22_v33 = vld [vmem:[%s1660_s0] sm:$0xff] }
   0xa   :  { %1119 = vmatprep.subr.bf16.mxu1 %v1253_v10  ;;  %v1268_v25 = vld [vmem:[%s1661_s1 + $0x30] sm:$0xff]   ;;  %v1272_v30 = vld [vmem:[%s1661_s1 + $0x38] sm:$0xff]   ;;  %v1276_v37 = vld [vmem:[%s1661_s1 + $0x140] sm:$0xff]   ;;  %v177_v38 = vcombine.high %v22_v33, %v22_v33  ;;  %v184_v42 = vrot.slane %v22_v33, %v1487_v41 }
   0xb   :  { %1098 = vmatpush3.bf16.msra.mxu0 %v1252_v9  ;;  %v1269_v26 = vld [vmem:[%s1661_s1 + $0xf0] sm:$0xff]   ;;  %v1273_v31 = vld [vmem:[%s1661_s1 + $0xf8] sm:$0xff]   ;;  %v1278_v40 = vld [vmem:[%s1661_s1 + $0x1c0] sm:$0xff]  }
   0xc   :  { %1099 = vmatprep.subr.bf16.mxu0 %v1255_v12  ;;  %v1270_v28 = vld [vmem:[%s1661_s1 + $0xb0] sm:$0xff]   ;;  %v1275_v34 = vld [vmem:[%s1661_s1 + $0xb8] sm:$0xff]   ;;  %v1491_v43 = vrot.slane %v177_v38, %v1487_v41  ;;  %v192_v44 = vcombine.high %v184_v42, %v184_v42  ;;  %v200_v45 = vrot.slane %v184_v42, %v1487_v41  ;;  %v1277_v48 = vld [vmem:[%s1661_s1 + $0x100] sm:$0xff]  }
   0xd   :  { %1120 = vmatpush3.bf16.msra.mxu1 %v1254_v11  ;;  %v1280_v51 = vld [vmem:[%s1661_s1 + $0x148] sm:$0xff]   ;;  %v1279_v53 = vld [vmem:[%s1661_s1 + $0x180] sm:$0xff]   ;;  %v1284_v57 = vld [vmem:[%s1661_s1 + $0x150] sm:$0xff]  }
   0xe   :  { %1121 = vmatprep.subr.bf16.mxu1 %v1257_v14  ;;  %v193_v46 = vcombine.high %v1491_v43, %v1491_v43  ;;  %v214_v47 = vrot.slane %v192_v44, %v1487_v41  ;;  %v222_v50 = vcombine.high %v200_v45, %v200_v45  ;;  %v1282_v54 = vld [vmem:[%s1661_s1 + $0x1c8] sm:$0xff]   ;;  %v1286_v59 = vld [vmem:[%s1661_s1 + $0x1d0] sm:$0xff]   ;;  %v1288_v61 = vld [vmem:[%s1661_s1 + $0x158] sm:$0xff]  }
   0xf   :  { %1100 = vmatpush3.bf16.msra.mxu0 %v1256_v13  ;;  %v1281_v56 = vld [vmem:[%s1661_s1 + $0x108] sm:$0xff]   ;;  %v1285_v60 = vld [vmem:[%s1661_s1 + $0x110] sm:$0xff]   ;;  %v1290_v63 = vld [vmem:[%s1661_s1 + $0x1d8] sm:$0xff]  }
  0x10   :  { %1101 = vmatprep.subr.bf16.mxu0 %v1259_v16  ;;  %v221_v49 = vrot.slane %v193_v46, %v1487_v41  ;;  %713 = vmatprep.mubr.bf16.mxu0 %v214_v47  ;;  %v224_v52 = vcombine.high %v214_v47, %v214_v47  ;;  %v1283_v58 = vld [vmem:[%s1661_s1 + $0x188] sm:$0xff]   ;;  %v1287_v62 = vld [vmem:[%s1661_s1 + $0x190] sm:$0xff]   ;;  %v1289_v0 = vld [vmem:[%s1661_s1 + $0x118] sm:$0xff]  }
  0x11   :  { %1122 = vmatpush3.bf16.msra.mxu1 %v1258_v15  ;;  %v1292_v1 = vld [vmem:[%s1661_s1 + $0x160] sm:$0xff]   ;;  %v1291_v2 = vld [vmem:[%s1661_s1 + $0x198] sm:$0xff]   ;;  %v1296_v5 = vld [vmem:[%s1661_s1 + $0x168] sm:$0xff]  }
  0x12   :  { %1123 = vmatprep.subr.bf16.mxu1 %v1261_v18  ;;  %v225_v55 = vcombine.high %v221_v49, %v221_v49  ;;  %753 = vmatprep.mubr.bf16.mxu1 %v224_v52  ;;  %v1294_v3 = vld [vmem:[%s1661_s1 + $0x1e0] sm:$0xff]   ;;  %v1298_v7 = vld [vmem:[%s1661_s1 + $0x1e8] sm:$0xff]   ;;  %v1300_v9 = vld [vmem:[%s1661_s1 + $0x170] sm:$0xff]  }
  0x13   :  { %1102 = vmatpush3.bf16.msra.mxu0 %v1260_v17  ;;  %v1293_v4 = vld [vmem:[%s1661_s1 + $0x120] sm:$0xff]   ;;  %v1297_v8 = vld [vmem:[%s1661_s1 + $0x128] sm:$0xff]   ;;  %v1302_v11 = vld [vmem:[%s1661_s1 + $0x1f0] sm:$0xff]   ;;  %v207_v17 = vrot.slane %v1491_v43, %v1487_v41 }
  0x14   :  { %1103 = vmatprep.subr.bf16.mxu0 %v1263_v20  ;;  %v1295_v6 = vld [vmem:[%s1661_s1 + $0x1a0] sm:$0xff]   ;;  %v1299_v10 = vld [vmem:[%s1661_s1 + $0x1a8] sm:$0xff]   ;;  %v1301_v12 = vld [vmem:[%s1661_s1 + $0x130] sm:$0xff]   ;;  %v1349_v20 = vmov 0.0  }
  0x15   :  { %1124 = vmatpush3.bf16.msra.mxu1 %v1262_v19  ;;  %v1304_v13 = vld [vmem:[%s1661_s1 + $0x178] sm:$0xff]   ;;  %v1303_v14 = vld [vmem:[%s1661_s1 + $0x1b0] sm:$0xff]   ;;  %v1308_v19 = vld [vmem:[%s1661_s1 + $0x200] sm:$0xff]  }
  0x16   :  { %1125 = vmatprep.subr.bf16.mxu1 %v1265_v22  ;;  %v1306_v15 = vld [vmem:[%s1661_s1 + $0x1f8] sm:$0xff]   ;;  %v1309_v22 = vld [vmem:[%s1661_s1 + $0x208] sm:$0xff]  }
  0x17   :  { %1104 = vmatpush3.bf16.msra.mxu0 %v1264_v21  ;;  %v1305_v16 = vld [vmem:[%s1661_s1 + $0x138] sm:$0xff]   ;;  %v223_v21 = vcombine.high %v207_v17, %v207_v17 }
  0x18   :  { %1105 = vmatprep.subr.bf16.mxu0 %v1267_v24  ;;  %v1307_v18 = vld [vmem:[%s1661_s1 + $0x1b8] sm:$0xff]  }
  0x19   :  { %1126 = vmatpush3.bf16.msra.mxu1 %v1266_v23 }
  0x1a   :  { %1127 = vmatprep.subr.bf16.mxu1 %v1269_v26 }
  0x1b   :  { %1106 = vmatpush3.bf16.msra.mxu0 %v1268_v25 }
  0x1c   :  { %1107 = vmatprep.subr.bf16.mxu0 %v1271_v29 }
  0x1d   :  { %1128 = vmatpush3.bf16.msra.mxu1 %v1270_v28 }
  0x1e   :  { %1129 = vmatprep.subr.bf16.mxu1 %v1273_v31 }
  0x1f   :  { %1108 = vmatpush3.bf16.msra.mxu0 %v1272_v30 }
  0x20   :  { %1137 = vmatprep.subr.bf16.mxu0 %v1276_v37 }
  0x21   :  { %1130 = vmatpush3.bf16.msra.mxu1 %v1275_v34 }
  0x22   :  { %1159 = vmatprep.subr.bf16.mxu1 %v1278_v40  ;;  %714 = vmatmul.mubr.bf16.vlgmr.msra.gmra.mrb[0].mxu0 %v200_v45 }
  0x23   :  { %1138 = vmatpush3.bf16.msra.mxu0 %v1277_v48  ;;  %793 = vmatprep.mubr.bf16.mxu0 %v221_v49 }
  0x24   :  { %754 = vmatmul.mubr.bf16.vlgmr.msra.gmra.mrb[0].mxu1 %v222_v50  ;;  %1139 = vmatprep.subr.bf16.mxu0 %v1280_v51 }
  0x25   :  { %1160 = vmatpush3.bf16.msra.mxu1 %v1279_v53  ;;  %833 = vmatprep.mubr.bf16.mxu1 %v225_v55 }
  0x26   :  { %1161 = vmatprep.subr.bf16.mxu1 %v1282_v54 }
  0x27   :  { %1140 = vmatpush3.bf16.msra.mxu0 %v1281_v56 }
  0x28   :  { %1141 = vmatprep.subr.bf16.mxu0 %v1284_v57 }
  0x29   :  { %1162 = vmatpush3.bf16.msra.mxu1 %v1283_v58 }
  0x2a   :  { %1163 = vmatprep.subr.bf16.mxu1 %v1286_v59 }
  0x2b   :  { %1142 = vmatpush3.bf16.msra.mxu0 %v1285_v60 }
  0x2c   :  { %1143 = vmatprep.subr.bf16.mxu0 %v1288_v61 }
  0x2d   :  { %1164 = vmatpush3.bf16.msra.mxu1 %v1287_v62 }
  0x2e   :  { %1165 = vmatprep.subr.bf16.mxu1 %v1290_v63 }
  0x2f   :  { %1144 = vmatpush3.bf16.msra.mxu0 %v1289_v0 }
  0x30   :  { %1145 = vmatprep.subr.bf16.mxu0 %v1292_v1 }
  0x31   :  { %1166 = vmatpush3.bf16.msra.mxu1 %v1291_v2 }
  0x32   :  { %1167 = vmatprep.subr.bf16.mxu1 %v1294_v3 }
  0x33   :  { %1146 = vmatpush3.bf16.msra.mxu0 %v1293_v4 }
  0x34   :  { %1147 = vmatprep.subr.bf16.mxu0 %v1296_v5 }
  0x35   :  { %1168 = vmatpush3.bf16.msra.mxu1 %v1295_v6 }
  0x36   :  { %1169 = vmatprep.subr.bf16.mxu1 %v1298_v7 }
  0x37   :  { %1148 = vmatpush3.bf16.msra.mxu0 %v1297_v8 }
  0x38   :  { %1149 = vmatprep.subr.bf16.mxu0 %v1300_v9 }
  0x39   :  { %1170 = vmatpush3.bf16.msra.mxu1 %v1299_v10 }
  0x3a   :  { %1171 = vmatprep.subr.bf16.mxu1 %v1302_v11 }
  0x3b   :  { %1150 = vmatpush3.bf16.msra.mxu0 %v1301_v12 }
  0x3c   :  { %1151 = vmatprep.subr.bf16.mxu0 %v1304_v13 }
  0x3d   :  { %1172 = vmatpush3.bf16.msra.mxu1 %v1303_v14 }
  0x3e   :  { %1173 = vmatprep.subr.bf16.mxu1 %v1306_v15 }
  0x3f   :  { %1152 = vmatpush3.bf16.msra.mxu0 %v1305_v16 }
  0x40   :  { %1199 = vmatprep.subr.bf16.mxu0 %v1349_v20 }
  0x41   :  { %1174 = vmatpush3.bf16.msra.mxu1 %v1307_v18 }
  0x42   :  { %794 = vmatmul.mubr.bf16.vlgmr.msra.gmra.mrb[4].mxu0 %v207_v17  ;;  %1219 = vmatprep.subr.bf16.mxu1 %v1349_v20 }
  0x43   :  { %1200 = vmatpush3.bf16.msra.mxu0 %v1308_v19  ;;  %1215 = vmatprep.mubr.msk.bf16.mxu0 %vm1350_vm0, %v1349_v20 }
  0x44   :  { %10 = vsyncpa [#allocation3], 0  ;;  %834 = vmatmul.mubr.bf16.vlgmr.msra.gmra.mrb[4].mxu1 %v223_v21  ;;  %1201 = vmatprep.subr.bf16.mxu0 %v1349_v20  ;;  %v1310_v23 = vld [vmem:[%s1661_s1 + $0x210] sm:$0xff]   ;;  %v1311_v24 = vld [vmem:[%s1661_s1 + $0x218] sm:$0xff]   ;;  %s1351_s7 = smov [#allocation2]   ;;  %vm994_vm1 = vcmask 74752  }
  0x45   :  { %1235 = vmatprep.mubr.msk.bf16.mxu1 %vm1350_vm0, %v1349_v20  ;;  %v1312_v25 = vld [vmem:[%s1661_s1 + $0x220] sm:$0xff]   ;;  %v1313_v26 = vld [vmem:[%s1661_s1 + $0x228] sm:$0xff]   ;;  %v1314_v27 = vld [vmem:[%s1661_s1 + $0x230] sm:$0xff]   ;;  %s1002_s8 = sshll.u32 %s1351_s7, 4  ;;  %s1003_s8 = int_to_ptr.vmem [resolvable:$true] %s1002_s8 }
  0x46   :  { %v1315_v28 = vld [vmem:[%s1661_s1 + $0x238] sm:$0xff]   ;;  %v1011_v29 = vld.sshfl [vmem:[%s1660_s0 + $0x8] sm:$0x1 pattern:$0x75316420]  ;;  %v1316_v31 = vld [vmem:[%s1663_s3] sm:$0xff]   ;;  %p1329_p1 = scmp.lt.s32.totalorder %s1003_s8, %s1003_s8 }
  0x47   :  { %1202 = vmatpush3.bf16.msra.mxu0 %v1309_v22  ;;  %v239_v30 = vrot.slane %v1011_v29, %v1487_v41  ;;  %1220 = vmatpush3.bf16.msra.mxu1 %v1316_v31  ;;  %v1317_v32 = vld [vmem:[%s1663_s3 + $0x8] sm:$0xff]   ;;  %v1318_v33 = vld [vmem:[%s1663_s3 + $0x10] sm:$0xff]   ;;  %v1319_v34 = vld [vmem:[%s1663_s3 + $0x18] sm:$0xff]   ;;  %s1324_s9 = scalar_lea.vmem %s1003_s8, 32 }
  0x48   :  { %1203 = vmatprep.subr.bf16.mxu0 %v1349_v20  ;;  %1221 = vmatprep.subr.bf16.mxu1 %v1349_v20  ;;  %v1320_v35 = vld [vmem:[%s1663_s3 + $0x20] sm:$0xff]   ;;  %v1321_v36 = vld [vmem:[%s1663_s3 + $0x28] sm:$0xff]   ;;  %v1322_v37 = vld [vmem:[%s1663_s3 + $0x30] sm:$0xff]   ;;  %p1325_p0 = scmp.ne.s32.totalorder %s1003_s8, %s1324_s9  ;;  %p1330_p2 = scmp.lt.s32.totalorder %s1324_s9, %s1324_s9 }
  0x49   :  { %v1323_v38 = vld [vmem:[%s1663_s3 + $0x38] sm:$0xff]   ;;  %v1010_v40 = vld [vmem:[%s1662_s2] ss:$0 sm:$0xff] }
  0x4a   :  { %v1084_v7 = vld [vmem:[%s1664_s4] ss:$0 sm:$0xff]  ;;  %p1331_p3 = por %p1330_p2, %p1329_p1 }
  0x4b   :  { %1204 = vmatpush3.bf16.msra.mxu0 %v1310_v23  ;;  %1222 = vmatpush3.bf16.msra.mxu1 %v1317_v32 }
  0x4c   :  { %1205 = vmatprep.subr.bf16.mxu0 %v1349_v20  ;;  %1223 = vmatprep.subr.bf16.mxu1 %v1349_v20  ;;  %p1332_p4 = pnand %p1331_p3, %p1325_p0 }
  0x4f   :  { %1206 = vmatpush3.bf16.msra.mxu0 %v1311_v24  ;;  %1224 = vmatpush3.bf16.msra.mxu1 %v1318_v33 }
  0x50   :  { %1207 = vmatprep.subr.bf16.mxu0 %v1349_v20  ;;  %1225 = vmatprep.subr.bf16.mxu1 %v1349_v20 }
  0x53   :  { %1208 = vmatpush3.bf16.msra.mxu0 %v1312_v25  ;;  %1226 = vmatpush3.bf16.msra.mxu1 %v1319_v34 }
  0x54   :  { %1209 = vmatprep.subr.bf16.mxu0 %v1349_v20  ;;  %1227 = vmatprep.subr.bf16.mxu1 %v1349_v20 }
  0x57   :  { %1210 = vmatpush3.bf16.msra.mxu0 %v1313_v26  ;;  %1228 = vmatpush3.bf16.msra.mxu1 %v1320_v35 }
  0x58   :  { %1211 = vmatprep.subr.bf16.mxu0 %v1349_v20  ;;  %1229 = vmatprep.subr.bf16.mxu1 %v1349_v20 }
  0x5b   :  { %1212 = vmatpush3.bf16.msra.mxu0 %v1314_v27  ;;  %1230 = vmatpush3.bf16.msra.mxu1 %v1321_v36 }
  0x5c   :  { %1213 = vmatprep.subr.bf16.mxu0 %v1349_v20  ;;  %1231 = vmatprep.subr.bf16.mxu1 %v1349_v20 }
  0x5f   :  { %1214 = vmatpush3.bf16.msra.mxu0 %v1315_v28  ;;  %1232 = vmatpush3.bf16.msra.mxu1 %v1322_v37 }
  0x60   :  { %1233 = vmatprep.subr.bf16.mxu1 %v1349_v20 }
  0x62   :  { %1216 = vmatmul.mubr.bf16.vlgmr.msra.gmra.mrb[8].mxu0 %v239_v30 }
  0x63   :  { %1234 = vmatpush3.bf16.msra.mxu1 %v1323_v38 }
  0xf5   :  { %v1109_v39 = vpop.f32.mrb[0].mxu0 }
  0xf6   :  { %v1110_v41 = vpop.f32.mrb[1].mxu0 }
  0xf7   :  { %v1111_v42 = vadd.f32 %v1110_v41, %v1109_v39  ;;  %v1112_v43 = vpop.f32.mrb[2].mxu0  ;;  %v1131_v44 = vpop.f32.mrb[0].mxu1 }
  0xf8   :  { %v1113_v45 = vpop.f32.mrb[3].mxu0  ;;  %v1132_v46 = vpop.f32.mrb[1].mxu1 }
  0xf9   :  { %v716_v47 = vadd.f32 %v1111_v42, %v1010_v40  ;;  %v1133_v48 = vadd.f32 %v1132_v46, %v1131_v44  ;;  %v1134_v49 = vpop.f32.mrb[2].mxu1 }
  0xfa   :  { %v1135_v50 = vpop.f32.mrb[3].mxu1 }
  0xfb   :  { %v756_v51 = vadd.f32 %v1133_v48, %v716_v47 }
 0x115   :  { %v1153_v52 = vpop.f32.mrb[4].mxu0 }
 0x116   :  { %v1154_v53 = vpop.f32.mrb[5].mxu0 }
 0x117   :  { %v1155_v54 = vadd.f32 %v1154_v53, %v1153_v52  ;;  %v1156_v55 = vpop.f32.mrb[6].mxu0  ;;  %v1175_v56 = vpop.f32.mrb[4].mxu1 }
 0x118   :  { %v1157_v57 = vpop.f32.mrb[7].mxu0  ;;  %v1176_v58 = vpop.f32.mrb[5].mxu1 }
 0x119   :  { %v796_v59 = vadd.f32 %v1155_v54, %v756_v51  ;;  %v1177_v60 = vadd.f32 %v1176_v58, %v1175_v56  ;;  %v1178_v61 = vpop.f32.mrb[6].mxu1 }
 0x11a   :  { %v1179_v62 = vpop.f32.mrb[7].mxu1 }
 0x11b   :  { %v836_v63 = vadd.f32 %v1177_v60, %v796_v59 }
 0x135   :  { %v875_v0 = vpop.f32.mrb[8].mxu0 }
 0x136   :  { %v876_v1 = vadd.f32 %v875_v0, %v836_v63  ;;  %v1217_v2 = vpop.f32.mrb[9].mxu0 }
 0x137   :  { %v878_v3 = vpop.f32.mrb[10].mxu0 }
 0x138   :  { %v881_v4 = vmax.f32 %v876_v1, 0.0  ;;  %v1218_v5 = vpop.f32.mrb[11].mxu0 }
 0x13a   :  { %v882_v6 = vpack.c.bf16 %v881_v4, %v881_v4 }
 0x13c   :  { %1236 = vmatmul.mubr.bf16.vlgmr.msra.gmra.mrb[8].mxu1 %v882_v6 }
 0x20f   :  { %v988_v8 = vpop.f32.mrb[8].mxu1 }
 0x210   :  { %v989_v9 = vadd.f32 %v1084_v7, %v988_v8  ;;  %v1237_v10 = vpop.f32.mrb[9].mxu1 }
 0x211   :  { %v991_v11 = vpop.f32.mrb[10].mxu1 }
 0x212   :  { %v1238_v12 = vpop.f32.mrb[11].mxu1  ;;  %995 = vst.msk [vmem:[#allocation2] sm:$0x3] %vm994_vm1, %v989_v9 }
 0x213   :  { %1335 = shalt.err (!%p1332_p4)
}
 0x214   :  { %s1336_s4 = scalar_lea.hbm %s1665_s5, 32 }
 0x215   :  { %p1337_p5 = scmp.ne.s32.totalorder %s1665_s5, %s1336_s4  ;;  %p1340_p6 = scmp.lt.u32.totalorder %s1336_s4, %s1665_s5 }
 0x217   :  { %p1342_p7 = pnand %p1340_p6, %p1337_p5 }
 0x219   :  { %1345 = shalt.err (!%p1342_p7)
}
 0x21a   :  { %1005 = dma.vmem_to_hbm [thread:$0]  %s1003_s8, 32, %s1665_s5, [#allocation3]  }
 0x21b   :  { %1346 = dma.done.wait [#allocation3], 32  }
 0x21c   :  { %1347 = vsyncadd [#allocation3], 4294967264 }
 0x21d   :  { %1009 = vsyncpa [#allocation3], 1 }

// kernel: simple_cnn_forward.3
= control target key start
LH: loop header
LB: loop body
LE: loop exit
PB: predicated region body
PF: predicated region fallthrough
CT: control target
= control target key end

     0   :  { %9 = vsyncpa [#allocation4], 0  ;;  %s3829_s15 = smov 0   ;;  %s4915_s0 = inlined_call_operand.vmem [shape: bf16[2,3,1152], index: 0, kind: input, shape index: {}]   ;;  %s4916_s1 = inlined_call_operand.vmem [shape: bf16[16,27], index: 1, kind: input, shape index: {}]   ;;  %s4917_s2 = inlined_call_operand.vmem [shape: f32[16,1], index: 2, kind: input, shape index: {}]   ;;  %s4918_s3 = inlined_call_operand.hbm [shape: bf16[960,256], index: 3, kind: input, shape index: {}]   ;;  %s4919_s4 = inlined_call_operand.vmem [shape: bf16[2,16,256], index: 4, kind: output, shape index: {}]  }
   0x1 LB: > { %s3835_s16 = sadd.s32 4294967295, %s3788_s15   ;;  %p3332_p0 = scmp.ge.s32.totalorder %s3788_s15, 1  ;;  %s3788_s15 = sphi %s3829_s15, %s15_s15  }
   0x2   : > { %p135_p1 = scmp.lt.s32.totalorder %s3788_s15, 3  ;;  %s3790_s17 = smov [#allocation3]  }
   0x3   : > { %s153_s18 = sshll.u32 %s3790_s17, 4  ;;  %p4920_p3 = scmp.eq.s32.totalorder %s3835_s16, 0  ;;  %s154_s18 = int_to_ptr.vmem [resolvable:$true] %s153_s18 }
   0x4   : > { %p3839_p2 = pnand %p3332_p0, %p135_p1  ;;  %s3750_s23 = scalar_lea.hbm %s4918_s3, 15360 }
   0x5   : > { %p3751_p6 = scmp.ne.s32.totalorder %s4918_s3, %s3750_s23  ;;  %p3757_p10 = scmp.lt.u32.totalorder %s3750_s23, %s4918_s3 }
   0x6   : > { %s4949_s19 = scalar_select %p3839_p2, 1, 0 }
   0x7   : > { %p3523_p4 = pneg %p3839_p2 }
   0x9   : > { %p3848_p5 = pnand %p4920_p3, %p3523_p4 }
   0xb   : > { %p3752_p7 = pneg %p3848_p5 }
   0xd   : > { %p3753_p8 = pnand %p3752_p7, %p3751_p6 }
   0xf   : > { %p3754_p9 = pneg %p3753_p8 }
  0x11   : > { %p3759_p11 = pnand %p3757_p10, %p3754_p9 }
  0x13   : > { %3762 = shalt.err (!%p3759_p11)
}
  0x14   : > { %s3763_s28 = scalar_lea.vmem %s154_s18, 15360  ;;  %p3771_p1 = scmp.lt.s32.totalorder %s154_s18, %s154_s18 }
  0x15   : > { %p3764_p12 = scmp.ne.s32.totalorder %s154_s18, %s3763_s28  ;;  %p3772_p4 = scmp.lt.s32.totalorder %s3763_s28, %s3763_s28 }
  0x17   : > { %p3766_p13 = pnand %p3764_p12, %p3752_p7  ;;  %p3773_p3 = por %p3772_p4, %p3771_p1 }
  0x19   : > { %p3767_p0 = pneg %p3766_p13 }
  0x1b   : > { %p3774_p2 = pnand %p3773_p3, %p3767_p0 }
  0x1d   : > { %3777 = shalt.err (!%p3774_p2)
}
  0x1e   : > { %s3791_s29 = smov 128   ;;  %s3792_s30 = smov 8  }
  0x1f   : > { %3526 = dma.hbm_to_vmem [thread:$0]  (!%p3848_p5), %s4918_s3, 15360, %s154_s18, [#allocation4], %s3791_s29, %s3791_s29, %s3792_s30  }
  0x20   : > { %p4951_p6 = scmp.ne.s32.totalorder %s4949_s19, 0 }
  0x21   : > { %p4952_p8 = scmp.eq.s32.totalorder (!%p4951_p6), %s3835_s16, 0 }
  0x22   : > { %177 = sbr.rel (%p4951_p6) target bundleno = 950 (0x3b6), region = 36 }
  0x29   : > { %3783 = dma.done.wait (%p4952_p8), [#allocation4], 15360   ;;  %p4953_p7 = pmov %p4952_p8 }
  0x2a   : > { %p203_p2 = scmp.lt.s32.totalorder %s3835_s16, 1  ;;  %v346_v0 = vlaneseq  ;;  %v3793_v1 = vmov 1983009808   ;;  %s3794_s11 = smov 95   ;;  %vm4924_vm0 = vcmask 1040384   ;;  %vm376_vm1 = vcmask 1041408  }
  0x2b   : > { %3785 = vsyncadd (%p4953_p7), [#allocation4], 4294951936  ;;  %v344_v2 = vunpack.c.l.s4 %v3793_v1  ;;  %s3795_s12 = smov 64   ;;  %s3796_s13 = smov 126   ;;  %vm377_vm2 = vsmask.f32 1280 }
  0x2c   : > { %s5120_s16 = smov (!%p203_p2, %s3835_s16), 1  ;;  %v347_v3 = vshrl.u32 %v346_v0, 7  ;;  %s3797_s14 = smov 127   ;;  %vm4923_vm3 = vcmask 790532   ;;  %vm379_vm4 = vcmask 1045508   ;;  %v4954_v63 = vmov 0  ;;  %vm4000_vm7 = vmand %vm376_vm1, %vm377_vm2 }
  0x2d   : > { %v345_v4 = vunpack.c.0.s8 %v344_v2  ;;  %s3518_s7 = smul.u32 18, %s5120_s16  ;;  %s3798_s17 = smov 96   ;;  %vm380_vm5 = vsmask.f32 5376  ;;  %v383_v60 = vld [vmem:[#allocation2] sm:$0x33]  ;;  %vm3995_vm6 = vmor %vm4923_vm3, %vm4924_vm0 }
  0x2e   : > { %s3799_s18 = smov 94   ;;  %v386_v61 = vld [vmem:[#allocation2 + $0x8] sm:$0x33]  ;;  %v4955_v63 = vsel %vm3995_vm6, 4294967295, %v4954_v63  ;;  %v4956_v0 = vmov 0  ;;  %vm381_vm9 = vmand %vm379_vm4, %vm380_vm5  ;;  %vm392_vm15 = vcmask 791556  }
  0x2f   : > { %v3879_v5 = vsub.s32 %v345_v4, %v347_v3  ;;  %s3884_s10 = scalar_lea.vmem %s4915_s0, %s3518_s7  ;;  %v4957_v0 = vsel %vm4000_vm7, 4294967295, %v4956_v0  ;;  %vm735_vm8 = vsmask.f32 7938  ;;  %vm737_vm10 = vsmask.f32 7954  ;;  %vm4014_vm11 = vmor %vm381_vm9, %vm4000_vm7  ;;  %s3800_s19 = smov 63  }
  0x30   : > { %v754_v6 = vld [vmem:[%s3884_s10] sm:$0xff]  ;;  %v755_v7 = vld [vmem:[%s3884_s10 + $0x8] sm:$0xff]  ;;  %v3567_v30 = vld [vmem:[%s3884_s10 + $0x10] ss:$0 sps:$4 sm:$0x33]   ;;  %v4958_v4 = vmov 0 }
  0x31   : > { %v3889_v8 = vrot.slane %v754_v6, %v3879_v5  ;;  %v760_v9 = vcombine.low %v754_v6, %v754_v6  ;;  %v775_v10 = vcombine.low %v755_v7, %v755_v7  ;;  %v3892_v11 = vrot.slane %v755_v7, %v3879_v5  ;;  %v3987_v59 = vld.sshfl [vmem:[%s3884_s10 + $0x10] sm:$0x3 pattern:$0x76325410]  ;;  %vm4030_vm12 = vmand %vm376_vm1, %vm735_vm8  ;;  %s3801_s20 = smov 62   ;;  %s3503_s27 = sshll.u32 %s5120_s16, 4 }
  0x32   : > { %v1026_v14 = vcombine.high %v754_v6, %v754_v6  ;;  %v530_v17 = vcombine.high %v755_v7, %v755_v7  ;;  %v797_v38 = vrot.slane %v3567_v30, %v3879_v5  ;;  %v1067_v3 = vrot.slane %v3987_v59, 7  ;;  %vm738_vm13 = vmand %vm379_vm4, %vm737_vm10  ;;  %s212_s30 = scalar_lea.vmem %s4919_s4, %s3503_s27 }
  0x33   : > { %800 = vrot.lane.b32.xlu0 %v3889_v8, %s3794_s11  ;;  %v767_v12 = vrot.slane %v760_v9, %v3879_v5  ;;  %v1063_v13 = vrot.slane %v3889_v8, 7  ;;  %v782_v15 = vrot.slane %v775_v10, %v3879_v5  ;;  %v547_v16 = vrot.slane %v3892_v11, 5  ;;  %vm4042_vm14 = vmor %vm738_vm13, %vm4030_vm12 }
  0x34   : > { %v1065_v18 = vrot.slane %v3892_v11, 7  ;;  %v545_v19 = vrot.slane %v3889_v8, 5  ;;  %v3905_v20 = vrot.slane %v1026_v14, %v3879_v5  ;;  %v3911_v22 = vrot.slane %v530_v17, %v3879_v5  ;;  %v339_v14 = vld [vmem:[%s3884_s10 + $0x8] sm:$0xff]  ;;  %vm4053_vm1 = vmand %vm392_vm15, %vm380_vm5 }
  0x35   : > { %798 = vrot.lane.b32.xlu1 %v767_v12, %s3794_s11  ;;  %v551_v21 = vrot.slane %v547_v16, 4  ;;  %v3924_v28 = vshrl.u32 %v3889_v8, 16  ;;  %v3927_v29 = vshll.u32 %v3889_v8, 16  ;;  %v3943_v36 = vshrl.u32 %v3892_v11, 16  ;;  %vm4922_vm2 = vmor %vm4053_vm1, %vm4000_vm7 }
  0x36   : > { %v549_v23 = vrot.slane %v545_v19, 4  ;;  %v546_v24 = vrot.slane %v3905_v20, 5  ;;  %v1064_v25 = vrot.slane %v3905_v20, 7  ;;  %v548_v26 = vrot.slane %v3911_v22, 5  ;;  %vm4090_vm4 = vmand %vm392_vm15, %vm737_vm10 }
  0x37   : > { %1068 = vrot.lane.b32.xlu0 %v1063_v13, %s3795_s12  ;;  %v3934_v32 = vshrl.u32 %v3905_v20, 16  ;;  %v3937_v33 = vshll.u32 %v3905_v20, 16  ;;  %v435_v34 = vrot.slane %v3924_v28, 6  ;;  %v438_v35 = vrot.slane %v3927_v29, 7 }
  0x38   : > { %v550_v27 = vrot.slane %v546_v24, 4  ;;  %v552_v31 = vrot.slane %v548_v26, 4  ;;  %v3946_v37 = vshll.u32 %v3892_v11, 16  ;;  %v451_v42 = vrot.slane %v3943_v36, 6 }
  0x39   : > { %802 = vrot.lane.b32.xlu1 %v782_v15, %s3794_s11  ;;  %v443_v39 = vrot.slane %v3934_v32, 6  ;;  %v446_v40 = vrot.slane %v3937_v33, 7  ;;  %v439_v41 = vor.u32 %v438_v35, %v435_v34  ;;  %v675_v45 = vrot.slane %v3924_v28, 7 }
  0x3a   : > { %v454_v43 = vrot.slane %v3946_v37, 7  ;;  %v682_v47 = vrot.slane %v3934_v32, 7  ;;  %v689_v49 = vrot.slane %v3943_v36, 7  ;;  %v3964_v50 = vshll.u32 %v3911_v22, 16 }
  0x3b   : > { %1072 = vrot.lane.b32.xlu0 %v1065_v18, %s3795_s12  ;;  %v447_v44 = vor.u32 %v446_v40, %v443_v39  ;;  %v678_v48 = vor.u32 %v675_v45, %v3927_v29  ;;  %v894_v52 = vrot.slane %v3927_v29, 5  ;;  %v898_v53 = vrot.slane %v3937_v33, 5 }
  0x3c   : > { %v455_v46 = vor.u32 %v454_v43, %v451_v42  ;;  %v685_v51 = vor.u32 %v682_v47, %v3937_v33  ;;  %v692_v54 = vor.u32 %v689_v49, %v3946_v37  ;;  %v902_v55 = vrot.slane %v3946_v37, 5 }
  0x3d   : > { %565 = vrot.lane.b32.xlu1 %v551_v21, %s3796_s13  ;;  %v906_v56 = vrot.slane %v3964_v50, 5  ;;  %v3551_v57 = vpack.i.bf16 %v898_v53, %v894_v52  ;;  %v1066_v62 = vrot.slane %v3911_v22, 7  ;;  %v1161_v1 = vrot.slane %v3924_v28, 5 }
  0x3e   : > { %v1164_v2 = vrot.slane %v3927_v29, 6  ;;  %v4959_v4 = vsel %vm4014_vm11, 4294967295, %v4958_v4  ;;  %v1169_v6 = vrot.slane %v3934_v32, 5  ;;  %v1172_v7 = vrot.slane %v3937_v33, 6 }
  0x3f   : > { %561 = vrot.lane.b32.xlu0 %v549_v23, %s3796_s13  ;;  %v3556_v58 = vpack.i.bf16 %v906_v56, %v902_v55  ;;  %v384_v9 = vsel %vm4014_vm11, %v3889_v8, %v383_v60  ;;  %v387_v10 = vsel %vm4014_vm11, %v3905_v20, %v386_v61  ;;  %v4960_v12 = vmov 0 }
  0x40   : > { %v4961_v12 = vsel %vm4030_vm12, 4294967295, %v4960_v12  ;;  %v1177_v13 = vrot.slane %v3943_v36, 5  ;;  %385 = vst [vmem:[#allocation2] sm:$0x33] %v384_v9  ;;  %388 = vst [vmem:[#allocation2 + $0x8] sm:$0x33] %v387_v10  ;;  %v1165_v15 = vor.u32 %v1164_v2, %v1161_v1  ;;  %v357_v18 = vcombine.high %v339_v14, %v339_v14 }
  0x41   : > { %1070 = vrot.lane.b32.xlu1 %v1064_v25, %s3795_s12  ;;  %v364_v23 = vrot.slane %v339_v14, %v3879_v5  ;;  %v4964_v30 = vmov 0  ;;  %v918_v34 = vrot.slane %v3934_v32, 4  ;;  %v457_v39 = vshrl.u32 %v3911_v22, 16 }
  0x42   : > { %v371_v21 = vrot.slane %v357_v18, %v3879_v5  ;;  %v4965_v30 = vsel %vm4053_vm1, 4294967295, %v4964_v30  ;;  %v462_v42 = vrot.slane %v3964_v50, 7  ;;  %v1188_v49 = vrot.slane %v3964_v50, 6 }
  0x43   : > { %563 = vrot.lane.b32.xlu0 %v550_v27, %s3796_s13  ;;  %v913_v27 = vrot.slane %v3924_v28, 4  ;;  %v919_v32 = vor.u32 %v918_v34, %v898_v53  ;;  %v696_v43 = vrot.slane %v457_v39, 7  ;;  %v3802_v53 = vmov 0  }
  0x44   : > { %1485 = vmatprep.mubr.bf16.mxu0 %v3802_v53  ;;  %1614 = vmatprep.mubr.bf16.mxu1 %v3802_v53  ;;  %vm4926_vm8 = vcmask 1043458   ;;  %vm827_vm9 = vsmask.f32 3328  ;;  %vm4925_vm10 = vcmask 1047558   ;;  %vm4927_vm13 = vsmask.f32 7424 }
  0x45   : > { %567 = vrot.lane.b32.xlu1 %v552_v31, %s3796_s13  ;;  %v389_v31 = vld [vmem:[#allocation2 + $0x10] sm:$0x33]  ;;  %v914_v35 = vor.u32 %v913_v27, %v894_v52  ;;  %v920_v29 = vrot.slane %v919_v32, 4  ;;  %v699_v45 = vor.u32 %v3964_v50, %v696_v43  ;;  %3562 = vset.pattern.permute.xlu0 %v3802_v53  ;;  %vm4125_vm15 = vmand %vm4926_vm8, %vm827_vm9  ;;  %vm4928_vm5 = vcmask 1043456   ;;  %v1101_v32 = vld [vmem:[#allocation2 + $0x40] sm:$0x66] }
  0x46   : > { %v390_v5 = vsel %vm4014_vm11, %v364_v23, %v389_v31  ;;  %3561 = vset.pattern.permute.xlu1 %v3802_v53  ;;  %vm4930_vm3 = vcmask 777216   ;;  %vm1096_vm9 = vsmask.f32 2304  ;;  %vm4937_vm8 = vsmask.f32 6400 }
  0x47   : > { %804 = vrot.lane.b32.xlu0 %v3892_v11, %s3794_s11  ;;  %391 = vst [vmem:[#allocation2 + $0x10] sm:$0x33] %v390_v5  ;;  %v915_v40 = vrot.slane %v914_v35, 4  ;;  %vm611_vm7 = vsmask.f32 4352  ;;  %vm4939_vm1 = vcmask 793606  }
  0x48   : > { %vm4974_vm12 = vcmask 1040384   ;;  %vm4940_vm11 = vcmask 523264  }
  0x49   : > { %806 = vrot.lane.b32.xlu1 %v797_v38, %s3794_s11  ;;  %v923_v38 = vrot.slane %v3943_v36, 4  ;;  %v459_v36 = vrot.slane %v457_v39, 6 }
  0x4b   : > { %464 = vrot.lane.b32.xlu0 %v439_v41, %s3797_s14  ;;  %v924_v41 = vor.u32 %v923_v38, %v902_v55  ;;  %v928_v55 = vrot.slane %v457_v39, 4 }
  0x4d   : > { %466 = vrot.lane.b32.xlu1 %v447_v44, %s3797_s14  ;;  %v925_v33 = vrot.slane %v924_v41, 4  ;;  %v704_v44 = vshll.u32 %v3987_v59, 16  ;;  %v929_v60 = vor.u32 %v928_v55, %v906_v56  ;;  %v626_v55 = vld [vmem:[#allocation2 + $0x38] sm:$0x11] }
  0x4f   : > { %468 = vrot.lane.b32.xlu0 %v455_v46, %s3797_s14  ;;  %v910_v47 = vrot.slane %v704_v44, 5  ;;  %v1196_v52 = vrot.slane %v704_v44, 6 }
  0x51   : > { %707 = vrot.lane.b32.xlu1 %v678_v48, %s3798_s17  ;;  %v1185_v48 = vrot.slane %v457_v39, 5  ;;  %v1104_v39 = vld [vmem:[#allocation2 + $0x48] sm:$0x66] }
  0x53   : > { %709 = vrot.lane.b32.xlu0 %v685_v51, %s3798_s17 }
  0x55   : > { %711 = vrot.lane.b32.xlu1 %v692_v54, %s3798_s17  ;;  %v1189_v54 = vor.u32 %v1188_v49, %v1185_v48 }
  0x57   : > { %3552 = vrot.lane.b32.xlu0 %v3551_v57, %s3799_s18 }
  0x59   : > { %3557 = vrot.lane.b32.xlu1 %v3556_v58, %s3799_s18 }
  0x5b   : > { %553 = vrot.lane.b32.xlu0 %v545_v19, %s3796_s13  ;;  %v1173_v19 = vor.u32 %v1172_v7, %v1169_v6 }
  0x5d   : > { %555 = vrot.lane.b32.xlu1 %v546_v24, %s3796_s13  ;;  %v395_v24 = vld [vmem:[#allocation2 + $0x18] sm:$0x33] }
  0x5e   : > { %v396_v28 = vsel %vm4922_vm2, %v371_v21, %v395_v24  ;;  %vm831_vm2 = vmand %vm4925_vm10, %vm4927_vm13  ;;  %vm4938_vm10 = vcmask 1046533   ;;  %vm608_vm13 = vsmask.f32 256 }
  0x5f   : > { %557 = vrot.lane.b32.xlu0 %v547_v16, %s3796_s13  ;;  %v1180_v16 = vrot.slane %v3946_v37, 6  ;;  %397 = vst [vmem:[#allocation2 + $0x18] sm:$0x33] %v396_v28  ;;  %vm4133_vm0 = vmor %vm831_vm2, %vm4125_vm15  ;;  %vm4936_vm2 = vcmask 1042433  }
  0x60   : > { %vm4155_vm6 = vmand %vm4936_vm2, %vm1096_vm9 }
  0x61   : > { %1074 = vrot.lane.b32.xlu1 %v1066_v62, %s3795_s12  ;;  %v1181_v25 = vor.u32 %v1180_v16, %v1177_v13  ;;  %v930_v62 = vrot.slane %v929_v60, 4 }
  0x63   : > { %1076 = vrot.lane.b32.xlu0 %v1067_v3, %s3795_s12  ;;  %v833_v3 = vld [vmem:[#allocation2 + $0x20] sm:$0xcc] }
  0x65   : > { %1198 = vrot.lane.b32.xlu1 %v1165_v15, %s3800_s19  ;;  %v836_v15 = vld [vmem:[#allocation2 + $0x28] sm:$0xcc] }
  0x67   : > { %1200 = vrot.lane.b32.xlu0 %v1173_v19, %s3800_s19 }
  0x69   : > { %1202 = vrot.lane.b32.xlu1 %v1181_v25, %s3800_s19 }
  0x6b   : > { %1288 = vrot.lane.b32.xlu0 %v3889_v8, %s3801_s20  ;;  %v701_v8 = vshrl.u32 %v3987_v59, 16 }
  0x6d   : > { %1290 = vrot.lane.b32.xlu1 %v3905_v20, %s3801_s20  ;;  %v4966_v20 = vmov 0  ;;  %v703_v37 = vrot.slane %v701_v8, 7  ;;  %v1193_v51 = vrot.slane %v701_v8, 5  ;;  %v933_v58 = vrot.slane %v701_v8, 4 }
  0x6e   : > { %v4967_v20 = vsel %vm4090_vm4, 4294967295, %v4966_v20  ;;  %vm4162_vm4 = vmand %vm4974_vm12, %vm608_vm13  ;;  %vm4941_vm12 = vcmask 1031168   ;;  %vm4979_vm13 = vcmask 1043456  }
  0x6f   : > { %1292 = vrot.lane.b32.xlu0 %v3892_v11, %s3801_s20  ;;  %v463_v11 = vor.u32 %v462_v42, %v459_v36  ;;  %v706_v46 = vor.u32 %v704_v44, %v703_v37  ;;  %v1197_v57 = vor.u32 %v1196_v52, %v1193_v51  ;;  %v934_v61 = vor.u32 %v933_v58, %v910_v47  ;;  %v614_v37 = vld [vmem:[#allocation2 + $0x20] sm:$0x11]  ;;  %v617_v44 = vld [vmem:[#allocation2 + $0x28] sm:$0x11] }
  0x71   : > { %946 = vrot.lane.b32.xlu1 %v915_v40, %s3799_s18  ;;  %v935_v1 = vrot.slane %v934_v61, 4 }
  0x73   : > { %948 = vrot.lane.b32.xlu0 %v920_v29, %s3799_s18 }
  0x75   : > { %950 = vrot.lane.b32.xlu1 %v925_v33, %s3799_s18 }
  0x77   : > { %470 = vrot.lane.b32.xlu0 %v463_v11, %s3797_s14 }
  0x79   : > { %713 = vrot.lane.b32.xlu1 %v699_v45, %s3798_s17 }
  0x7b   : > { %715 = vrot.lane.b32.xlu0 %v706_v46, %s3798_s17 }
  0x7d   : > { %944 = vrot.lane.b32.xlu1 %v910_v47, %s3799_s18 }
  0x7f   : > { %559 = vrot.lane.b32.xlu0 %v548_v26, %s3796_s13 }
  0x81   : > { %1204 = vrot.lane.b32.xlu1 %v1189_v54, %s3800_s19 }
  0x83   : > { %1206 = vrot.lane.b32.xlu0 %v1197_v57, %s3800_s19 }
  0x85   : > { %1294 = vrot.lane.b32.xlu1 %v3911_v22, %s3801_s20 }
  0x87   : > { %1296 = vrot.lane.b32.xlu0 %v3987_v59, %s3801_s20 }
  0x89   : > { %952 = vrot.lane.b32.xlu1 %v930_v62, %s3799_s18  ;;  %v620_v62 = vld [vmem:[#allocation2 + $0x30] sm:$0x11] }
  0x8b   : > { %954 = vrot.lane.b32.xlu0 %v935_v1, %s3799_s18 }
  0xa5   : > { %v801_v26 = vpop.permute.xlu0 %800 }
  0xa6   : > { %v809_v56 = vrot.slane %v801_v26, 4 }
  0xa7   : > { %v799_v22 = vpop.permute.xlu1 %798 }
  0xa8   : > { %v808_v59 = vrot.slane %v799_v22, 4 }
  0xa9   : > { %v1069_v6 = vpop.permute.xlu0 %1068 }
  0xaa   : > { %v813_v7 = vsel %vm4928_vm5, %v808_v59, %v809_v56  ;;  %v1078_v5 = vrot.slane %v1069_v6, 4 }
  0xab   : > { %v815_v9 = vsel %vm4930_vm3, %v799_v22, %v813_v7  ;;  %v4139_v10 = vpop.permute.xlu1 %802 }
  0xac   : > { %v834_v13 = vsel %vm4133_vm0, %v815_v9, %v833_v3  ;;  %v810_v14 = vrot.slane %v4139_v10, 4 }
  0xad   : > { %835 = vst [vmem:[#allocation2 + $0x20] sm:$0xcc] %v834_v13  ;;  %v4144_v16 = vpop.permute.xlu0 %1072 }
  0xae   : > { %v816_v18 = vsel %vm4928_vm5, %v809_v56, %v810_v14  ;;  %vm610_vm5 = vcmask 1044484   ;;  %v1080_v34 = vrot.slane %v4144_v16, 4  ;;  %v839_v56 = vld [vmem:[#allocation2 + $0x30] sm:$0xcc] }
  0xaf   : > { %v817_v19 = vsel %vm4930_vm3, %v801_v26, %v816_v18  ;;  %v4150_v21 = vpop.permute.xlu1 %565  ;;  %vm1099_vm3 = vmand %vm4938_vm10, %vm4937_vm8 }
  0xb0   : > { %v837_v23 = vsel %vm4133_vm0, %v817_v19, %v836_v15  ;;  %vm612_vm9 = vmand %vm610_vm5, %vm611_vm7  ;;  %v575_v35 = vrot.slane %v4150_v21, 4  ;;  %vm4981_vm5 = vcmask 790532   ;;  %v845_v19 = vld [vmem:[#allocation2 + $0x38] sm:$0xcc] }
  0xb1   : > { %838 = vst [vmem:[#allocation2 + $0x28] sm:$0xcc] %v837_v23  ;;  %v562_v24 = vpop.permute.xlu0 %561  ;;  %vm4171_vm2 = vmor %vm1099_vm3, %vm4155_vm6 }
  0xb2   : > { %v573_v41 = vrot.slane %v562_v24, 4  ;;  %vm4980_vm8 = vmmov %vm4979_vm13 }
  0xb3   : > { %v1071_v27 = vpop.permute.xlu1 %1070  ;;  %vm4181_vm10 = vmand %vm4981_vm5, %vm611_vm7  ;;  %vm4989_vm7 = vcmask 1043456  }
  0xb4   : > { %v1079_v28 = vrot.slane %v1071_v27, 4  ;;  %vm4189_vm3 = vmor %vm612_vm9, %vm4162_vm4 }
  0xb5   : > { %v564_v40 = vpop.permute.xlu0 %563  ;;  %vm4990_vm9 = vmmov %vm4989_vm7 }
  0xb6   : > { %v1083_v29 = vsel %vm4979_vm13, %v1078_v5, %v1079_v28  ;;  %v1086_v36 = vsel %vm4980_vm8, %v1079_v28, %v1080_v34  ;;  %v574_v42 = vrot.slane %v564_v40, 4  ;;  %vm4986_vm8 = vsmask.f32 7424  ;;  %vm625_vm5 = vmor %vm4181_vm10, %vm4162_vm4  ;;  %v496_v28 = vld [vmem:[#allocation2] sm:$0x66] }
  0xb7   : > { %v1085_v33 = vsel %vm4940_vm11, %v1069_v6, %v1083_v29  ;;  %v1087_v43 = vsel %vm4940_vm11, %v1071_v27, %v1086_v36  ;;  %v568_v45 = vpop.permute.xlu1 %567  ;;  %vm4195_vm13 = vmand %vm4939_vm1, %vm4986_vm8  ;;  %vm490_vm8 = vsmask.f32 7942  ;;  %vm4993_vm11 = vcmask 1042433  }
  0xb8   : > { %v1102_v47 = vsel %vm4171_vm2, %v1085_v33, %v1101_v32  ;;  %v1105_v48 = vsel %vm4171_vm2, %v1087_v43, %v1104_v39  ;;  %v585_v49 = vsel %vm4989_vm7, %v573_v41, %v574_v42  ;;  %v587_v51 = vsel %vm4990_vm9, %v574_v42, %v575_v35  ;;  %vm4991_vm9 = vmmov %vm4989_vm7 }
  0xb9   : > { %1103 = vst [vmem:[#allocation2 + $0x40] sm:$0x66] %v1102_v47  ;;  %1106 = vst [vmem:[#allocation2 + $0x48] sm:$0x66] %v1105_v48  ;;  %v586_v52 = vsel %vm4941_vm12, %v562_v24, %v585_v49  ;;  %v588_v54 = vsel %vm4941_vm12, %v564_v40, %v587_v51  ;;  %v576_v57 = vrot.slane %v568_v45, 4  ;;  %v805_v58 = vpop.permute.xlu0 %804  ;;  %vm4998_vm10 = vcmask 1046533  }
  0xba   : > { %v615_v60 = vsel %vm4189_vm3, %v586_v52, %v614_v37  ;;  %v618_v61 = vsel %vm4189_vm3, %v588_v54, %v617_v44  ;;  %v811_v1 = vrot.slane %v805_v58, 4  ;;  %vm844_vm1 = vmor %vm4195_vm13, %vm4125_vm15  ;;  %vm4997_vm4 = vsmask.f32 7958  ;;  %v499_v40 = vld [vmem:[#allocation2 + $0x8] sm:$0x66] }
  0xbb   : > { %616 = vst [vmem:[#allocation2 + $0x20] sm:$0x11] %v615_v60  ;;  %619 = vst [vmem:[#allocation2 + $0x28] sm:$0x11] %v618_v61  ;;  %v589_v26 = vsel %vm4991_vm9, %v575_v35, %v576_v57  ;;  %v591_v22 = vsel %vm4941_vm12, %v568_v45, %v576_v57  ;;  %v807_v59 = vpop.permute.xlu1 %806  ;;  %vm4943_vm15 = vcmask 785408   ;;  %vm4942_vm13 = vcmask 1043459  }
  0xbc   : > { %v590_v3 = vsel %vm4941_vm12, %v4150_v21, %v589_v26  ;;  %v627_v6 = vsel %vm625_vm5, %v591_v22, %v626_v55  ;;  %vm4992_vm9 = vmmov %vm4989_vm7  ;;  %v812_v9 = vrot.slane %v807_v59, 4  ;;  %vm4996_vm12 = vcmask 777216  }
  0xbd   : > { %v818_v7 = vsel %vm4992_vm9, %v810_v14, %v811_v1  ;;  %vm4233_vm7 = vmand %vm4993_vm11, %vm490_vm8  ;;  %v621_v15 = vsel %vm4189_vm3, %v590_v3, %v620_v62  ;;  %628 = vst [vmem:[#allocation2 + $0x38] sm:$0x11] %v627_v6  ;;  %v465_v21 = vpop.permute.xlu0 %464 }
  0xbe   : > { %v819_v18 = vsel %vm4996_vm12, %v4139_v10, %v818_v7  ;;  %vm494_vm5 = vmand %vm4998_vm10, %vm4997_vm4  ;;  %622 = vst [vmem:[#allocation2 + $0x30] sm:$0x11] %v621_v15  ;;  %v472_v31 = vrot.slane %v465_v21, 4  ;;  %vm994_vm4 = vcmask 1047559   ;;  %vm4944_vm10 = vsmask.f32 7966 }
  0xbf   : > { %v840_v14 = vsel %vm4133_vm0, %v819_v18, %v839_v56  ;;  %vm4999_vm11 = vmmov %vm4992_vm9  ;;  %v467_v27 = vpop.permute.xlu1 %466  ;;  %v998_v7 = vld [vmem:[#allocation2 + $0x20] sm:$0x88] }
  0xc0   : > { %v820_v23 = vsel %vm4999_vm11, %v811_v1, %v812_v9  ;;  %841 = vst [vmem:[#allocation2 + $0x30] sm:$0xcc] %v840_v14  ;;  %vm5000_vm8 = vmmov %vm4996_vm12  ;;  %vm4945_vm12 = vcmask 1039360   ;;  %v473_v5 = vrot.slane %v467_v27, 4 }
  0xc1   : > { %v821_v24 = vsel %vm5000_vm8, %v805_v58, %v820_v23  ;;  %vm4254_vm3 = vmor %vm494_vm5, %vm4233_vm7  ;;  %v4258_v35 = vpop.permute.xlu0 %468 }
  0xc2   : > { %v846_v10 = vsel %vm844_vm1, %v821_v24, %v845_v19  ;;  %vm5003_vm0 = vmmov %vm4992_vm9  ;;  %v474_v39 = vrot.slane %v4258_v35, 4  ;;  %vm992_vm9 = vsmask.f32 7950  ;;  %v740_v46 = vld [vmem:[#allocation2 + $0x20] sm:$0x33] }
  0xc3   : > { %847 = vst [vmem:[#allocation2 + $0x38] sm:$0xcc] %v846_v10  ;;  %v477_v32 = vsel %vm5003_vm0, %v472_v31, %v473_v5  ;;  %v708_v41 = vpop.permute.xlu1 %707  ;;  %vm5004_vm1 = vmmov %vm5003_vm0  ;;  %v743_v57 = vld [vmem:[#allocation2 + $0x28] sm:$0x33]  ;;  %v1001_v10 = vld [vmem:[#allocation2 + $0x28] sm:$0x88] }
  0xc4   : > { %v479_v50 = vsel %vm4945_vm12, %v465_v21, %v477_v32  ;;  %v480_v36 = vsel %vm5004_vm1, %v473_v5, %v474_v39  ;;  %v717_v42 = vrot.slane %v708_v41, 4  ;;  %vm5005_vm5 = vmmov %vm5003_vm0  ;;  %vm4946_vm1 = vcmask 769024  }
  0xc5   : > { %v497_v29 = vsel %vm4254_vm3, %v479_v50, %v496_v28  ;;  %v481_v8 = vsel %vm4945_vm12, %v467_v27, %v480_v36  ;;  %v710_v33 = vpop.permute.xlu0 %709  ;;  %vm4277_vm11 = vmand %vm4942_vm13, %vm992_vm9  ;;  %vm1226_vm13 = vsmask.f32 7946 }
  0xc6   : > { %498 = vst [vmem:[#allocation2] sm:$0x66] %v497_v29  ;;  %v500_v43 = vsel %vm4254_vm3, %v481_v8, %v499_v40  ;;  %v718_v11 = vrot.slane %v710_v33, 4  ;;  %vm5008_vm8 = vmmov %vm5003_vm0 }
  0xc7   : > { %501 = vst [vmem:[#allocation2 + $0x8] sm:$0x66] %v500_v43  ;;  %v4271_v37 = vpop.permute.xlu1 %711  ;;  %vm996_vm0 = vmand %vm994_vm4, %vm4944_vm10  ;;  %v1004_v31 = vld [vmem:[#allocation2 + $0x30] sm:$0x88]  ;;  %vm1228_vm10 = vsmask.f32 7962 }
  0xc8   : > { %v722_v44 = vsel %vm5005_vm5, %v717_v42, %v718_v11  ;;  %v719_v45 = vrot.slane %v4271_v37, 4  ;;  %vm4295_vm9 = vmor %vm996_vm0, %vm4277_vm11 }
  0xc9   : > { %v724_v47 = vsel %vm4943_vm15, %v708_v41, %v722_v44  ;;  %v3553_v49 = vpop.permute.xlu0 %3552  ;;  %vm5011_vm4 = vmmov %vm5005_vm5  ;;  %vm505_vm5 = vcmask 792581  }
  0xca   : > { %v741_v51 = vsel %vm4042_vm14, %v724_v47, %v740_v46  ;;  %v725_v52 = vsel %vm5008_vm8, %v718_v11, %v719_v45  ;;  %v3555_v54 = vunpack.i.h.bf16 %v3553_v49  ;;  %v3554_v55 = vunpack.i.l.bf16 %v3553_v49  ;;  %vm5012_vm8 = vmmov %vm5011_vm4  ;;  %v1107_v11 = vld [vmem:[#allocation2 + $0x50] sm:$0x66] }
  0xcb   : > { %742 = vst [vmem:[#allocation2 + $0x20] sm:$0x33] %v741_v51  ;;  %v726_v58 = vsel %vm4943_vm15, %v710_v33, %v725_v52  ;;  %v4288_v60 = vpop.permute.xlu1 %3557  ;;  %vm5013_vm0 = vmmov %vm5011_vm4  ;;  %v1112_v52 = vld [vmem:[#allocation2 + $0x58] sm:$0x66] }
  0xcc   : > { %v744_v61 = vsel %vm4042_vm14, %v726_v58, %v743_v57  ;;  %v957_v62 = vrot.slane %v3555_v54, 4  ;;  %v956_v1 = vrot.slane %v3554_v55, 4  ;;  %v3560_v26 = vunpack.i.h.bf16 %v4288_v60 }
  0xcd   : > { %745 = vst [vmem:[#allocation2 + $0x28] sm:$0x33] %v744_v61  ;;  %v3559_v56 = vunpack.i.l.bf16 %v4288_v60  ;;  %v554_v59 = vpop.permute.xlu0 %553 }
  0xce   : > { %v966_v3 = vsel %vm5011_vm4, %v956_v1, %v957_v62  ;;  %v4303_v6 = vrot.slane %v3560_v26, 4  ;;  %v569_v21 = vrot.slane %v554_v59, 4  ;;  %vm5014_vm4 = vmmov %vm5013_vm0 }
  0xcf   : > { %v968_v9 = vsel %vm4946_vm1, %v3554_v55, %v966_v3  ;;  %v958_v15 = vrot.slane %v3559_v56, 4  ;;  %v556_v18 = vpop.permute.xlu1 %555 }
  0xd0   : > { %v999_v19 = vsel %vm4295_vm9, %v968_v9, %v998_v7  ;;  %v570_v14 = vrot.slane %v556_v18, 4  ;;  %v1231_v9 = vld [vmem:[#allocation2 + $0x40] sm:$0xcc] }
  0xd1   : > { %1000 = vst [vmem:[#allocation2 + $0x20] sm:$0x88] %v999_v19  ;;  %v969_v23 = vsel %vm5012_vm8, %v957_v62, %v958_v15  ;;  %v971_v24 = vsel %vm5013_vm0, %v958_v15, %v4303_v6  ;;  %v4311_v27 = vpop.permute.xlu0 %557  ;;  %vm5015_vm8 = vcmask 1031168   ;;  %vm5016_vm0 = vsmask.f32 6400 }
  0xd2   : > { %v970_v5 = vsel %vm4946_vm1, %v3555_v54, %v969_v23  ;;  %v972_v28 = vsel %vm4946_vm1, %v3559_v56, %v971_v24  ;;  %v577_v32 = vsel %vm5014_vm4, %v569_v21, %v570_v14  ;;  %v571_v50 = vrot.slane %v4311_v27, 4  ;;  %vm4324_vm15 = vmand %vm505_vm5, %vm5016_vm0 }
  0xd3   : > { %v1002_v40 = vsel %vm4295_vm9, %v970_v5, %v1001_v10  ;;  %v1005_v41 = vsel %vm4295_vm9, %v972_v28, %v1004_v31  ;;  %v579_v29 = vsel %vm5015_vm8, %v554_v59, %v577_v32  ;;  %v1075_v36 = vpop.permute.xlu1 %1074  ;;  %vm5019_vm12 = vmmov %vm5015_vm8  ;;  %vm5020_vm9 = vcmask 1043458   ;;  %v1316_v28 = vld [vmem:[#allocation2 + $0x60] sm:$0x33] }
  0xd4   : > { %1003 = vst [vmem:[#allocation2 + $0x28] sm:$0x88] %v1002_v40  ;;  %1006 = vst [vmem:[#allocation2 + $0x30] sm:$0x88] %v1005_v41  ;;  %v580_v8 = vsel %vm5014_vm4, %v570_v14, %v571_v50  ;;  %v1081_v33 = vrot.slane %v1075_v36, 4 }
  0xd5   : > { %600 = vst [vmem:[#allocation2] sm:$0x88] %v579_v29  ;;  %v581_v43 = vsel %vm5019_vm12, %v556_v18, %v580_v8  ;;  %v1077_v44 = vpop.permute.xlu0 %1076  ;;  %vm4334_vm8 = vmand %vm5020_vm9, %vm1226_vm13  ;;  %vm5024_vm12 = vcmask 523264   ;;  %vm5025_vm13 = vcmask 1047558   ;;  %v1234_v14 = vld [vmem:[#allocation2 + $0x48] sm:$0xcc] }
  0xd6   : > { %601 = vst [vmem:[#allocation2 + $0x8] sm:$0x88] %v581_v43  ;;  %vm5023_vm0 = vmmov %vm5014_vm4  ;;  %v1082_v49 = vrot.slane %v1077_v44, 4 }
  0xd7   : > { %v1088_v47 = vsel %vm5023_vm0, %v1080_v34, %v1081_v33  ;;  %vm1111_vm4 = vmor %vm4324_vm15, %vm4155_vm6  ;;  %v1199_v54 = vpop.permute.xlu1 %1198  ;;  %vm4948_vm6 = vcmask 515072  }
  0xd8   : > { %v1089_v51 = vsel %vm5024_vm12, %v4144_v16, %v1088_v47  ;;  %vm1229_vm9 = vmand %vm5025_vm13, %vm1228_vm10  ;;  %v1208_v34 = vrot.slane %v1199_v54, 4  ;;  %v1332_v22 = vld [vmem:[#allocation2 + $0x20] sm:$0xff]  ;;  %vm5032_vm13 = vnez %v4959_v4 }
  0xd9   : > { %v1108_v55 = vsel %vm4171_vm2, %v1089_v51, %v1107_v11  ;;  %vm5026_vm1 = vmmov %vm5023_vm0  ;;  %v1201_v58 = vpop.permute.xlu0 %1200 }
  0xda   : > { %v1090_v57 = vsel %vm5026_vm1, %v1081_v33, %v1082_v49  ;;  %1109 = vst [vmem:[#allocation2 + $0x50] sm:$0x66] %v1108_v55  ;;  %vm5027_vm0 = vmmov %vm5024_vm12  ;;  %v1209_v62 = vrot.slane %v1201_v58, 4 }
  0xdb   : > { %v1091_v25 = vsel %vm5027_vm0, %v1075_v36, %v1090_v57  ;;  %vm4355_vm15 = vmor %vm1229_vm9, %vm4334_vm8  ;;  %v4359_v1 = vpop.permute.xlu1 %1202  ;;  %v1319_v36 = vld [vmem:[#allocation2 + $0x68] sm:$0x33]  ;;  %vm5034_vm0 = vsmask.f32 7958 }
  0xdc   : > { %v1113_v61 = vsel %vm1111_vm4, %v1091_v25, %v1112_v52  ;;  %v1328_v38 = vld [vmem:[#allocation2] sm:$0xff]  ;;  %vm5030_vm2 = vmmov %vm5026_vm1  ;;  %v1210_v59 = vrot.slane %v4359_v1, 4  ;;  %vm4947_vm4 = vcmask 506880  }
  0xdd   : > { %1114 = vst [vmem:[#allocation2 + $0x58] sm:$0x66] %v1113_v61  ;;  %v1213_v56 = vsel %vm5030_vm2, %v1208_v34, %v1209_v62  ;;  %v4363_v3 = vcombine.high %v1328_v38, %v1332_v22  ;;  %v4365_v7 = vcombine.low %v1328_v38, %v1332_v22  ;;  %v1289_v18 = vpop.permute.xlu0 %1288  ;;  %vm5031_vm12 = vmmov %vm5026_vm1  ;;  %v508_v61 = vld [vmem:[#allocation2 + $0x18] sm:$0x66]  ;;  %v502_v38 = vld [vmem:[#allocation2 + $0x10] sm:$0x66] }
  0xde   : > { %v1215_v15 = vsel %vm4948_vm6, %v1199_v54, %v1213_v56  ;;  %v1216_v21 = vsel %vm5026_vm1, %v1209_v62, %v1210_v59  ;;  %v1298_v31 = vrot.slane %v1289_v18, 4  ;;  %vm5033_vm9 = vmmov %vm5026_vm1 }
  0xdf   : > { %v1232_v19 = vsel %vm4355_vm15, %v1215_v15, %v1231_v9  ;;  %1453 = vmatprep.subr.bf16.mxu0 %v4363_v3  ;;  %v1217_v23 = vsel %vm4948_vm6, %v1201_v58, %v1216_v21  ;;  %v1291_v24 = vpop.permute.xlu1 %1290  ;;  %vm4395_vm2 = vmand %vm505_vm5, %vm5034_vm0  ;;  %vm604_vm0 = vcmask 793607   ;;  %vm5041_vm6 = vcmask 1039360  }
  0xe0   : > { %1233 = vst [vmem:[#allocation2 + $0x40] sm:$0xcc] %v1232_v19  ;;  %1454 = vmatpush1.bf16.msra.mxu0 %v4365_v7  ;;  %v1235_v10 = vsel %vm4355_vm15, %v1217_v23, %v1234_v14  ;;  %v1299_v5 = vrot.slane %v1291_v24, 4  ;;  %vm507_vm5 = vmor %vm4395_vm2, %vm4233_vm7  ;;  %vm5043_vm7 = vsmask.f32 7966 }
  0xe1   : > { %1236 = vst [vmem:[#allocation2 + $0x48] sm:$0xcc] %v1235_v10  ;;  %v4378_v32 = vpop.permute.xlu0 %1292  ;;  %vm4418_vm2 = vmand %vm604_vm0, %vm5043_vm7  ;;  %v746_v10 = vld [vmem:[#allocation2 + $0x30] sm:$0x33] }
  0xe2   : > { %v1303_v40 = vsel %vm5031_vm12, %v1298_v31, %v1299_v5  ;;  %v1300_v41 = vrot.slane %v4378_v32, 4  ;;  %vm5037_vm12 = vcmask 769024  }
  0xe3   : > { %v1305_v29 = vsel %vm4947_vm4, %v1289_v18, %v1303_v40  ;;  %v947_v42 = vpop.permute.xlu1 %946 }
  0xe4   : > { %v1317_v8 = vsel %vm5032_vm13, %v1305_v29, %v1316_v28  ;;  %v1306_v33 = vsel %vm5033_vm9, %v1299_v5, %v1300_v41  ;;  %v961_v43 = vrot.slane %v947_v42, 4  ;;  %vm5038_vm9 = vmmov %vm5026_vm1 }
  0xe5   : > { %1318 = vst [vmem:[#allocation2 + $0x60] sm:$0x33] %v1317_v8  ;;  %v1307_v11 = vsel %vm4947_vm4, %v1291_v24, %v1306_v33  ;;  %v949_v44 = vpop.permute.xlu0 %948  ;;  %vm5039_vm4 = vmmov %vm5037_vm12  ;;  %v3803_v24 = vmov 65535  }
  0xe6   : > { %v1320_v47 = vsel %vm5032_vm13, %v1307_v11, %v1319_v36  ;;  %v962_v49 = vrot.slane %v949_v44, 4 }
  0xe7   : > { %1321 = vst [vmem:[#allocation2 + $0x68] sm:$0x33] %v1320_v47  ;;  %v4391_v51 = vpop.permute.xlu1 %950 }
  0xe8   : > { %v975_v54 = vsel %vm5026_vm1, %v961_v43, %v962_v49  ;;  %v963_v55 = vrot.slane %v4391_v51, 4  ;;  %vm1425_vm1 = vcmask 1044480  }
  0xe9   : > { %v976_v57 = vsel %vm5037_vm12, %v947_v42, %v975_v54  ;;  %v471_v34 = vpop.permute.xlu0 %470  ;;  %vm5040_vm12 = vmmov %vm5038_vm9 }
  0xea   : > { %1013 = vst [vmem:[#allocation2 + $0x40] sm:$0x11] %v976_v57  ;;  %v977_v25 = vsel %vm5038_vm9, %v962_v49, %v963_v55  ;;  %v475_v58 = vrot.slane %v471_v34, 4  ;;  %vm5042_vm9 = vmmov %vm5041_vm6 }
  0xeb   : > { %v978_v62 = vsel %vm5039_vm4, %v949_v44, %v977_v25  ;;  %v714_v22 = vpop.permute.xlu1 %713  ;;  %vm1426_vm4 = vcmask 1045504   ;;  %v1329_v25 = vld [vmem:[#allocation2 + $0x8] sm:$0xff] }
  0xec   : > { %1014 = vst [vmem:[#allocation2 + $0x48] sm:$0x11] %v978_v62  ;;  %v482_v56 = vsel %vm5040_vm12, %v474_v39, %v475_v58  ;;  %v484_v9 = vsel %vm5041_vm6, %v471_v34, %v475_v58  ;;  %v720_v15 = vrot.slane %v714_v22, 4  ;;  %vm5046_vm6 = vmmov %vm5040_vm12  ;;  %v1340_v8 = vld [vmem:[#allocation2 + $0x60] sm:$0x33] }
  0xed   : > { %v483_v13 = vsel %vm5042_vm9, %v4258_v35, %v482_v56  ;;  %v509_v18 = vsel %vm507_vm5, %v484_v9, %v508_v61  ;;  %v716_v19 = vpop.permute.xlu0 %715  ;;  %v1427_v35 = vsel %vm1425_vm1, 4294967295, %v3803_v24  ;;  %vm5047_vm5 = vcmask 785408   ;;  %vm5048_vm12 = vmmov %vm5046_vm6  ;;  %v1237_v56 = vld [vmem:[#allocation2 + $0x50] sm:$0xcc] }
  0xee   : > { %v503_v14 = vsel %vm4254_vm3, %v483_v13, %v502_v38  ;;  %510 = vst [vmem:[#allocation2 + $0x18] sm:$0x66] %v509_v18  ;;  %v727_v39 = vsel %vm5046_vm6, %v719_v45, %v720_v15  ;;  %v721_v23 = vrot.slane %v716_v19, 4  ;;  %vm1009_vm3 = vmor %vm4418_vm2, %vm4277_vm11  ;;  %v751_v45 = vld [vmem:[#allocation2 + $0x38] sm:$0x33]  ;;  %vm5051_vm9 = vnez %v4961_v12  ;;  %v4505_v18 = vld [vmem:[%s4916_s1] sm:$0xff]  }
  0xef   : > { %504 = vst [vmem:[#allocation2 + $0x10] sm:$0x66] %v503_v14  ;;  %v728_v31 = vsel %vm5047_vm5, %v4271_v37, %v727_v39  ;;  %v945_v5 = vpop.permute.xlu1 %944  ;;  %vm5049_vm1 = vmmov %vm5047_vm5  ;;  %v4438_v37 = vsel %vm1426_vm4, %v1427_v35, 0  ;;  %vm5053_vm5 = vcmask 1043459   ;;  %vm5056_vm4 = vcmask 769024  }
  0xf0   : > { %v747_v28 = vsel %vm4042_vm14, %v728_v31, %v746_v10  ;;  %v729_v2 = vsel %vm5048_vm12, %v720_v15, %v721_v23  ;;  %v960_v40 = vrot.slane %v945_v5, 4  ;;  %vm5050_vm14 = vnez %v4967_v20  ;;  %vm4449_vm12 = vmor %vm604_vm0, %vm5053_vm5  ;;  %v1010_v12 = vld [vmem:[#allocation2 + $0x38] sm:$0x88]  ;;  %v1341_v34 = vld [vmem:[#allocation2 + $0x68] sm:$0x33] }
  0xf1   : > { %748 = vst [vmem:[#allocation2 + $0x30] sm:$0x33] %v747_v28  ;;  %v730_v29 = vsel %vm5049_vm1, %v714_v22, %v729_v2  ;;  %v560_v36 = vpop.permute.xlu0 %559  ;;  %v1336_v42 = vld [vmem:[#allocation2 + $0x40] sm:$0xff]  ;;  %vm5052_vm7 = vmor %vm5050_vm14, %vm5051_vm9  ;;  %vm5057_vm1 = vcmask 793606   ;;  %vm5061_vm9 = vcmask 1031168  }
  0xf2   : > { %v752_v17 = vsel %vm5052_vm7, %v730_v29, %v751_v45  ;;  %v973_v33 = vsel %vm5046_vm6, %v4303_v6, %v960_v40  ;;  %v572_v11 = vrot.slane %v560_v36, 4  ;;  %v4453_v44 = vcombine.high %v1336_v42, %v1340_v8  ;;  %vm4462_vm14 = vmand %vm5057_vm1, %vm1228_vm10  ;;  %v1242_v39 = vld [vmem:[#allocation2 + $0x58] sm:$0xcc]  ;;  %v1322_v23 = vld [vmem:[#allocation2 + $0x70] sm:$0x33] }
  0xf3   : > { %753 = vst [vmem:[#allocation2 + $0x38] sm:$0x33] %v752_v17  ;;  %v974_v20 = vsel %vm5056_vm4, %v3560_v26, %v973_v33  ;;  %v1205_v47 = vpop.permute.xlu1 %1204  ;;  %v4458_v49 = vcombine.low %v1336_v42, %v1340_v8  ;;  %v1337_v52 = vld [vmem:[#allocation2 + $0x48] sm:$0xff]  ;;  %vm5060_vm0 = vmmov %vm5046_vm6  ;;  %vm1421_vm6 = vcmask 220160   ;;  %v1325_v28 = vld [vmem:[#allocation2 + $0x78] sm:$0x33]  ;;  %vm5072_vm1 = vnez %v4957_v0 }
  0xf4   : > { %v582_v54 = vsel %vm5060_vm0, %v571_v50, %v572_v11  ;;  %v584_v57 = vsel %vm5061_vm9, %v560_v36, %v572_v11  ;;  %v1011_v60 = vsel %vm1009_vm3, %v974_v20, %v1010_v12  ;;  %v1211_v26 = vrot.slane %v1205_v47, 4  ;;  %1643 = vrot.lane.b32.xlu0 %v4453_v44, %s3797_s14  ;;  %vm5062_vm10 = vmmov %vm5061_vm9 }
  0xf5   : > { %v583_v58 = vsel %vm5062_vm10, %v4311_v27, %v582_v54  ;;  %606 = vst.msk [vmem:[#allocation2 + $0x18] sm:$0x88] %vm4449_vm12, %v584_v57  ;;  %1012 = vst [vmem:[#allocation2 + $0x38] sm:$0x88] %v1011_v60  ;;  %v1207_v50 = vpop.permute.xlu0 %1206  ;;  %v4481_v61 = vcombine.low %v1337_v52, %v1341_v34  ;;  %v1433_v48 = vand.u32 %v4453_v44, %v4438_v37  ;;  %v1333_v27 = vld [vmem:[#allocation2 + $0x28] sm:$0xff]  ;;  %vm5064_vm3 = vcmask 515072  }
  0xf6   : > { %602 = vst [vmem:[#allocation2 + $0x10] sm:$0x88] %v583_v58  ;;  %vm5063_vm11 = vmmov %vm5060_vm0  ;;  %v1212_v38 = vrot.slane %v1207_v50, 4  ;;  %v1430_v22 = vand.u32 %v4458_v49, %v4438_v37  ;;  %v4496_v15 = vcombine.high %v1337_v52, %v1341_v34  ;;  %v4500_v13 = vcombine.high %v1329_v25, %v1333_v27 }
  0xf7   : > { %v1218_v62 = vsel %vm5063_vm11, %v1210_v59, %v1211_v26  ;;  %vm1241_vm2 = vmor %vm4462_vm14, %vm4334_vm8  ;;  %1645 = vrot.lane.b32.xlu1 %v4481_v61, %s3797_s14  ;;  %1455 = vmatprep.subr.bf16.mxu0 %v1433_v48  ;;  %v1295_v59 = vpop.permute.xlu1 %1294  ;;  %v4522_v31 = vcombine.low %v1329_v25, %v1333_v27  ;;  %vm5068_vm12 = vcmask 506880   ;;  %v1436_v8 = vand.u32 %v4481_v61, %v4438_v37 }
  0xf8   : > { %v1219_v9 = vsel %vm5064_vm3, %v4359_v1, %v1218_v62  ;;  %vm5065_vm7 = vmmov %vm5060_vm0  ;;  %v1301_v1 = vrot.slane %v1295_v59, 4  ;;  %1456 = vmatpush1.bf16.msra.mxu0 %v1430_v22  ;;  %1641 = vrot.lane.b32.xlu0 %v4458_v49, %s3797_s14  ;;  %v1439_v46 = vand.u32 %v4496_v15, %v4438_v37  ;;  %v1334_v33 = vld [vmem:[#allocation2 + $0x30] sm:$0xff]  ;;  %vm5074_vm9 = vcmask 769024  }
  0xf9   : > { %v1238_v19 = vsel %vm4355_vm15, %v1219_v9, %v1237_v56  ;;  %v1220_v21 = vsel %vm5065_vm7, %v1211_v26, %v1212_v38  ;;  %vm5066_vm5 = vmmov %vm5064_vm3  ;;  %1496 = vmatprep.subr.bf16.mxu0 %v4500_v13  ;;  %v1297_v24 = vpop.permute.xlu0 %1296  ;;  %vm5078_vm3 = vcmask 1039360  }
  0xfa   : > { %1239 = vst [vmem:[#allocation2 + $0x50] sm:$0xcc] %v1238_v19  ;;  %v1221_v14 = vsel %vm5066_vm5, %v1205_v47, %v1220_v21  ;;  %vm5067_vm15 = vmmov %vm5060_vm0  ;;  %v1302_v10 = vrot.slane %v1297_v24, 4 }
  0xfb   : > { %v1243_v16 = vsel %vm1241_vm2, %v1221_v14, %v1242_v39  ;;  %v1308_v35 = vsel %vm5067_vm15, %v1300_v41, %v1301_v1  ;;  %v953_v2 = vpop.permute.xlu1 %952  ;;  %3362 = vmatmul.mubr.msk.bf16.vlgmr.msra.gmra.mrb[0].mxu0 %vm1421_vm6, %v4505_v18  ;;  %vm5069_vm8 = vmmov %vm5060_vm0  ;;  %vm5077_vm2 = vnez %v4955_v63 }
  0xfc   : > { %1244 = vst [vmem:[#allocation2 + $0x58] sm:$0xcc] %v1243_v16  ;;  %v1309_v5 = vsel %vm5068_vm12, %v4378_v32, %v1308_v35  ;;  %v1310_v41 = vsel %vm5069_vm8, %v1301_v1, %v1302_v10  ;;  %v964_v45 = vrot.slane %v953_v2, 4  ;;  %1497 = vmatpush1.bf16.msra.mxu0 %v4522_v31  ;;  %v1331_v29 = vld [vmem:[#allocation2 + $0x18] sm:$0xff]  ;;  %1528 = vmatprep.mubr.bf16.mxu0 %v3802_v53  ;;  %vm5070_vm4 = vmmov %vm5068_vm12 }
  0xfd   : > { %v1323_v40 = vsel %vm5032_vm13, %v1309_v5, %v1322_v23  ;;  %v1335_v36 = vld [vmem:[#allocation2 + $0x38] sm:$0xff]  ;;  %v1311_v32 = vsel %vm5070_vm4, %v1295_v59, %v1310_v41  ;;  %1498 = vmatprep.subr.bf16.mxu0 %v1439_v46  ;;  %v955_v42 = vpop.permute.xlu0 %954  ;;  %v1330_v4 = vld [vmem:[#allocation2 + $0x10] sm:$0xff]  ;;  %vm5071_vm13 = vnez %v4965_v30  ;;  %vm5075_vm10 = vmmov %vm5060_vm0 }
  0xfe   : > { %1324 = vst [vmem:[#allocation2 + $0x70] sm:$0x33] %v1323_v40  ;;  %v4538_v17 = vcombine.high %v1331_v29, %v1335_v36  ;;  %v4540_v43 = vcombine.low %v1331_v29, %v1335_v36  ;;  %vm5073_vm14 = vmor %vm5071_vm13, %vm5072_vm1  ;;  %v979_v20 = vsel %vm5060_vm0, %v963_v55, %v964_v45  ;;  %v965_v12 = vrot.slane %v955_v42, 4 }
  0xff   : > { %v1326_v11 = vsel %vm5073_vm14, %v1311_v32, %v1325_v28  ;;  %v4550_v47 = vcombine.high %v1330_v4, %v1334_v33  ;;  %v980_v52 = vsel %vm5074_vm9, %v4391_v51, %v979_v20  ;;  %vm5076_vm11 = vmmov %vm5074_vm9  ;;  %v3350_v55 = vcombine.low %v1330_v4, %v1334_v33 }
 0x100   : > { %1327 = vst [vmem:[#allocation2 + $0x78] sm:$0x33] %v1326_v11  ;;  %1582 = vmatprep.subr.bf16.mxu1 %v4538_v17  ;;  %1015 = vst [vmem:[#allocation2 + $0x50] sm:$0x11] %v980_v52  ;;  %v981_v30 = vsel %vm5075_vm10, %v964_v45, %v965_v12  ;;  %1499 = vmatpush1.bf16.msra.mxu0 %v1436_v8  ;;  %vm5086_vm1 = vcmask 785408  }
 0x101   : > { %1583 = vmatpush1.bf16.msra.mxu1 %v4540_v43  ;;  %v982_v0 = vsel %vm5076_vm11, %v953_v2, %v981_v30  ;;  %1539 = vmatprep.subr.bf16.mxu0 %v4550_v47  ;;  %vm5079_vm7 = vmmov %vm5078_vm3 }
 0x102   : > { %1019 = vst.msk [vmem:[#allocation2 + $0x58] sm:$0x11] %vm5077_vm2, %v982_v0  ;;  %vm5080_vm5 = vmmov %vm5078_vm3 }
 0x103   : > { %3363 = vmatmul.mubr.msk.bf16.vlgmr.msra.gmra.mrb[4].mxu0 %vm1421_vm6, %v4505_v18  ;;  %vm5081_vm15 = vmmov %vm5078_vm3 }
 0x104   : > { %1540 = vmatpush1.bf16.msra.mxu0 %v3350_v55  ;;  %1571 = vmatprep.mubr.bf16.mxu0 %v3802_v53  ;;  %vm5082_vm12 = vmmov %vm5078_vm3 }
 0x105   : > { %v1342_v6 = vld [vmem:[#allocation2 + $0x70] sm:$0x33]  ;;  %vm5083_vm8 = vmmov %vm5078_vm3 }
 0x106   : > { %vm5084_vm4 = vmmov %vm5078_vm3 }
 0x107   : > { %v1338_v51 = vld [vmem:[#allocation2 + $0x50] sm:$0xff]  ;;  %v1343_v26 = vld [vmem:[#allocation2 + $0x78] sm:$0x33]  ;;  %vm5085_vm13 = vmmov %vm5078_vm3 }
 0x108   : > { %v3359_v54 = vcombine.high %v1338_v51, %v1342_v6  ;;  %v3358_v57 = vcombine.low %v1338_v51, %v1342_v6  ;;  %vm5087_vm14 = vmmov %vm5086_vm1 }
 0x109   : > { %v1339_v60 = vld [vmem:[#allocation2 + $0x58] sm:$0xff]  ;;  %vm5088_vm0 = vmmov %vm5086_vm1 }
 0x10a   : > { %1651 = vrot.lane.b32.xlu0 %v3359_v54, %s3797_s14  ;;  %v3360_v34 = vcombine.low %v1339_v60, %v1343_v26  ;;  %v3361_v25 = vcombine.high %v1339_v60, %v1343_v26  ;;  %v1445_v63 = vand.u32 %v3359_v54, %v4438_v37  ;;  %v1442_v58 = vand.u32 %v3358_v57, %v4438_v37  ;;  %vm5089_vm9 = vmmov %vm5088_vm0 }
 0x10b   : > { %vm5090_vm10 = vmmov %vm5088_vm0 }
 0x10c   : > { %1653 = vrot.lane.b32.xlu1 %v3360_v34, %s3797_s14  ;;  %1541 = vmatprep.subr.bf16.mxu0 %v1445_v63  ;;  %v1451_v50 = vand.u32 %v3361_v25, %v4438_v37  ;;  %v1448_v48 = vand.u32 %v3360_v34, %v4438_v37  ;;  %vm5091_vm11 = vmmov %vm5088_vm0 }
 0x10d   : > { %1542 = vmatpush1.bf16.msra.mxu0 %v1442_v58  ;;  %vm5092_vm2 = vmmov %vm5088_vm0 }
 0x10e   : > { %1649 = vrot.lane.b32.xlu0 %v3358_v57, %s3797_s14  ;;  %1584 = vmatprep.subr.bf16.mxu1 %v1451_v50 }
 0x10f   : > { %1585 = vmatpush1.bf16.msra.mxu1 %v1448_v48 }
 0x110   : > { %1627 = vrot.lane.b32.xlu1 %v4363_v3, %s3797_s14  ;;  %3364 = vmatmul.mubr.msk.bf16.vlgmr.msra.gmra.mrb[8].mxu0 %vm1421_vm6, %v4505_v18 }
 0x111   : > { %1735 = vmatprep.mubr.bf16.mxu0 %v3802_v53 }
 0x112   : > { %1637 = vrot.lane.b32.xlu0 %v4540_v43, %s3797_s14  ;;  %3365 = vmatmul.mubr.msk.bf16.vlgmr.msra.gmra.mrb[0].mxu1 %vm1421_vm6, %v4505_v18 }
 0x113   : > { %1778 = vmatprep.mubr.bf16.mxu1 %v3802_v53 }
 0x114   : > { %1911 = vrot.lane.b32.xlu1 %v4481_v61, %s3798_s17 }
 0x116   : > { %1629 = vrot.lane.b32.xlu0 %v4522_v31, %s3797_s14 }
 0x118   : > { %1625 = vrot.lane.b32.xlu1 %v4365_v7, %s3797_s14 }
 0x11a   : > { %1909 = vrot.lane.b32.xlu0 %v4453_v44, %s3798_s17 }
 0x11c   : > { %1635 = vrot.lane.b32.xlu1 %v4550_v47, %s3797_s14 }
 0x11e   : > { %1907 = vrot.lane.b32.xlu0 %v4458_v49, %s3798_s17 }
 0x120   : > { %1633 = vrot.lane.b32.xlu1 %v3350_v55, %s3797_s14 }
 0x122   : > { %1903 = vrot.lane.b32.xlu0 %v4540_v43, %s3798_s17 }
 0x124   : > { %1893 = vrot.lane.b32.xlu1 %v4363_v3, %s3798_s17 }
 0x126   : > { %1895 = vrot.lane.b32.xlu0 %v4522_v31, %s3798_s17 }
 0x128   : > { %1919 = vrot.lane.b32.xlu1 %v3360_v34, %s3798_s17 }
 0x12a   : > { %1917 = vrot.lane.b32.xlu0 %v3359_v54, %s3798_s17 }
 0x12c   : > { %1891 = vrot.lane.b32.xlu1 %v4365_v7, %s3798_s17 }
 0x12e   : > { %1915 = vrot.lane.b32.xlu0 %v3358_v57, %s3798_s17 }
 0x130   : > { %1901 = vrot.lane.b32.xlu1 %v4550_v47, %s3798_s17 }
 0x132   : > { %2175 = vrot.lane.b32.xlu0 %v4453_v44, %s3794_s11  ;;  %v217_v44 = vld [vmem:[%s4917_s2 + $0x8] sm:$0xff] }
 0x134   : > { %1899 = vrot.lane.b32.xlu1 %v3350_v55, %s3798_s17 }
 0x136   : > { %2161 = vrot.lane.b32.xlu0 %v4522_v31, %s3794_s11 }
 0x138   : > { %2159 = vrot.lane.b32.xlu1 %v4363_v3, %s3794_s11 }
 0x13a   : > { %2173 = vrot.lane.b32.xlu0 %v4458_v49, %s3794_s11 }
 0x13c   : > { %2157 = vrot.lane.b32.xlu1 %v4365_v7, %s3794_s11  ;;  %v216_v7 = vld [vmem:[%s4917_s2] sm:$0xff] }
 0x13e   : > { %2169 = vrot.lane.b32.xlu0 %v4540_v43, %s3794_s11 }
 0x140   : > { %2177 = vrot.lane.b32.xlu1 %v4481_v61, %s3794_s11 }
 0x142   : > { %2183 = vrot.lane.b32.xlu0 %v3359_v54, %s3794_s11 }
 0x144   : > { %2167 = vrot.lane.b32.xlu1 %v4550_v47, %s3794_s11 }
 0x146   : > { %2181 = vrot.lane.b32.xlu0 %v3358_v57, %s3794_s11 }
 0x148   : > { %2165 = vrot.lane.b32.xlu1 %v3350_v55, %s3794_s11 }
 0x14a   : > { %1647 = vrot.lane.b32.xlu0 %v4496_v15, %s3797_s14 }
 0x14c   : > { %2185 = vrot.lane.b32.xlu1 %v3360_v34, %s3794_s11 }
 0x14e   : > { %1655 = vrot.lane.b32.xlu0 %v3361_v25, %s3797_s14 }
 0x150   : > { %1631 = vrot.lane.b32.xlu1 %v4500_v13, %s3797_s14 }
 0x152   : > { %1913 = vrot.lane.b32.xlu0 %v4496_v15, %s3798_s17 }
 0x154   : > { %1639 = vrot.lane.b32.xlu1 %v4538_v17, %s3797_s14 }
 0x156   : > { %1921 = vrot.lane.b32.xlu0 %v3361_v25, %s3798_s17 }
 0x158   : > { %1897 = vrot.lane.b32.xlu1 %v4500_v13, %s3798_s17 }
 0x15a   : > { %2179 = vrot.lane.b32.xlu0 %v4496_v15, %s3794_s11 }
 0x15c   : > { %1905 = vrot.lane.b32.xlu1 %v4538_v17, %s3798_s17 }
 0x15e   : > { %2187 = vrot.lane.b32.xlu0 %v3361_v25, %s3794_s11 }
 0x160   : > { %2163 = vrot.lane.b32.xlu1 %v4500_v13, %s3794_s11 }
 0x162   : > { %2430 = vperm.xlu0 %3562, %v217_v44  }
 0x164   : > { %2171 = vrot.lane.b32.xlu1 %v4538_v17, %s3794_s11 }
 0x166   : > { %v1644_v3 = vpop.permute.xlu0 %1643 }
 0x168   : > { %2425 = vperm.xlu1 %3561, %v216_v7  }
 0x169   : > { %v4655_v61 = vpop.permute.xlu1 %1645 }
 0x16a   : > { %v1642_v49 = vpop.permute.xlu0 %1641  ;;  %v1665_v15 = vsel %vm5078_vm3, %v1644_v3, %v4655_v61  ;;  %vm5093_vm3 = vmmov %vm5088_vm0 }
 0x16b   : > { %v1683_v21 = vand.u32 %v1665_v15, %v4438_v37  ;;  %v1664_v1 = vsel %vm5080_vm5, %v1642_v49, %v1644_v3 }
 0x16c   : > { %v1680_v23 = vand.u32 %v1664_v1, %v4438_v37 }
 0x17c   : > { %v1652_v62 = vpop.permute.xlu0 %1651 }
 0x17e   : > { %v4657_v38 = vpop.permute.xlu1 %1653 }
 0x17f   : > { %v1669_v35 = vsel %vm5083_vm8, %v1652_v62, %v4657_v38 }
 0x180   : > { %v4659_v22 = vpop.permute.xlu0 %1649  ;;  %v1695_v5 = vand.u32 %v1669_v35, %v4438_v37 }
 0x181   : > { %v1668_v28 = vsel %vm5084_vm4, %v4659_v22, %v1652_v62 }
 0x182   : > { %v1628_v27 = vpop.permute.xlu1 %1627  ;;  %v1692_v40 = vand.u32 %v1668_v28, %v4438_v37  ;;  %v3582_v28 = vld [vmem:[#allocation3 + $0x200] ss:$8 sps:$4 sm:$0xff]  }
 0x184   : > { %v4661_v56 = vpop.permute.xlu0 %1637 }
 0x186   : > { %v4663_v9 = vpop.permute.xlu1 %1911 }
 0x188   : > { %v4667_v59 = vpop.permute.xlu0 %1629 }
 0x189   : > { %v1658_v13 = vsel %vm5079_vm7, %v1628_v27, %v4667_v59  ;;  %vm5094_vm7 = vcmask 777216  }
 0x18a   : > { %v1626_v19 = vpop.permute.xlu1 %1625  ;;  %1703 = vmatprep.subr.bf16.mxu0 %v1658_v13  ;;  %vm5095_vm5 = vmmov %vm5094_vm7 }
 0x18b   : > { %v1657_v14 = vsel %vm5081_vm15, %v1626_v19, %v1628_v27  ;;  %vm5096_vm15 = vmmov %vm5095_vm5 }
 0x18c   : > { %v1910_v39 = vpop.permute.xlu0 %1909  ;;  %1704 = vmatpush1.bf16.msra.mxu0 %v1657_v14  ;;  %vm5098_vm8 = vmmov %vm5095_vm5 }
 0x18d   : > { %1705 = vmatprep.subr.bf16.mxu0 %v1683_v21  ;;  %v1931_v32 = vsel %vm5087_vm14, %v1910_v39, %v4663_v9  ;;  %vm5099_vm4 = vmmov %vm5095_vm5  ;;  %vm5102_vm14 = vcmask 1039360  }
 0x18e   : > { %v1636_v24 = vpop.permute.xlu1 %1635  ;;  %v1949_v17 = vand.u32 %v1931_v32, %v4438_v37 }
 0x18f   : > { %v1662_v16 = vsel %vm5082_vm12, %v1636_v24, %v4661_v56  ;;  %vm5097_vm12 = vmmov %vm5095_vm5 }
 0x190   : > { %v1908_v10 = vpop.permute.xlu0 %1907  ;;  %1706 = vmatpush1.bf16.msra.mxu0 %v1680_v23  ;;  %v3584_v23 = vld [vmem:[#allocation3 + $0x204] ss:$8 sps:$4 sm:$0xff]  }
 0x191   : > { %1789 = vmatprep.subr.bf16.mxu0 %v1662_v16  ;;  %v1930_v4 = vsel %vm5088_vm0, %v1908_v10, %v1910_v39  ;;  %vm5103_vm0 = vmmov %vm5102_vm14 }
 0x192   : > { %v4679_v31 = vpop.permute.xlu1 %1633  ;;  %v1946_v11 = vand.u32 %v1930_v4, %v4438_v37 }
 0x193   : > { %v1661_v2 = vsel %vm5085_vm13, %v4679_v31, %v1636_v24  ;;  %3366 = vmatmul.mubr.msk.bf16.vlgmr.msra.gmra.mrb[12].mxu0 %vm1421_vm6, %v4505_v18  ;;  %vm5100_vm13 = vmmov %vm5099_vm4 }
 0x194   : > { %v4688_v46 = vpop.permute.xlu0 %1903  ;;  %1790 = vmatpush1.bf16.msra.mxu0 %v1661_v2  ;;  %1821 = vmatprep.mubr.bf16.mxu0 %v3802_v53 }
 0x195   : > { %1791 = vmatprep.subr.bf16.mxu0 %v1695_v5 }
 0x196   : > { %v1894_v41 = vpop.permute.xlu1 %1893 }
 0x198   : > { %v4692_v45 = vpop.permute.xlu0 %1895  ;;  %1792 = vmatpush1.bf16.msra.mxu0 %v1692_v40 }
 0x199   : > { %v1924_v29 = vsel %vm5086_vm1, %v1894_v41, %v4692_v45  ;;  %vm5101_vm1 = vmmov %vm5099_vm4 }
 0x19a   : > { %v4696_v36 = vpop.permute.xlu1 %1919  ;;  %1969 = vmatprep.subr.bf16.mxu0 %v1924_v29 }
 0x19b   : > { %3368 = vmatmul.mubr.msk.bf16.vlgmr.msra.gmra.mrb[16].mxu0 %vm1421_vm6, %v4505_v18 }
 0x19c   : > { %v1918_v42 = vpop.permute.xlu0 %1917  ;;  %2001 = vmatprep.mubr.bf16.mxu0 %v3802_v53 }
 0x19d   : > { %v1935_v47 = vsel %vm5091_vm11, %v1918_v42, %v4696_v36  ;;  %vm5106_vm11 = vmmov %vm5103_vm0 }
 0x19e   : > { %v1892_v8 = vpop.permute.xlu1 %1891  ;;  %v1961_v0 = vand.u32 %v1935_v47, %v4438_v37 }
 0x19f   : > { %v1923_v33 = vsel %vm5089_vm9, %v1892_v8, %v1894_v41  ;;  %vm5104_vm9 = vmmov %vm5103_vm0 }
 0x1a0   : > { %v4706_v43 = vpop.permute.xlu0 %1915  ;;  %1970 = vmatpush1.bf16.msra.mxu0 %v1923_v33 }
 0x1a1   : > { %1971 = vmatprep.subr.bf16.mxu0 %v1949_v17  ;;  %v1934_v55 = vsel %vm5092_vm2, %v4706_v43, %v1918_v42  ;;  %vm5107_vm2 = vmmov %vm5103_vm0 }
 0x1a2   : > { %v1902_v20 = vpop.permute.xlu1 %1901  ;;  %v1958_v54 = vand.u32 %v1934_v55, %v4438_v37 }
 0x1a3   : > { %v1928_v12 = vsel %vm5090_vm10, %v1902_v20, %v4688_v46  ;;  %vm5105_vm10 = vmmov %vm5103_vm0 }
 0x1a4   : > { %v2176_v52 = vpop.permute.xlu0 %2175  ;;  %1972 = vmatpush1.bf16.msra.mxu0 %v1946_v11 }
 0x1a5   : > { %2055 = vmatprep.subr.bf16.mxu0 %v1928_v12 }
 0x1a6   : > { %v4713_v30 = vpop.permute.xlu1 %1899 }
 0x1a7   : > { %v1927_v51 = vsel %vm5093_vm3, %v4713_v30, %v1902_v20  ;;  %3370 = vmatmul.mubr.msk.bf16.vlgmr.msra.gmra.mrb[20].mxu0 %vm1421_vm6, %v4505_v18 }
 0x1a8   : > { %v4722_v6 = vpop.permute.xlu0 %2161  ;;  %2056 = vmatpush1.bf16.msra.mxu0 %v1927_v51  ;;  %2087 = vmatprep.mubr.bf16.mxu0 %v3802_v53 }
 0x1a9   : > { %2057 = vmatprep.subr.bf16.mxu0 %v1961_v0 }
 0x1aa   : > { %v2160_v57 = vpop.permute.xlu1 %2159 }
 0x1ab   : > { %v2190_v60 = vsel %vm5094_vm7, %v2160_v57, %v4722_v6  ;;  %vm5108_vm7 = vmmov %vm5093_vm3 }
 0x1ac   : > { %v2174_v26 = vpop.permute.xlu0 %2173  ;;  %2058 = vmatpush1.bf16.msra.mxu0 %v1958_v54 }
 0x1ad   : > { %2235 = vmatprep.subr.bf16.mxu0 %v2190_v60  ;;  %v2196_v58 = vsel %vm5096_vm15, %v2174_v26, %v2176_v52  ;;  %vm5110_vm15 = vmmov %vm5093_vm3 }
 0x1ae   : > { %v2158_v34 = vpop.permute.xlu1 %2157  ;;  %v2212_v44 = vand.u32 %v2196_v58, %v4438_v37 }
 0x1af   : > { %v2189_v25 = vsel %vm5095_vm5, %v2158_v34, %v2160_v57  ;;  %3372 = vmatmul.mubr.msk.bf16.vlgmr.msra.gmra.mrb[24].mxu0 %vm1421_vm6, %v4505_v18  ;;  %vm5109_vm5 = vmmov %vm5093_vm3 }
 0x1b0   : > { %v4731_v63 = vpop.permute.xlu0 %2169  ;;  %2236 = vmatpush1.bf16.msra.mxu0 %v2189_v25  ;;  %2267 = vmatprep.mubr.bf16.mxu0 %v3802_v53 }
 0x1b2   : > { %v4735_v50 = vpop.permute.xlu1 %2177 }
 0x1b3   : > { %v2197_v48 = vsel %vm5097_vm12, %v2176_v52, %v4735_v50  ;;  %vm5111_vm12 = vmmov %vm5093_vm3 }
 0x1b4   : > { %v2215_v3 = vand.u32 %v2197_v48, %v4438_v37  ;;  %v2184_v7 = vpop.permute.xlu0 %2183 }
 0x1b6   : > { %v2168_v49 = vpop.permute.xlu1 %2167  ;;  %2237 = vmatprep.subr.bf16.mxu0 %v2215_v3 }
 0x1b7   : > { %2238 = vmatpush1.bf16.msra.mxu0 %v2212_v44  ;;  %v2194_v62 = vsel %vm5098_vm8, %v2168_v49, %v4731_v63  ;;  %vm5112_vm8 = vmmov %vm5093_vm3 }
 0x1b8   : > { %v4743_v27 = vpop.permute.xlu0 %2181  ;;  %2321 = vmatprep.subr.bf16.mxu0 %v2194_v62 }
 0x1b9   : > { %v2200_v19 = vsel %vm5100_vm13, %v4743_v27, %v2184_v7  ;;  %vm5114_vm13 = vmmov %vm5101_vm1 }
 0x1ba   : > { %v4745_v15 = vpop.permute.xlu1 %2165  ;;  %3374 = vmatmul.mubr.msk.bf16.vlgmr.msra.gmra.mrb[28].mxu0 %vm1421_vm6, %v4505_v18  ;;  %v2224_v24 = vand.u32 %v2200_v19, %v4438_v37 }
 0x1bb   : > { %v2193_v13 = vsel %vm5099_vm4, %v4745_v15, %v2168_v49  ;;  %2353 = vmatprep.mubr.bf16.mxu0 %v3802_v53  ;;  %vm5113_vm4 = vmmov %vm5101_vm1 }
 0x1bc   : > { %2322 = vmatpush1.bf16.msra.mxu0 %v2193_v13  ;;  %v1648_v21 = vpop.permute.xlu0 %1647  ;;  %v3596_v13 = vld [vmem:[#allocation3 + $0x224] ss:$8 sps:$4 sm:$0xff]  }
 0x1bd   : > { %v1667_v16 = vsel %vm5102_vm14, %v1648_v21, %v4659_v22  ;;  %v1666_v2 = vsel %vm5105_vm10, %v4655_v61, %v1648_v21  ;;  %vm5115_vm14 = vmmov %vm5101_vm1 }
 0x1be   : > { %v4754_v1 = vpop.permute.xlu1 %2185  ;;  %v1689_v40 = vand.u32 %v1667_v16, %v4438_v37  ;;  %v1686_v22 = vand.u32 %v1666_v2, %v4438_v37  ;;  %v3602_v16 = vld [vmem:[#allocation3 + $0x234] ss:$8 sps:$4 sm:$0xff]   ;;  %v3612_v2 = vld [vmem:[#allocation3 + $0x250] ss:$8 sps:$4 sm:$0xff]  }
 0x1bf   : > { %v2201_v14 = vsel %vm5101_vm1, %v2184_v7, %v4754_v1 }
 0x1c0   : > { %v2227_v39 = vand.u32 %v2201_v14, %v4438_v37 }
 0x1c2   : > { %v1632_v35 = vpop.permute.xlu1 %1631  ;;  %2323 = vmatprep.subr.bf16.mxu0 %v2227_v39  ;;  %v3594_v39 = vld [vmem:[#allocation3 + $0x220] ss:$8 sps:$4 sm:$0xff]  }
 0x1c3   : > { %v1659_v10 = vsel %vm5103_vm0, %v4667_v59, %v1632_v35  ;;  %2324 = vmatpush1.bf16.msra.mxu0 %v2224_v24  ;;  %v1660_v5 = vsel %vm5104_vm9, %v1632_v35, %v4679_v31  ;;  %v1656_v59 = vpop.permute.xlu0 %1655  ;;  %vm5116_vm0 = vmmov %vm5101_vm1  ;;  %v3575_v35 = vld [vmem:[#allocation3 + $0x14] ss:$8 sps:$4 sm:$0xff]  }
 0x1c4   : > { %1746 = vmatprep.subr.bf16.mxu1 %v1660_v5  ;;  %3163 = vmatprep.subr.bf16.mxu0 %v3584_v23  ;;  %v1670_v31 = vsel %vm5106_vm11, %v4657_v38, %v1656_v59  ;;  %v1701_v61 = vand.u32 %v1656_v59, %v4438_v37  ;;  %vm5117_vm9 = vmmov %vm5116_vm0  ;;  %v3572_v23 = vld [vmem:[#allocation3 + $0x4] ss:$8 sps:$4 sm:$0xff]   ;;  %v3606_v5 = vld [vmem:[#allocation3 + $0x240] ss:$8 sps:$4 sm:$0xff]  }
 0x1c5   : > { %1747 = vmatpush1.bf16.msra.mxu1 %v1659_v10  ;;  %v1698_v17 = vand.u32 %v1670_v31, %v4438_v37  ;;  %v3608_v10 = vld [vmem:[#allocation3 + $0x244] ss:$8 sps:$4 sm:$0xff]   ;;  %v3579_v59 = vld [vmem:[#allocation3 + $0x30] ss:$8 sps:$4 sm:$0xff]   ;;  %v3618_v31 = vld [vmem:[#allocation3 + $0x260] ss:$8 sps:$4 sm:$0xff]  }
 0x1c6   : > { %1748 = vmatprep.subr.bf16.mxu1 %v1689_v40  ;;  %3376 = vmatmul.mubr.msk.bf16.vlgmr.msra.gmra.mrb[32].mxu0 %vm1421_vm6, %v4505_v18  ;;  %v1640_v41 = vpop.permute.xlu1 %1639  ;;  %v3576_v40 = vld [vmem:[#allocation3 + $0x20] ss:$8 sps:$4 sm:$0xff]  }
 0x1c7   : > { %3164 = vmatpush1.bf16.msra.mxu0 %v3582_v28  ;;  %v1663_v29 = vsel %vm5107_vm2, %v4661_v56, %v1640_v41  ;;  %v1914_v32 = vpop.permute.xlu0 %1913  ;;  %v3614_v28 = vld [vmem:[#allocation3 + $0x254] ss:$8 sps:$4 sm:$0xff]  }
 0x1c8   : > { %v1933_v56 = vsel %vm5093_vm3, %v1914_v32, %v4706_v43  ;;  %v1932_v20 = vsel %vm5109_vm5, %v4663_v9, %v1914_v32  ;;  %v3585_v32 = vld [vmem:[#allocation3 + $0x40] ss:$8 sps:$4 sm:$0xff]  }
 0x1c9   : > { %1749 = vmatpush1.bf16.msra.mxu1 %v1686_v22  ;;  %v1955_v12 = vand.u32 %v1933_v56, %v4438_v37  ;;  %v1952_v52 = vand.u32 %v1932_v20, %v4438_v37  ;;  %v3581_v22 = vld [vmem:[#allocation3 + $0x34] ss:$8 sps:$4 sm:$0xff]   ;;  %v3632_v56 = vld [vmem:[#allocation3 + $0x284] ss:$8 sps:$4 sm:$0xff]   ;;  %v3630_v20 = vld [vmem:[#allocation3 + $0x280] ss:$8 sps:$4 sm:$0xff]  }
 0x1ca   : > { %1832 = vmatprep.subr.bf16.mxu1 %v1640_v41  ;;  %v1898_v42 = vpop.permute.xlu1 %1897  ;;  %v3620_v41 = vld [vmem:[#allocation3 + $0x264] ss:$8 sps:$4 sm:$0xff]  }
 0x1cb   : > { %v1926_v33 = vsel %vm5108_vm7, %v1898_v42, %v4713_v30  ;;  %v1925_v47 = vsel %vm5110_vm15, %v4692_v45, %v1898_v42  ;;  %v1922_v30 = vpop.permute.xlu0 %1921  ;;  %v3593_v42 = vld [vmem:[#allocation3 + $0x54] ss:$8 sps:$4 sm:$0xff]  }
 0x1cc   : > { %3367 = vmatmul.mubr.msk.bf16.vlgmr.msra.gmra.mrb[4].mxu1 %vm1421_vm6, %v4505_v18  ;;  %v1936_v45 = vsel %vm5111_vm12, %v4696_v36, %v1922_v30  ;;  %v1967_v54 = vand.u32 %v1922_v30, %v4438_v37  ;;  %v3605_v30 = vld [vmem:[#allocation3 + $0x74] ss:$8 sps:$4 sm:$0xff]  }
 0x1cd   : > { %1833 = vmatpush1.bf16.msra.mxu1 %v1663_v29  ;;  %1864 = vmatprep.mubr.bf16.mxu1 %v3802_v53  ;;  %v1964_v34 = vand.u32 %v1936_v45, %v4438_v37  ;;  %v3624_v29 = vld [vmem:[#allocation3 + $0x270] ss:$8 sps:$4 sm:$0xff]   ;;  %v3644_v45 = vld [vmem:[#allocation3 + $0x2a4] ss:$8 sps:$4 sm:$0xff]  }
 0x1ce   : > { %1834 = vmatprep.subr.bf16.mxu1 %v1701_v61  ;;  %v4780_v8 = vpop.f32.mrb[0].mxu0  ;;  %v1906_v9 = vpop.permute.xlu1 %1905  ;;  %v3626_v61 = vld [vmem:[#allocation3 + $0x274] ss:$8 sps:$4 sm:$0xff]  }
 0x1cf   : > { %v4783_v4 = vpop.f32.mrb[1].mxu0  ;;  %v1929_v57 = vsel %vm5112_vm8, %v4688_v46, %v1906_v9  ;;  %v2180_v60 = vpop.permute.xlu0 %2179 }
 0x1d0   : > { %v4785_v38 = vpop.f32.mrb[2].mxu0  ;;  %v2199_v25 = vsel %vm5113_vm4, %v2180_v60, %v4743_v27  ;;  %v2198_v58 = vsel %vm5101_vm1, %v4735_v50, %v2180_v60  ;;  %v3609_v60 = vld [vmem:[#allocation3 + $0x80] ss:$8 sps:$4 sm:$0xff]  }
 0x1d1   : > { %1835 = vmatpush1.bf16.msra.mxu1 %v1698_v17  ;;  %v4791_v11 = vpop.f32.mrb[3].mxu0  ;;  %v2221_v48 = vand.u32 %v2199_v25, %v4438_v37  ;;  %v2218_v50 = vand.u32 %v2198_v58, %v4438_v37  ;;  %v3591_v17 = vld [vmem:[#allocation3 + $0x50] ss:$8 sps:$4 sm:$0xff]   ;;  %v3650_v25 = vld [vmem:[#allocation3 + $0x2b4] ss:$8 sps:$4 sm:$0xff]  }
 0x1d2   : > { %2012 = vmatprep.subr.bf16.mxu1 %v1926_v33  ;;  %v2164_v26 = vpop.permute.xlu1 %2163  ;;  %v3599_v33 = vld [vmem:[#allocation3 + $0x64] ss:$8 sps:$4 sm:$0xff]   ;;  %v3615_v58 = vld [vmem:[#allocation3 + $0x90] ss:$8 sps:$4 sm:$0xff]  }
 0x1d3   : > { %v2192_v36 = vsel %vm5114_vm13, %v2164_v26, %v4745_v15  ;;  %v2191_v3 = vsel %vm5115_vm14, %v4722_v6, %v2164_v26  ;;  %v2188_v62 = vpop.permute.xlu0 %2187  ;;  %v3590_v15 = vld [vmem:[#allocation3 + $0x214] ss:$8 sps:$4 sm:$0xff]   ;;  %v3588_v6 = vld [vmem:[#allocation3 + $0x210] ss:$8 sps:$4 sm:$0xff]  }
 0x1d4   : > { %3369 = vmatmul.mubr.msk.bf16.vlgmr.msra.gmra.mrb[8].mxu1 %vm1421_vm6, %v4505_v18  ;;  %3165 = vmatprep.subr.bf16.mxu0 %v3590_v15  ;;  %v2202_v19 = vsel %vm5116_vm0, %v4754_v1, %v2188_v62  ;;  %v2233_v21 = vand.u32 %v2188_v62, %v4438_v37  ;;  %v3570_v1 = vld [vmem:[#allocation3] ss:$8 sps:$4 sm:$0xff]   ;;  %v3648_v26 = vld [vmem:[#allocation3 + $0x2b0] ss:$8 sps:$4 sm:$0xff]   ;;  %v3662_v62 = vld [vmem:[#allocation3 + $0x2d4] ss:$8 sps:$4 sm:$0xff]  }
 0x1d5   : > { %2013 = vmatpush1.bf16.msra.mxu1 %v1925_v47  ;;  %2044 = vmatprep.mubr.bf16.mxu1 %v3802_v53  ;;  %v2230_v24 = vand.u32 %v2202_v19, %v4438_v37  ;;  %v3578_v37 = vld [vmem:[#allocation3 + $0x24] ss:$8 sps:$4 sm:$0xff]   ;;  %v3636_v47 = vld [vmem:[#allocation3 + $0x290] ss:$8 sps:$4 sm:$0xff]  }
 0x1d6   : > { %2014 = vmatprep.subr.bf16.mxu1 %v1955_v12  ;;  %v4801_v43 = vpop.f32.mrb[4].mxu0  ;;  %v2172_v27 = vpop.permute.xlu1 %2171  ;;  %3166 = vmatpush1.bf16.msra.mxu0 %v3588_v6  ;;  %v3638_v12 = vld [vmem:[#allocation3 + $0x294] ss:$8 sps:$4 sm:$0xff]   ;;  %v3660_v15 = vld [vmem:[#allocation3 + $0x2d0] ss:$8 sps:$4 sm:$0xff]  }
 0x1d7   : > { %v4804_v0 = vpop.f32.mrb[5].mxu0  ;;  %v2195_v14 = vsel %vm5117_vm9, %v4731_v63, %v2172_v27  ;;  %3167 = vmatprep.subr.bf16.mxu0 %v3596_v13  ;;  %v3600_v63 = vld [vmem:[#allocation3 + $0x230] ss:$8 sps:$4 sm:$0xff]  }
 0x1d8   : > { %v4806_v55 = vpop.f32.mrb[6].mxu0  ;;  %v3627_v19 = vld [vmem:[#allocation3 + $0xb0] ss:$8 sps:$4 sm:$0xff]  }
 0x1d9   : > { %2015 = vmatpush1.bf16.msra.mxu1 %v1952_v52  ;;  %v4808_v51 = vpop.f32.mrb[7].mxu0  ;;  %v3597_v52 = vld [vmem:[#allocation3 + $0x60] ss:$8 sps:$4 sm:$0xff]  }
 0x1da   : > { %2098 = vmatprep.subr.bf16.mxu1 %v1906_v9  ;;  %3168 = vmatpush1.bf16.msra.mxu0 %v3594_v39  ;;  %v3603_v9 = vld [vmem:[#allocation3 + $0x70] ss:$8 sps:$4 sm:$0xff]   ;;  %v3635_v39 = vld [vmem:[#allocation3 + $0xc4] ss:$8 sps:$4 sm:$0xff]  }
 0x1db   : > { %3169 = vmatprep.subr.bf16.mxu0 %v3602_v16  ;;  %v3674_v16 = vld [vmem:[#allocation3 + $0x2f4] ss:$8 sps:$4 sm:$0xff]  }
 0x1dc   : > { %3371 = vmatmul.mubr.msk.bf16.vlgmr.msra.gmra.mrb[12].mxu1 %vm1421_vm6, %v4505_v18 }
 0x1dd   : > { %2099 = vmatpush1.bf16.msra.mxu1 %v1929_v57  ;;  %2130 = vmatprep.mubr.bf16.mxu1 %v3802_v53  ;;  %v3642_v57 = vld [vmem:[#allocation3 + $0x2a0] ss:$8 sps:$4 sm:$0xff]  }
 0x1de   : > { %2100 = vmatprep.subr.bf16.mxu1 %v1967_v54  ;;  %3170 = vmatpush1.bf16.msra.mxu0 %v3600_v63  ;;  %v3611_v54 = vld [vmem:[#allocation3 + $0x84] ss:$8 sps:$4 sm:$0xff]   ;;  %v3672_v63 = vld [vmem:[#allocation3 + $0x2f0] ss:$8 sps:$4 sm:$0xff]  }
 0x1df   : > { %3171 = vmatprep.subr.bf16.mxu0 %v3608_v10  ;;  %v3639_v10 = vld [vmem:[#allocation3 + $0xd0] ss:$8 sps:$4 sm:$0xff]  }
 0x1e1   : > { %2101 = vmatpush1.bf16.msra.mxu1 %v1964_v34  ;;  %v3617_v34 = vld [vmem:[#allocation3 + $0x94] ss:$8 sps:$4 sm:$0xff]  }
 0x1e2   : > { %2278 = vmatprep.subr.bf16.mxu1 %v2192_v36  ;;  %3172 = vmatpush1.bf16.msra.mxu0 %v3606_v5  ;;  %v3656_v36 = vld [vmem:[#allocation3 + $0x2c4] ss:$8 sps:$4 sm:$0xff]  }
 0x1e3   : > { %v4823_v46 = vpop.f32.mrb[8].mxu0  ;;  %3173 = vmatprep.subr.bf16.mxu0 %v3614_v28  ;;  %v3680_v5 = vld [vmem:[#allocation3 + $0x304] ss:$8 sps:$4 sm:$0xff]   ;;  %v3645_v28 = vld [vmem:[#allocation3 + $0xe0] ss:$8 sps:$4 sm:$0xff]  }
 0x1e4   : > { %3373 = vmatmul.mubr.msk.bf16.vlgmr.msra.gmra.mrb[16].mxu1 %vm1421_vm6, %v4505_v18  ;;  %v4832_v7 = vpop.f32.mrb[9].mxu0 }
 0x1e5   : > { %2279 = vmatpush1.bf16.msra.mxu1 %v2191_v3  ;;  %2310 = vmatprep.mubr.bf16.mxu1 %v3802_v53  ;;  %v4835_v44 = vpop.f32.mrb[10].mxu0  ;;  %v3623_v3 = vld [vmem:[#allocation3 + $0xa4] ss:$8 sps:$4 sm:$0xff]   ;;  %v4851_v6 = vpop.f32.mrb[0].mxu1 }
 0x1e6   : > { %2280 = vmatprep.subr.bf16.mxu1 %v2221_v48  ;;  %v4837_v49 = vpop.f32.mrb[11].mxu0  ;;  %3174 = vmatpush1.bf16.msra.mxu0 %v3612_v2  ;;  %v3654_v48 = vld [vmem:[#allocation3 + $0x2c0] ss:$8 sps:$4 sm:$0xff]   ;;  %v4853_v13 = vpop.f32.mrb[1].mxu1  ;;  %v3651_v2 = vld [vmem:[#allocation3 + $0xf0] ss:$8 sps:$4 sm:$0xff]  }
 0x1e7   : > { %3175 = vmatprep.subr.bf16.mxu0 %v3620_v41 }
 0x1e9   : > { %2281 = vmatpush1.bf16.msra.mxu1 %v2218_v50  ;;  %v3621_v50 = vld [vmem:[#allocation3 + $0xa0] ss:$8 sps:$4 sm:$0xff]  }
 0x1ea   : > { %2364 = vmatprep.subr.bf16.mxu1 %v2172_v27  ;;  %3176 = vmatpush1.bf16.msra.mxu0 %v3618_v31  ;;  %v3629_v27 = vld [vmem:[#allocation3 + $0xb4] ss:$8 sps:$4 sm:$0xff]  }
 0x1eb   : > { %3177 = vmatprep.subr.bf16.mxu0 %v3626_v61 }
 0x1ec   : > { %3375 = vmatmul.mubr.msk.bf16.vlgmr.msra.gmra.mrb[20].mxu1 %vm1421_vm6, %v4505_v18 }
 0x1ed   : > { %2365 = vmatpush1.bf16.msra.mxu1 %v2195_v14  ;;  %2396 = vmatprep.mubr.bf16.mxu1 %v3802_v53  ;;  %v3573_v53 = vld [vmem:[#allocation3 + $0x10] ss:$8 sps:$4 sm:$0xff]   ;;  %v3668_v14 = vld [vmem:[#allocation3 + $0x2e4] ss:$8 sps:$4 sm:$0xff]  }
 0x1ee   : > { %2366 = vmatprep.subr.bf16.mxu1 %v2233_v21  ;;  %3178 = vmatpush1.bf16.msra.mxu0 %v3624_v29  ;;  %v4855_v21 = vpop.f32.mrb[2].mxu1 }
 0x1ef   : > { %3179 = vmatprep.subr.bf16.mxu0 %v3632_v56 }
 0x1f1   : > { %2367 = vmatpush1.bf16.msra.mxu1 %v2230_v24  ;;  %v3666_v24 = vld [vmem:[#allocation3 + $0x2e0] ss:$8 sps:$4 sm:$0xff]  }
 0x1f2   : > { %3077 = vmatprep.subr.bf16.mxu1 %v3572_v23  ;;  %3180 = vmatpush1.bf16.msra.mxu0 %v3630_v20  ;;  %v4857_v23 = vpop.f32.mrb[3].mxu1 }
 0x1f3   : > { %3181 = vmatprep.subr.bf16.mxu0 %v3638_v12 }
 0x1f4   : > { %3377 = vmatmul.mubr.msk.bf16.vlgmr.msra.gmra.mrb[24].mxu1 %vm1421_vm6, %v4505_v18  ;;  %v3587_v18 = vld [vmem:[#allocation3 + $0x44] ss:$8 sps:$4 sm:$0xff]   ;;  %vm5118_vm6 = vcmask 523264  }
 0x1f5   : > { %3078 = vmatpush1.bf16.msra.mxu1 %v3570_v1  ;;  %v3633_v1 = vld [vmem:[#allocation3 + $0xc0] ss:$8 sps:$4 sm:$0xff]  }
 0x1f6   : > { %3079 = vmatprep.subr.bf16.mxu1 %v3575_v35  ;;  %3182 = vmatpush1.bf16.msra.mxu0 %v3636_v47  ;;  %v3641_v35 = vld [vmem:[#allocation3 + $0xd4] ss:$8 sps:$4 sm:$0xff]  }
 0x1f7   : > { %3183 = vmatprep.subr.bf16.mxu0 %v3644_v45 }
 0x1f9   : > { %3080 = vmatpush1.bf16.msra.mxu1 %v3573_v53  ;;  %v3647_v53 = vld [vmem:[#allocation3 + $0xe4] ss:$8 sps:$4 sm:$0xff]  }
 0x1fa   : > { %3081 = vmatprep.subr.bf16.mxu1 %v3578_v37  ;;  %3184 = vmatpush1.bf16.msra.mxu0 %v3642_v57  ;;  %v3653_v37 = vld [vmem:[#allocation3 + $0xf4] ss:$8 sps:$4 sm:$0xff]  }
 0x1fb   : > { %3185 = vmatprep.subr.bf16.mxu0 %v3650_v25 }
 0x1fd   : > { %3082 = vmatpush1.bf16.msra.mxu1 %v3576_v40  ;;  %v3659_v40 = vld [vmem:[#allocation3 + $0x104] ss:$8 sps:$4 sm:$0xff]  }
 0x1fe   : > { %3083 = vmatprep.subr.bf16.mxu1 %v3581_v22  ;;  %3186 = vmatpush1.bf16.msra.mxu0 %v3648_v26 }
 0x1ff   : > { %3187 = vmatprep.subr.bf16.mxu0 %v3656_v36 }
 0x201   : > { %3084 = vmatpush1.bf16.msra.mxu1 %v3579_v59 }
 0x202   : > { %3085 = vmatprep.subr.bf16.mxu1 %v3587_v18  ;;  %3188 = vmatpush1.bf16.msra.mxu0 %v3654_v48 }
 0x203   : > { %3189 = vmatprep.subr.bf16.mxu0 %v3662_v62  ;;  %v4869_v62 = vpop.permute.xlu0 %2430 }
 0x205   : > { %3086 = vmatpush1.bf16.msra.mxu1 %v3585_v32 }
 0x206   : > { %3087 = vmatprep.subr.bf16.mxu1 %v3593_v42  ;;  %3190 = vmatpush1.bf16.msra.mxu0 %v3660_v15 }
 0x207   : > { %3191 = vmatprep.subr.bf16.mxu0 %v3668_v14 }
 0x209   : > { %3088 = vmatpush1.bf16.msra.mxu1 %v3591_v17 }
 0x20a   : > { %3089 = vmatprep.subr.bf16.mxu1 %v3599_v33  ;;  %3192 = vmatpush1.bf16.msra.mxu0 %v3666_v24 }
 0x20b   : > { %3193 = vmatprep.subr.bf16.mxu0 %v3674_v16 }
 0x20d   : > { %3090 = vmatpush1.bf16.msra.mxu1 %v3597_v52 }
 0x20e   : > { %3091 = vmatprep.subr.bf16.mxu1 %v3605_v30  ;;  %3194 = vmatpush1.bf16.msra.mxu0 %v3672_v63 }
 0x20f   : > { %3206 = vmatprep.subr.bf16.mxu0 %v3680_v5 }
 0x211   : > { %3092 = vmatpush1.bf16.msra.mxu1 %v3603_v9 }
 0x212   : > { %3093 = vmatprep.subr.bf16.mxu1 %v3611_v54 }
 0x215   : > { %3094 = vmatpush1.bf16.msra.mxu1 %v3609_v60 }
 0x216   : > { %3095 = vmatprep.subr.bf16.mxu1 %v3617_v34 }
 0x219   : > { %3096 = vmatpush1.bf16.msra.mxu1 %v3615_v58  ;;  %v4867_v58 = vpop.permute.xlu1 %2425 }
 0x21a   : > { %3097 = vmatprep.subr.bf16.mxu1 %v3623_v3 }
 0x21d   : > { %3098 = vmatpush1.bf16.msra.mxu1 %v3621_v50 }
 0x21e   : > { %3099 = vmatprep.subr.bf16.mxu1 %v3629_v27 }
 0x221   : > { %3100 = vmatpush1.bf16.msra.mxu1 %v3627_v19 }
 0x222   : > { %3101 = vmatprep.subr.bf16.mxu1 %v3635_v39 }
 0x225   : > { %3102 = vmatpush1.bf16.msra.mxu1 %v3633_v1 }
 0x226   : > { %3103 = vmatprep.subr.bf16.mxu1 %v3641_v35 }
 0x229   : > { %3104 = vmatpush1.bf16.msra.mxu1 %v3639_v10 }
 0x22a   : > { %3105 = vmatprep.subr.bf16.mxu1 %v3647_v53 }
 0x22d   : > { %3106 = vmatpush1.bf16.msra.mxu1 %v3645_v28  ;;  %v3657_v28 = vld [vmem:[#allocation3 + $0x100] ss:$8 sps:$4 sm:$0xff]  }
 0x22e   : > { %3107 = vmatprep.subr.bf16.mxu1 %v3653_v37  ;;  %v3665_v37 = vld [vmem:[#allocation3 + $0x114] ss:$8 sps:$4 sm:$0xff]  }
 0x231   : > { %3108 = vmatpush1.bf16.msra.mxu1 %v3651_v2 }
 0x232   : > { %3120 = vmatprep.subr.bf16.mxu1 %v3659_v40 }
 0x266   : > { %v1737_v22 = vpop.f32.mrb[12].mxu0 }
 0x267   : > { %v1875_v59 = vmax.f32 %v4780_v8, %v1737_v22  ;;  %v1739_v41 = vpop.f32.mrb[13].mxu0 }
 0x268   : > { %v1876_v18 = vmax.f32 %v4783_v4, %v1739_v41  ;;  %v1741_v31 = vpop.f32.mrb[14].mxu0 }
 0x269   : > { %v1883_v61 = vmax.f32 %v4785_v38, %v1741_v31  ;;  %v1743_v29 = vpop.f32.mrb[15].mxu0 }
 0x26a   : > { %v1884_v32 = vmax.f32 %v4791_v11, %v1743_v29 }
 0x26e   : > { %v1823_v42 = vpop.f32.mrb[16].mxu0 }
 0x26f   : > { %v1879_v17 = vmax.f32 %v4823_v46, %v1823_v42  ;;  %v1825_v56 = vpop.f32.mrb[17].mxu0 }
 0x270   : > { %v1880_v33 = vmax.f32 %v4832_v7, %v1825_v56  ;;  %v1827_v20 = vpop.f32.mrb[18].mxu0 }
 0x271   : > { %v1887_v12 = vmax.f32 %v4835_v44, %v1827_v20  ;;  %v1829_v47 = vpop.f32.mrb[19].mxu0 }
 0x272   : > { %v1888_v8 = vmax.f32 %v4837_v49, %v1829_v47 }
 0x27a   : > { %v2003_v52 = vpop.f32.mrb[20].mxu0 }
 0x27b   : > { %v2141_v4 = vmax.f32 %v1875_v59, %v2003_v52  ;;  %v2005_v30 = vpop.f32.mrb[21].mxu0 }
 0x27c   : > { %v2142_v9 = vmax.f32 %v1876_v18, %v2005_v30  ;;  %v2007_v38 = vpop.f32.mrb[22].mxu0  ;;  %v3663_v18 = vld [vmem:[#allocation3 + $0x110] ss:$8 sps:$4 sm:$0xff]   ;;  %v3677_v30 = vld [vmem:[#allocation3 + $0x134] ss:$8 sps:$4 sm:$0xff]  }
 0x27d   : > { %v2149_v45 = vmax.f32 %v1883_v61, %v2007_v38  ;;  %v2009_v54 = vpop.f32.mrb[23].mxu0 }
 0x27e   : > { %v2150_v11 = vmax.f32 %v1884_v32, %v2009_v54  ;;  %v3671_v32 = vld [vmem:[#allocation3 + $0x124] ss:$8 sps:$4 sm:$0xff]  }
 0x282   : > { %v2089_v57 = vpop.f32.mrb[24].mxu0 }
 0x283   : > { %v2145_v60 = vmax.f32 %v1879_v17, %v2089_v57  ;;  %v2091_v46 = vpop.f32.mrb[25].mxu0 }
 0x284   : > { %v2146_v26 = vmax.f32 %v1880_v33, %v2091_v46  ;;  %v2093_v34 = vpop.f32.mrb[26].mxu0 }
 0x285   : > { %v2153_v7 = vmax.f32 %v1887_v12, %v2093_v34  ;;  %v2095_v25 = vpop.f32.mrb[27].mxu0  ;;  %v3669_v12 = vld [vmem:[#allocation3 + $0x120] ss:$8 sps:$4 sm:$0xff]  }
 0x286   : > { %v2154_v36 = vmax.f32 %v1888_v8, %v2095_v25  ;;  %v3686_v25 = vld [vmem:[#allocation3 + $0x314] ss:$8 sps:$4 sm:$0xff]  }
 0x28d   : > { %v2269_v44 = vpop.f32.mrb[28].mxu0 }
 0x28e   : > { %v2407_v49 = vmax.f32 %v2141_v4, %v2269_v44  ;;  %v2271_v48 = vpop.f32.mrb[29].mxu0  ;;  %v3684_v44 = vld [vmem:[#allocation3 + $0x310] ss:$8 sps:$4 sm:$0xff]  }
 0x28f   : > { %v2408_v3 = vmax.f32 %v2142_v9, %v2271_v48  ;;  %v2273_v50 = vpop.f32.mrb[30].mxu0  ;;  %v3692_v48 = vld [vmem:[#allocation3 + $0x324] ss:$8 sps:$4 sm:$0xff]  }
 0x290   : > { %v2415_v27 = vmax.f32 %v2149_v45, %v2273_v50  ;;  %v2275_v15 = vpop.f32.mrb[31].mxu0  ;;  %v2433_v19 = vadd.f32 %v4867_v58, %v2407_v49 }
 0x291   : > { %v2416_v14 = vmax.f32 %v2150_v11, %v2275_v15  ;;  %v2434_v39 = vadd.f32 %v4867_v58, %v2408_v3 }
 0x292   : > { %v2441_v24 = vadd.f32 %v4869_v62, %v2415_v27  ;;  %v2449_v16 = vmax.f32 %v2433_v19, 0.0 }
 0x293   : > { %v2442_v1 = vadd.f32 %v4869_v62, %v2416_v14  ;;  %v2450_v63 = vmax.f32 %v2434_v39, 0.0  ;;  %v3687_v14 = vld [vmem:[#allocation3 + $0x150] ss:$8 sps:$4 sm:$0xff]   ;;  %v3690_v39 = vld [vmem:[#allocation3 + $0x320] ss:$8 sps:$4 sm:$0xff]  }
 0x294   : > { %v2457_v35 = vmax.f32 %v2441_v24, 0.0  ;;  %v3698_v24 = vld [vmem:[#allocation3 + $0x334] ss:$8 sps:$4 sm:$0xff]  }
 0x295   : > { %v2458_v10 = vmax.f32 %v2442_v1, 0.0 }
 0x296   : > { %v2465_v5 = vpack.c.bf16 %v2457_v35, %v2449_v16  ;;  %v3693_v16 = vld [vmem:[#allocation3 + $0x160] ss:$8 sps:$4 sm:$0xff]   ;;  %v3696_v35 = vld [vmem:[#allocation3 + $0x330] ss:$8 sps:$4 sm:$0xff]  }
 0x297   : > { %v2466_v53 = vpack.c.bf16 %v2458_v10, %v2450_v63  ;;  %v3704_v10 = vld [vmem:[#allocation3 + $0x344] ss:$8 sps:$4 sm:$0xff]  }
 0x299   : > { %v2355_v2 = vpop.f32.mrb[32].mxu0  ;;  %3109 = vmatprep.mubr.bf16.mxu1 %v2466_v53 }
 0x29a   : > { %v2411_v40 = vmax.f32 %v2145_v60, %v2355_v2  ;;  %v2357_v22 = vpop.f32.mrb[33].mxu0  ;;  %3110 = vmatmul.mubr.bf16.vlgmr.msra.gmra.mrb[28].mxu1 %v2465_v5  ;;  %v3699_v2 = vld [vmem:[#allocation3 + $0x170] ss:$8 sps:$4 sm:$0xff]  }
 0x29b   : > { %v2412_v59 = vmax.f32 %v2146_v26, %v2357_v22  ;;  %3121 = vmatpush1.bf16.msra.mxu1 %v3657_v28  ;;  %v2359_v41 = vpop.f32.mrb[34].mxu0  ;;  %v3675_v26 = vld [vmem:[#allocation3 + $0x130] ss:$8 sps:$4 sm:$0xff]   ;;  %v3707_v22 = vld [vmem:[#allocation3 + $0x184] ss:$8 sps:$4 sm:$0xff]  }
 0x29c   : > { %v2437_v31 = vadd.f32 %v4867_v58, %v2411_v40  ;;  %v2419_v61 = vmax.f32 %v2153_v7, %v2359_v41  ;;  %v2361_v29 = vpop.f32.mrb[35].mxu0  ;;  %3122 = vmatprep.subr.bf16.mxu1 %v3665_v37  ;;  %v3678_v7 = vld [vmem:[#allocation3 + $0x300] ss:$8 sps:$4 sm:$0xff]  }
 0x29d   : > { %v2438_v42 = vadd.f32 %v4867_v58, %v2412_v59  ;;  %v2420_v17 = vmax.f32 %v2154_v36, %v2361_v29  ;;  %v3702_v40 = vld [vmem:[#allocation3 + $0x340] ss:$8 sps:$4 sm:$0xff]   ;;  %v3710_v59 = vld [vmem:[#allocation3 + $0x354] ss:$8 sps:$4 sm:$0xff]  }
 0x29e   : > { %v2445_v56 = vadd.f32 %v4869_v62, %v2419_v61  ;;  %v2453_v47 = vmax.f32 %v2437_v31, 0.0  ;;  %v3708_v31 = vld [vmem:[#allocation3 + $0x350] ss:$8 sps:$4 sm:$0xff]  }
 0x29f   : > { %v2446_v33 = vadd.f32 %v4869_v62, %v2420_v17  ;;  %3123 = vmatpush1.bf16.msra.mxu1 %v3663_v18  ;;  %v1780_v20 = vpop.f32.mrb[4].mxu1  ;;  %v2454_v9 = vmax.f32 %v2438_v42, 0.0  ;;  %v3705_v18 = vld [vmem:[#allocation3 + $0x180] ss:$8 sps:$4 sm:$0xff]   ;;  %v3716_v42 = vld [vmem:[#allocation3 + $0x364] ss:$8 sps:$4 sm:$0xff]  }
 0x2a0   : > { %v2461_v8 = vmax.f32 %v2445_v56, 0.0  ;;  %v1877_v52 = vmax.f32 %v4801_v43, %v1780_v20  ;;  %v1782_v4 = vpop.f32.mrb[5].mxu1  ;;  %3124 = vmatprep.subr.bf16.mxu1 %v3671_v32  ;;  %v3683_v43 = vld [vmem:[#allocation3 + $0x144] ss:$8 sps:$4 sm:$0xff]   ;;  %v3713_v32 = vld [vmem:[#allocation3 + $0x194] ss:$8 sps:$4 sm:$0xff]  }
 0x2a1   : > { %v2462_v38 = vmax.f32 %v2446_v33, 0.0  ;;  %v1878_v45 = vmax.f32 %v4804_v0, %v1782_v4  ;;  %v1784_v54 = vpop.f32.mrb[6].mxu1  ;;  %v3681_v0 = vld [vmem:[#allocation3 + $0x140] ss:$8 sps:$4 sm:$0xff]   ;;  %v3722_v4 = vld [vmem:[#allocation3 + $0x374] ss:$8 sps:$4 sm:$0xff]  }
 0x2a2   : > { %v2469_v11 = vpack.c.bf16 %v2461_v8, %v2453_v47  ;;  %v1885_v57 = vmax.f32 %v4806_v55, %v1784_v54  ;;  %v1786_v60 = vpop.f32.mrb[7].mxu1  ;;  %v3711_v47 = vld [vmem:[#allocation3 + $0x190] ss:$8 sps:$4 sm:$0xff]   ;;  %v3714_v8 = vld [vmem:[#allocation3 + $0x360] ss:$8 sps:$4 sm:$0xff]  }
 0x2a3   : > { %v1886_v46 = vmax.f32 %v4808_v51, %v1786_v60  ;;  %3125 = vmatpush1.bf16.msra.mxu1 %v3669_v12  ;;  %v2470_v34 = vpack.c.bf16 %v2462_v38, %v2454_v9  ;;  %v3689_v51 = vld [vmem:[#allocation3 + $0x154] ss:$8 sps:$4 sm:$0xff]   ;;  %v3717_v9 = vld [vmem:[#allocation3 + $0x1a0] ss:$8 sps:$4 sm:$0xff]   ;;  %v3720_v38 = vld [vmem:[#allocation3 + $0x370] ss:$8 sps:$4 sm:$0xff]  }
 0x2a4   : > { %3126 = vmatprep.subr.bf16.mxu1 %v3677_v30 }
 0x2a5   : > { %3195 = vmatprep.mubr.bf16.mxu0 %v2470_v34 }
 0x2a6   : > { %3196 = vmatmul.mubr.bf16.vlgmr.msra.gmra.mrb[36].mxu0 %v2469_v11  ;;  %v3725_v11 = vld [vmem:[#allocation3 + $0x1b4] ss:$8 sps:$4 sm:$0xff]  }
 0x2a7   : > { %3127 = vmatpush1.bf16.msra.mxu1 %v3675_v26  ;;  %3207 = vmatpush1.bf16.msra.mxu0 %v3678_v7  ;;  %v1866_v36 = vpop.f32.mrb[8].mxu1 }
 0x2a8   : > { %v1881_v49 = vmax.f32 %v4851_v6, %v1866_v36  ;;  %v1868_v55 = vpop.f32.mrb[9].mxu1  ;;  %3128 = vmatprep.subr.bf16.mxu1 %v3683_v43  ;;  %3208 = vmatprep.subr.bf16.mxu0 %v3686_v25  ;;  %v3695_v6 = vld [vmem:[#allocation3 + $0x164] ss:$8 sps:$4 sm:$0xff]   ;;  %v3723_v36 = vld [vmem:[#allocation3 + $0x1b0] ss:$8 sps:$4 sm:$0xff]  }
 0x2a9   : > { %v1882_v3 = vmax.f32 %v4853_v13, %v1868_v55  ;;  %v1870_v50 = vpop.f32.mrb[10].mxu1  ;;  %v3734_v55 = vld [vmem:[#allocation3 + $0x394] ss:$8 sps:$4 sm:$0xff]  }
 0x2aa   : > { %v1889_v27 = vmax.f32 %v4855_v21, %v1870_v50  ;;  %v1872_v15 = vpop.f32.mrb[11].mxu1  ;;  %v3701_v21 = vld [vmem:[#allocation3 + $0x174] ss:$8 sps:$4 sm:$0xff]   ;;  %v3729_v50 = vld [vmem:[#allocation3 + $0x1c0] ss:$8 sps:$4 sm:$0xff]  }
 0x2ab   : > { %v1890_v19 = vmax.f32 %v4857_v23, %v1872_v15  ;;  %3129 = vmatpush1.bf16.msra.mxu1 %v3681_v0  ;;  %3209 = vmatpush1.bf16.msra.mxu0 %v3684_v44  ;;  %v3726_v0 = vld [vmem:[#allocation3 + $0x380] ss:$8 sps:$4 sm:$0xff]  }
 0x2ac   : > { %3130 = vmatprep.subr.bf16.mxu1 %v3689_v51  ;;  %3210 = vmatprep.subr.bf16.mxu0 %v3692_v48 }
 0x2af   : > { %3131 = vmatpush1.bf16.msra.mxu1 %v3687_v14  ;;  %3211 = vmatpush1.bf16.msra.mxu0 %v3690_v39  ;;  %v2046_v1 = vpop.f32.mrb[12].mxu1  ;;  %v3732_v14 = vld [vmem:[#allocation3 + $0x390] ss:$8 sps:$4 sm:$0xff]  }
 0x2b0   : > { %v2143_v13 = vmax.f32 %v1877_v52, %v2046_v1  ;;  %v2048_v63 = vpop.f32.mrb[13].mxu1  ;;  %3132 = vmatprep.subr.bf16.mxu1 %v3695_v6  ;;  %3212 = vmatprep.subr.bf16.mxu0 %v3698_v24  ;;  %v3719_v52 = vld [vmem:[#allocation3 + $0x1a4] ss:$8 sps:$4 sm:$0xff]   ;;  %v3737_v1 = vld [vmem:[#allocation3 + $0x1d4] ss:$8 sps:$4 sm:$0xff]  }
 0x2b1   : > { %v2144_v23 = vmax.f32 %v1878_v45, %v2048_v63  ;;  %v2050_v5 = vpop.f32.mrb[14].mxu1  ;;  %v3740_v63 = vld [vmem:[#allocation3 + $0x3a4] ss:$8 sps:$4 sm:$0xff]  }
 0x2b2   : > { %v2151_v53 = vmax.f32 %v1885_v57, %v2050_v5  ;;  %v2052_v28 = vpop.f32.mrb[15].mxu1  ;;  %v3728_v57 = vld [vmem:[#allocation3 + $0x384] ss:$8 sps:$4 sm:$0xff]  }
 0x2b3   : > { %v2152_v37 = vmax.f32 %v1886_v46, %v2052_v28  ;;  %3133 = vmatpush1.bf16.msra.mxu1 %v3693_v16  ;;  %3213 = vmatpush1.bf16.msra.mxu0 %v3696_v35  ;;  %v3735_v28 = vld [vmem:[#allocation3 + $0x1d0] ss:$8 sps:$4 sm:$0xff]  }
 0x2b4   : > { %3134 = vmatprep.subr.bf16.mxu1 %v3701_v21  ;;  %3214 = vmatprep.subr.bf16.mxu0 %v3704_v10 }
 0x2b7   : > { %3135 = vmatpush1.bf16.msra.mxu1 %v3699_v2  ;;  %3215 = vmatpush1.bf16.msra.mxu0 %v3702_v40  ;;  %v2132_v41 = vpop.f32.mrb[16].mxu1  ;;  %v3743_v40 = vld [vmem:[#allocation3 + $0x1e4] ss:$8 sps:$4 sm:$0xff]  }
 0x2b8   : > { %v4887_v61 = vmax.f32 %v1881_v49, %v2132_v41  ;;  %v2134_v29 = vpop.f32.mrb[17].mxu1  ;;  %3136 = vmatprep.subr.bf16.mxu1 %v3707_v22  ;;  %3216 = vmatprep.subr.bf16.mxu0 %v3710_v59  ;;  %v3731_v49 = vld [vmem:[#allocation3 + $0x1c4] ss:$8 sps:$4 sm:$0xff]   ;;  %v3746_v22 = vld [vmem:[#allocation3 + $0x3b4] ss:$8 sps:$4 sm:$0xff]  }
 0x2b9   : > { %v4889_v17 = vmax.f32 %v1882_v3, %v2134_v29  ;;  %v2136_v56 = vpop.f32.mrb[18].mxu1  ;;  %v3744_v29 = vld [vmem:[#allocation3 + $0x3b0] ss:$8 sps:$4 sm:$0xff]  }
 0x2ba   : > { %v4891_v33 = vmax.f32 %v1889_v27, %v2136_v56  ;;  %v2138_v20 = vpop.f32.mrb[19].mxu1  ;;  %v3747_v56 = vld [vmem:[#allocation3 + $0x1f0] ss:$8 sps:$4 sm:$0xff]  }
 0x2bb   : > { %v4893_v12 = vmax.f32 %v1890_v19, %v2138_v20  ;;  %3137 = vmatpush1.bf16.msra.mxu1 %v3705_v18  ;;  %3217 = vmatpush1.bf16.msra.mxu0 %v3708_v31 }
 0x2bc   : > { %3138 = vmatprep.subr.bf16.mxu1 %v3713_v32  ;;  %3218 = vmatprep.subr.bf16.mxu0 %v3716_v42  ;;  %v3749_v42 = vld [vmem:[#allocation3 + $0x1f4] ss:$8 sps:$4 sm:$0xff]  }
 0x2bf   : > { %3139 = vmatpush1.bf16.msra.mxu1 %v3711_v47  ;;  %3219 = vmatpush1.bf16.msra.mxu0 %v3714_v8  ;;  %v2312_v30 = vpop.f32.mrb[20].mxu1 }
 0x2c0   : > { %v2409_v45 = vmax.f32 %v2143_v13, %v2312_v30  ;;  %v2314_v54 = vpop.f32.mrb[21].mxu1  ;;  %3140 = vmatprep.subr.bf16.mxu1 %v3719_v52  ;;  %3220 = vmatprep.subr.bf16.mxu0 %v3722_v4 }
 0x2c1   : > { %v2410_v60 = vmax.f32 %v2144_v23, %v2314_v54  ;;  %v2316_v46 = vpop.f32.mrb[22].mxu1 }
 0x2c2   : > { %v2435_v26 = vadd.f32 %v4867_v58, %v2409_v45  ;;  %v2417_v34 = vmax.f32 %v2151_v53, %v2316_v46  ;;  %v2318_v7 = vpop.f32.mrb[23].mxu1 }
 0x2c3   : > { %v2436_v43 = vadd.f32 %v4867_v58, %v2410_v60  ;;  %v2418_v25 = vmax.f32 %v2152_v37, %v2318_v7  ;;  %3141 = vmatpush1.bf16.msra.mxu1 %v3717_v9  ;;  %3221 = vmatpush1.bf16.msra.mxu0 %v3720_v38  ;;  %v3738_v37 = vld [vmem:[#allocation3 + $0x3a0] ss:$8 sps:$4 sm:$0xff]  }
 0x2c4   : > { %v2443_v44 = vadd.f32 %v4869_v62, %v2417_v34  ;;  %3142 = vmatprep.subr.bf16.mxu1 %v3725_v11  ;;  %3222 = vmatprep.subr.bf16.mxu0 %v3728_v57  ;;  %v2451_v48 = vmax.f32 %v2435_v26, 0.0 }
 0x2c5   : > { %v2444_v51 = vadd.f32 %v4869_v62, %v2418_v25  ;;  %v2452_v27 = vmax.f32 %v2436_v43, 0.0 }
 0x2c6   : > { %v2459_v3 = vmax.f32 %v2443_v44, 0.0 }
 0x2c7   : > { %v2460_v15 = vmax.f32 %v2444_v51, 0.0  ;;  %3143 = vmatpush1.bf16.msra.mxu1 %v3723_v36  ;;  %3223 = vmatpush1.bf16.msra.mxu0 %v3726_v0  ;;  %v2398_v19 = vpop.f32.mrb[24].mxu1 }
 0x2c8   : > { %v2467_v39 = vpack.c.bf16 %v2459_v3, %v2451_v48  ;;  %v2413_v6 = vmax.f32 %v4887_v61, %v2398_v19  ;;  %v2400_v24 = vpop.f32.mrb[25].mxu1  ;;  %3144 = vmatprep.subr.bf16.mxu1 %v3731_v49  ;;  %3224 = vmatprep.subr.bf16.mxu0 %v3734_v55 }
 0x2c9   : > { %v2414_v16 = vmax.f32 %v4889_v17, %v2400_v24  ;;  %v2402_v35 = vpop.f32.mrb[26].mxu1  ;;  %v2468_v13 = vpack.c.bf16 %v2460_v15, %v2452_v27 }
 0x2ca   : > { %v2439_v21 = vadd.f32 %v4867_v58, %v2413_v6  ;;  %v2421_v10 = vmax.f32 %v4891_v33, %v2402_v35  ;;  %v2404_v23 = vpop.f32.mrb[27].mxu1 }
 0x2cb   : > { %v2440_v5 = vadd.f32 %v4867_v58, %v2414_v16  ;;  %v2422_v53 = vmax.f32 %v4893_v12, %v2404_v23  ;;  %3145 = vmatpush1.bf16.msra.mxu1 %v3729_v50  ;;  %3225 = vmatpush1.bf16.msra.mxu0 %v3732_v14  ;;  %v3741_v58 = vld [vmem:[#allocation3 + $0x1e0] ss:$8 sps:$4 sm:$0xff]  }
 0x2cc   : > { %v2447_v2 = vadd.f32 %v4869_v62, %v2421_v10  ;;  %3152 = vmatprep.mubr.bf16.mxu1 %v2468_v13  ;;  %3146 = vmatprep.subr.bf16.mxu1 %v3737_v1  ;;  %v2455_v41 = vmax.f32 %v2439_v21, 0.0 }
 0x2cd   : > { %v2448_v59 = vadd.f32 %v4869_v62, %v2422_v53  ;;  %3226 = vmatprep.subr.bf16.mxu0 %v3740_v63  ;;  %v2456_v31 = vmax.f32 %v2440_v5, 0.0 }
 0x2ce   : > { %v2463_v18 = vmax.f32 %v2447_v2, 0.0 }
 0x2cf   : > { %v2464_v61 = vmax.f32 %v2448_v59, 0.0  ;;  %3147 = vmatpush1.bf16.msra.mxu1 %v3735_v28  ;;  %3227 = vmatpush1.bf16.msra.mxu0 %v3738_v37 }
 0x2d0   : > { %v2471_v32 = vpack.c.bf16 %v2463_v18, %v2455_v41  ;;  %3148 = vmatprep.subr.bf16.mxu1 %v3743_v40  ;;  %3228 = vmatprep.subr.bf16.mxu0 %v3746_v22 }
 0x2d1   : > { %v2472_v17 = vpack.c.bf16 %v2464_v61, %v2456_v31 }
 0x2d3   : > { %3149 = vmatpush1.bf16.msra.mxu1 %v3741_v58  ;;  %3229 = vmatpush1.bf16.msra.mxu0 %v3744_v29 }
 0x2d4   : > { %3498 = vmatprep.mubr.msk.bf16.mxu0 %vm5118_vm6, %v2472_v17  ;;  %3150 = vmatprep.subr.bf16.mxu1 %v3749_v42 }
 0x2d6   : > { %3239 = vmatmul.mubr.bf16.vlgmr.msra.gmra.mrb[36].mxu0 %v2471_v32 }
 0x2d7   : > { %3151 = vmatpush1.bf16.msra.mxu1 %v3747_v56 }
 0x2da   : > { %3153 = vmatmul.mubr.bf16.vlgmr.msra.gmra.mrb[28].mxu1 %v2467_v39 }
 0x3a9   : > { %v3240_v62 = vpop.f32.mrb[36].mxu0 }
 0x3aa   : > { %v3242_v33 = vpop.f32.mrb[37].mxu0 }
 0x3ab   : > { %v3244_v20 = vpop.f32.mrb[38].mxu0 }
 0x3ac   : > { %v3246_v12 = vpop.f32.mrb[39].mxu0 }
 0x3ad   : > { %v3154_v47 = vpop.f32.mrb[28].mxu1 }
 0x3ae   : > { %v3506_v8 = vadd.f32 %v3240_v62, %v3154_v47  ;;  %v3156_v52 = vpop.f32.mrb[29].mxu1 }
 0x3af   : > { %v3507_v4 = vadd.f32 %v3242_v33, %v3156_v52  ;;  %v3158_v30 = vpop.f32.mrb[30].mxu1 }
 0x3b0   : > { %v3508_v9 = vadd.f32 %v3244_v20, %v3158_v30  ;;  %v3160_v38 = vpop.f32.mrb[31].mxu1 }
 0x3b1   : > { %v3504_v45 = vpack.c.bf16 %v3507_v4, %v3506_v8  ;;  %v3509_v54 = vadd.f32 %v3246_v12, %v3160_v38 }
 0x3b3   : > { %3261 = vst [vmem:[%s212_s30] sm:$0xff] %v3504_v45  ;;  %v3505_v11 = vpack.c.bf16 %v3509_v54, %v3508_v9 }
 0x3b5   : > { %3262 = vst [vmem:[%s212_s30 + $0x8] sm:$0xff] %v3505_v11 }
 0x3b6 PF: > { %s15_s15 = sadd.s32 1, %s3788_s15  }
 0x3b7   : > { %p12_p3 = scmp.ge.s32.totalorder %s15_s15, 4  }
 0x3b9   :  { %14 = sbr.rel (!%p12_p3) target bundleno = 1 (0x1), region = 71 }
 0x3c0   :  { %3284 = vsyncpa [#allocation4], 1 }
 0x3c1   :  { %3286 = vsyncpa [#allocation4 + $0x1], 1 }

</bundles_post_ra>
